<compile_context>
chip_gen: v7x
topology: tpu7x:2x2x1
jax: 0.10.0
libtpu: 0.0.40
codegen_flags: <defaults>
</compile_context>

<pallas_src>
import jax
import jax.numpy as jnp
from jax.experimental import pallas as pl
from jax.experimental.pallas import tpu as pltpu


LATENT = 128          # latent_dim of both encoders and drone feature width
DRONE_PAD_K = 128     # drone_info contraction dim padded 46 -> 128
OUT_PAD_N = 128       # final reward layer padded 1 -> 128 (lane-dense store)
M_PAD = 16            # batch padded up to a multiple of 16 (bf16 sublane pack)

# ---- static row offsets inside the three packed bf16 weight slabs ----------
# w512 slab (width 512): om1, pm1, r1o, r1p, r1d
OM1_R, PM1_R = 0, 1024
R1O_R, R1P_R, R1D_R = 2048, 2176, 2304
W512_ROWS = 2432
# w256 slab (width 256): om2, pm2, dw1, rw2
OM2_R, PM2_R, DW1_R, RW2_R = 0, 512, 1024, 1152
W256_ROWS = 1664
# w128 slab (width 128): ofw, pfw, dw2, rw3, rw4(pad), rw5(pad)
OFW_R, PFW_R, DW2_R, RW3_R, RW4_R, RW5_R = 0, 256, 512, 768, 1024, 1152
W128_ROWS = 1280
# bias slab rows (f32, (16, 512), each bias zero-padded to width 512)
(B_OB1, B_OB2, B_OFB, B_PB1, B_PB2, B_PFB,
 B_DB1, B_DB2, B_RB1, B_RB2, B_RB3, B_RB4, B_RB5) = range(13)
N_BIAS_ROWS = 16


# ----------------------------------------------------------------------------
# Single fused Pallas kernel: whole forward pass.
# ----------------------------------------------------------------------------
def _fused_forward_kernel(obs_ref, path_ref, drone_ref,
                          w512_ref, w256_ref, w128_ref, bias_ref, o_ref):
    f32 = jnp.float32
    bf16 = jnp.bfloat16

    def dense(x, w_ref, r0, k, n, b_row, relu):
        # bf16 MXU operands (static slab slices), f32 accumulation; bias/ReLU f32.
        w = w_ref[r0:r0 + k, 0:n]
        b = bias_ref[b_row:b_row + 1, 0:n]
        h = jnp.dot(x, w, preferred_element_type=f32) + b
        return jnp.maximum(h, 0.0) if relu else h

    def encoder(x, m1_r, b1, m2_r, b2, fw_r, bfc):
        h = dense(x, w512_ref, m1_r, 1024, 512, b1, True).astype(bf16)  # conv1+ReLU
        h = dense(h, w256_ref, m2_r, 512, 256, b2, True).astype(bf16)   # conv2+ReLU
        return dense(h, w128_ref, fw_r, 256, 128, bfc, False)           # fc_enc; dropout=id (eval)

    obs_f = encoder(obs_ref[...], OM1_R, B_OB1, OM2_R, B_OB2, OFW_R, B_OFB)   # (M,128) f32
    path_f = encoder(path_ref[...], PM1_R, B_PB1, PM2_R, B_PB2, PFW_R, B_PFB)  # (M,128) f32

    d = dense(drone_ref[...], w256_ref, DW1_R, 128, 256, B_DB1, True).astype(bf16)  # (M,256)
    drone_f = dense(d, w128_ref, DW2_R, 256, 128, B_DB2, False)                     # (M,128) f32

    # concat([obs, path, drone]) @ Wr1  ==  sum of three split matmuls
    h = (jnp.dot(obs_f.astype(bf16), w512_ref[R1O_R:R1O_R + 128, :],
                 preferred_element_type=f32)
         + jnp.dot(path_f.astype(bf16), w512_ref[R1P_R:R1P_R + 128, :],
                   preferred_element_type=f32)
         + jnp.dot(drone_f.astype(bf16), w512_ref[R1D_R:R1D_R + 128, :],
                   preferred_element_type=f32)
         + bias_ref[B_RB1:B_RB1 + 1, 0:512])
    h = jnp.maximum(h, 0.0).astype(bf16)                                # (M, 512)
    h = dense(h, w256_ref, RW2_R, 512, 256, B_RB2, True).astype(bf16)   # (M, 256)
    h = dense(h, w128_ref, RW3_R, 256, 128, B_RB3, True).astype(bf16)   # (M, 128)
    h = dense(h, w128_ref, RW4_R, 128, 128, B_RB4, True).astype(bf16)   # (M, 128) lane-dense (64 real + 64 zero)
    h = dense(h, w128_ref, RW5_R, 128, 128, B_RB5, False)               # (M, 128) padded; col 0 is the reward

    # exact sigmoid (perf review: drop approx reciprocal + clip)
    o_ref[...] = (1.0 / (1.0 + jnp.exp(-h))).astype(o_ref.dtype)


# ----------------------------------------------------------------------------
# Parameter initialization (deterministic, synthetic — same scheme as before)
# ----------------------------------------------------------------------------
def init_linear(key, fan_in, fan_out):
    k1, k2 = jax.random.split(key)
    w = jax.random.normal(k1, (fan_in, fan_out), jnp.float32) / jnp.sqrt(float(fan_in))
    b = 0.01 * jax.random.normal(k2, (fan_out,), jnp.float32)
    return w, b


def init_conv(key, cout, cin, kh, kw):
    k1, k2 = jax.random.split(key)
    fan_in = cin * kh * kw
    w = jax.random.normal(k1, (cout, cin, kh, kw), jnp.float32) / jnp.sqrt(float(fan_in))
    b = 0.01 * jax.random.normal(k2, (cout,), jnp.float32)
    return w, b


def init_cnn_encoder(key, cin, spatial, latent_dim=LATENT):
    """Synthetic stand-in for the frozen obstacle/path encoders:
    encoder = Conv(cin->8,3,s2,p1)+ReLU -> Conv(8->16,3,s2,p1)+ReLU
    fc_enc  = Linear(16 * (spatial//4)**2, latent_dim)."""
    k1, k2, k3 = jax.random.split(key, 3)
    conv1 = init_conv(k1, 8, cin, 3, 3)
    conv2 = init_conv(k2, 16, 8, 3, 3)
    flat_dim = 16 * (spatial // 4) * (spatial // 4)
    fc = init_linear(k3, flat_dim, latent_dim)
    return {"conv1": conv1, "conv2": conv2, "fc_enc": fc}


def init_model(key, drone_info_dim=46, cin=4, spatial=16, latent_dim=LATENT):
    keys = jax.random.split(key, 9)
    return {
        "obstacle_encoder": init_cnn_encoder(keys[0], cin, spatial, latent_dim),
        "path_encoder": init_cnn_encoder(keys[1], cin, spatial, latent_dim),
        "drone_fc1": init_linear(keys[2], drone_info_dim, 256),
        "drone_fc2": init_linear(keys[3], 256, 128),
        "reward": [
            init_linear(keys[4], latent_dim + latent_dim + 128, 512),
            init_linear(keys[5], 512, 256),
            init_linear(keys[6], 256, 128),
            init_linear(keys[7], 128, 64),
            init_linear(keys[8], 64, 1),
        ],
    }


# ----------------------------------------------------------------------------
# One-time parameter preparation (outside the timed forward):
#   * convs -> exact dense matrices (NCHW/torch.flatten ordering preserved)
#   * K/N padding to lane/sublane-friendly sizes
#   * everything packed into 3 bf16 weight slabs + 1 f32 bias slab (4 DMAs)
# ----------------------------------------------------------------------------
def _conv_as_dense(w, b, in_hw, stride, pad):
    """w: (Cout,Cin,kh,kw). Returns (Cin*H*W, Cout*OH*OW) matrix + expanded bias,
    with channel-major flattening on both sides (matches torch.flatten of NCHW)."""
    cout, cin, kh, kw = w.shape
    H, W = in_hw
    eye = jnp.eye(cin * H * W, dtype=jnp.float32).reshape(cin * H * W, cin, H, W)
    y = jax.lax.conv_general_dilated(
        eye, w.astype(jnp.float32),
        window_strides=(stride, stride),
        padding=((pad, pad), (pad, pad)),
        dimension_numbers=("NCHW", "OIHW", "NCHW"))          # (CHW, Cout, OH, OW)
    oh, ow = y.shape[2], y.shape[3]
    wmat = y.reshape(cin * H * W, cout * oh * ow)
    bvec = jnp.repeat(b, oh * ow)                            # channel-major bias
    return wmat, bvec


def prepare_params(params, spatial=16, drone_info_dim=46, latent_dim=LATENT):
    def enc_mats(enc):
        w1, b1 = enc["conv1"]
        w2, b2 = enc["conv2"]
        m1, bv1 = _conv_as_dense(w1, b1, (spatial, spatial), stride=2, pad=1)
        s2 = spatial // 2
        m2, bv2 = _conv_as_dense(w2, b2, (s2, s2), stride=2, pad=1)
        wf, bfc = enc["fc_enc"]
        return m1, bv1, m2, bv2, wf, bfc

    om1, ob1, om2, ob2, ofw, ofb = enc_mats(params["obstacle_encoder"])
    pm1, pb1, pm2, pb2, pfw, pfb = enc_mats(params["path_encoder"])

    # drone_info_encoder: pad K 46 -> 128 with zero rows (exactly equivalent).
    dw1, db1 = params["drone_fc1"]
    dw1 = jnp.pad(dw1, ((0, DRONE_PAD_K - drone_info_dim), (0, 0)))
    dw2, db2 = params["drone_fc2"]

    # reward_predictor: layer-1 split by feature source; tail padded lane-dense.
    (wr1, rb1), (wr2, rb2), (wr3, rb3), (wr4, rb4), (wr5, rb5) = params["reward"]
    d_out = dw2.shape[1]
    r1o = wr1[:latent_dim]
    r1p = wr1[latent_dim:2 * latent_dim]
    r1d = wr1[2 * latent_dim:2 * latent_dim + d_out]
    wr4p = jnp.pad(wr4, ((0, 0), (0, 128 - wr4.shape[1])))                       # (128,128)
    wr5p = jnp.pad(wr5, ((0, 128 - wr5.shape[0]), (0, OUT_PAD_N - wr5.shape[1])))  # (128,128)
    rb4p = jnp.pad(rb4, ((0, 128 - rb4.shape[0]),))
    rb5p = jnp.pad(rb5, ((0, OUT_PAD_N - rb5.shape[0]),))

    bf = jnp.bfloat16
    w512 = jnp.concatenate([om1, pm1, r1o, r1p, r1d], axis=0).astype(bf)
    w256 = jnp.concatenate([om2, pm2, dw1, wr2], axis=0).astype(bf)
    w128 = jnp.concatenate([ofw, pfw, dw2, wr3, wr4p, wr5p], axis=0).astype(bf)
    assert w512.shape == (W512_ROWS, 512)
    assert w256.shape == (W256_ROWS, 256)
    assert w128.shape == (W128_ROWS, 128)

    def brow(b):
        return jnp.pad(b.astype(jnp.float32), ((0, 512 - b.shape[0]),))
    bias_rows = [ob1, ob2, ofb, pb1, pb2, pfb, db1, db2,
                 rb1, rb2, rb3, rb4p, rb5p]
    bias = jnp.stack([brow(b) for b in bias_rows], axis=0)
    bias = jnp.pad(bias, ((0, N_BIAS_ROWS - bias.shape[0]), (0, 0)))
    assert bias.shape == (N_BIAS_ROWS, 512)

    return w512, w256, w128, bias


# ----------------------------------------------------------------------------
# Forward pass (matches RewardModelOverfitting.forward, eval mode)
# ----------------------------------------------------------------------------
def reward_model_forward(prepped, drone_info, obs, path):
    n = drone_info.shape[0]
    m = ((n + M_PAD - 1) // M_PAD) * M_PAD                       # batch pad -> mult of 16
    # NCHW flatten (== torch.flatten(x, start_dim=1)); dense conv matrices use
    # the same channel-major ordering, so no transposes are needed anywhere.
    obs_flat = jnp.pad(obs.reshape(n, -1).astype(jnp.bfloat16), ((0, m - n), (0, 0)))
    path_flat = jnp.pad(path.reshape(n, -1).astype(jnp.bfloat16), ((0, m - n), (0, 0)))
    d_pad = jnp.pad(drone_info.astype(jnp.bfloat16),
                    ((0, m - n), (0, DRONE_PAD_K - drone_info.shape[1])))

    w512, w256, w128, bias = prepped
    vmem = pl.BlockSpec(memory_space=pltpu.MemorySpace.VMEM)
    # Single fused kernel, no grid: 4 packed parameter slabs (~3.7 MB bf16) +
    # padded activations all live in VMEM on v5e/v6e/v7x.
    out = pl.pallas_call(
        _fused_forward_kernel,
        out_shape=jax.ShapeDtypeStruct((m, OUT_PAD_N), jnp.float32),
        in_specs=[vmem] * 7,
        out_specs=vmem,
    )(obs_flat, path_flat, d_pad, w512, w256, w128, bias)
    return out[:n, :1]


# ----------------------------------------------------------------------------
# Main
# ----------------------------------------------------------------------------
if __name__ == "__main__":
    key = jax.random.PRNGKey(0)
    k_params, k_drone, k_obs, k_path = jax.random.split(key, 4)

    batch, drone_info_dim, cin, spatial = 2, 46, 4, 16
    params = init_model(k_params, drone_info_dim=drone_info_dim, cin=cin,
                        spatial=spatial, latent_dim=LATENT)
    prepped = prepare_params(params, spatial=spatial,
                             drone_info_dim=drone_info_dim, latent_dim=LATENT)

    drone_info = jax.random.normal(k_drone, (batch, drone_info_dim), jnp.float32)
    obs = jax.random.normal(k_obs, (batch, cin, spatial, spatial), jnp.float32)
    path = jax.random.normal(k_path, (batch, cin, spatial, spatial), jnp.float32)

    fwd = jax.jit(reward_model_forward)
    reward = fwd(prepped, drone_info, obs, path)
    reward = jax.block_until_ready(reward)

    assert reward.shape == (batch, 1)
    assert bool(jnp.all((reward >= 0.0) & (reward <= 1.0)))
    print("KERNEL_OK")
</pallas_src>

<mosaic_0001>
module attributes {stable_mosaic.version = 11 : i64} {
  func.func @_fused_forward_kernel(%arg0: memref<16x1024xbf16, #tpu.memory_space<vmem>>, %arg1: memref<16x1024xbf16, #tpu.memory_space<vmem>>, %arg2: memref<16x128xbf16, #tpu.memory_space<vmem>>, %arg3: memref<2432x512xbf16, #tpu.memory_space<vmem>>, %arg4: memref<1664x256xbf16, #tpu.memory_space<vmem>>, %arg5: memref<1280x128xbf16, #tpu.memory_space<vmem>>, %arg6: memref<16x512xf32, #tpu.memory_space<vmem>>, %arg7: memref<16x128xf32, #tpu.memory_space<vmem>>) attributes {dimension_semantics = [], scalar_prefetch = 0 : i64, scratch_operands = 0 : i64, tpu.core_type = #tpu.core_type<tc>} {
    %c0 = arith.constant 0 : index
    %c0_0 = arith.constant 0 : index
    %0 = vector.load %arg0[%c0, %c0_0] : memref<16x1024xbf16, #tpu.memory_space<vmem>>, vector<16x1024xbf16>
    %c0_1 = arith.constant 0 : index
    %c0_2 = arith.constant 0 : index
    %1 = vector.load %arg3[%c0_1, %c0_2] : memref<2432x512xbf16, #tpu.memory_space<vmem>>, vector<1024x512xbf16>
    %c0_3 = arith.constant 0 : index
    %c0_4 = arith.constant 0 : index
    %2 = vector.load %arg6[%c0_3, %c0_4] : memref<16x512xf32, #tpu.memory_space<vmem>>, vector<1x512xf32>
    %cst = arith.constant dense<0.000000e+00> : vector<16x512xf32>
    %3 = tpu.matmul %0, %1, %cst {dimension_numbers = #tpu.dot_dimension_numbers<[1], [0], [0], [1], [0, 0, 1, 1], [], []>} : vector<16x1024xbf16>, vector<1024x512xbf16>, vector<16x512xf32> -> vector<16x512xf32>
    %4 = vector.broadcast %2 : vector<1x512xf32> to vector<16x512xf32>
    %5 = arith.addf %3, %4 : vector<16x512xf32>
    %cst_5 = arith.constant 0.000000e+00 : f32
    %6 = vector.broadcast %cst_5 : f32 to vector<16x512xf32>
    %7 = arith.maximumf %5, %6 : vector<16x512xf32>
    %8 = arith.truncf %7 : vector<16x512xf32> to vector<16x512xbf16>
    %c0_6 = arith.constant 0 : index
    %c0_7 = arith.constant 0 : index
    %9 = vector.load %arg4[%c0_6, %c0_7] : memref<1664x256xbf16, #tpu.memory_space<vmem>>, vector<512x256xbf16>
    %c1 = arith.constant 1 : index
    %c0_8 = arith.constant 0 : index
    %10 = vector.load %arg6[%c1, %c0_8] : memref<16x512xf32, #tpu.memory_space<vmem>>, vector<1x256xf32>
    %cst_9 = arith.constant dense<0.000000e+00> : vector<16x256xf32>
    %11 = tpu.matmul %8, %9, %cst_9 {dimension_numbers = #tpu.dot_dimension_numbers<[1], [0], [0], [1], [0, 0, 1, 1], [], []>} : vector<16x512xbf16>, vector<512x256xbf16>, vector<16x256xf32> -> vector<16x256xf32>
    %12 = vector.broadcast %10 : vector<1x256xf32> to vector<16x256xf32>
    %13 = arith.addf %11, %12 : vector<16x256xf32>
    %cst_10 = arith.constant 0.000000e+00 : f32
    %14 = vector.broadcast %cst_10 : f32 to vector<16x256xf32>
    %15 = arith.maximumf %13, %14 : vector<16x256xf32>
    %16 = arith.truncf %15 : vector<16x256xf32> to vector<16x256xbf16>
    %c0_11 = arith.constant 0 : index
    %c0_12 = arith.constant 0 : index
    %17 = vector.load %arg5[%c0_11, %c0_12] : memref<1280x128xbf16, #tpu.memory_space<vmem>>, vector<256x128xbf16>
    %c2 = arith.constant 2 : index
    %c0_13 = arith.constant 0 : index
    %18 = vector.load %arg6[%c2, %c0_13] : memref<16x512xf32, #tpu.memory_space<vmem>>, vector<1x128xf32>
    %cst_14 = arith.constant dense<0.000000e+00> : vector<16x128xf32>
    %19 = tpu.matmul %16, %17, %cst_14 {dimension_numbers = #tpu.dot_dimension_numbers<[1], [0], [0], [1], [0, 0, 1, 1], [], []>} : vector<16x256xbf16>, vector<256x128xbf16>, vector<16x128xf32> -> vector<16x128xf32>
    %20 = vector.broadcast %18 : vector<1x128xf32> to vector<16x128xf32>
    %21 = arith.addf %19, %20 : vector<16x128xf32>
    %c0_15 = arith.constant 0 : index
    %c0_16 = arith.constant 0 : index
    %22 = vector.load %arg1[%c0_15, %c0_16] : memref<16x1024xbf16, #tpu.memory_space<vmem>>, vector<16x1024xbf16>
    %c1024 = arith.constant 1024 : index
    %c0_17 = arith.constant 0 : index
    %23 = vector.load %arg3[%c1024, %c0_17] : memref<2432x512xbf16, #tpu.memory_space<vmem>>, vector<1024x512xbf16>
    %c3 = arith.constant 3 : index
    %c0_18 = arith.constant 0 : index
    %24 = vector.load %arg6[%c3, %c0_18] : memref<16x512xf32, #tpu.memory_space<vmem>>, vector<1x512xf32>
    %cst_19 = arith.constant dense<0.000000e+00> : vector<16x512xf32>
    %25 = tpu.matmul %22, %23, %cst_19 {dimension_numbers = #tpu.dot_dimension_numbers<[1], [0], [0], [1], [0, 0, 1, 1], [], []>} : vector<16x1024xbf16>, vector<1024x512xbf16>, vector<16x512xf32> -> vector<16x512xf32>
    %26 = vector.broadcast %24 : vector<1x512xf32> to vector<16x512xf32>
    %27 = arith.addf %25, %26 : vector<16x512xf32>
    %cst_20 = arith.constant 0.000000e+00 : f32
    %28 = vector.broadcast %cst_20 : f32 to vector<16x512xf32>
    %29 = arith.maximumf %27, %28 : vector<16x512xf32>
    %30 = arith.truncf %29 : vector<16x512xf32> to vector<16x512xbf16>
    %c512 = arith.constant 512 : index
    %c0_21 = arith.constant 0 : index
    %31 = vector.load %arg4[%c512, %c0_21] : memref<1664x256xbf16, #tpu.memory_space<vmem>>, vector<512x256xbf16>
    %c4 = arith.constant 4 : index
    %c0_22 = arith.constant 0 : index
    %32 = vector.load %arg6[%c4, %c0_22] : memref<16x512xf32, #tpu.memory_space<vmem>>, vector<1x256xf32>
    %cst_23 = arith.constant dense<0.000000e+00> : vector<16x256xf32>
    %33 = tpu.matmul %30, %31, %cst_23 {dimension_numbers = #tpu.dot_dimension_numbers<[1], [0], [0], [1], [0, 0, 1, 1], [], []>} : vector<16x512xbf16>, vector<512x256xbf16>, vector<16x256xf32> -> vector<16x256xf32>
    %34 = vector.broadcast %32 : vector<1x256xf32> to vector<16x256xf32>
    %35 = arith.addf %33, %34 : vector<16x256xf32>
    %cst_24 = arith.constant 0.000000e+00 : f32
    %36 = vector.broadcast %cst_24 : f32 to vector<16x256xf32>
    %37 = arith.maximumf %35, %36 : vector<16x256xf32>
    %38 = arith.truncf %37 : vector<16x256xf32> to vector<16x256xbf16>
    %c256 = arith.constant 256 : index
    %c0_25 = arith.constant 0 : index
    %39 = vector.load %arg5[%c256, %c0_25] : memref<1280x128xbf16, #tpu.memory_space<vmem>>, vector<256x128xbf16>
    %c5 = arith.constant 5 : index
    %c0_26 = arith.constant 0 : index
    %40 = vector.load %arg6[%c5, %c0_26] : memref<16x512xf32, #tpu.memory_space<vmem>>, vector<1x128xf32>
    %cst_27 = arith.constant dense<0.000000e+00> : vector<16x128xf32>
    %41 = tpu.matmul %38, %39, %cst_27 {dimension_numbers = #tpu.dot_dimension_numbers<[1], [0], [0], [1], [0, 0, 1, 1], [], []>} : vector<16x256xbf16>, vector<256x128xbf16>, vector<16x128xf32> -> vector<16x128xf32>
    %42 = vector.broadcast %40 : vector<1x128xf32> to vector<16x128xf32>
    %43 = arith.addf %41, %42 : vector<16x128xf32>
    %c0_28 = arith.constant 0 : index
    %c0_29 = arith.constant 0 : index
    %44 = vector.load %arg2[%c0_28, %c0_29] : memref<16x128xbf16, #tpu.memory_space<vmem>>, vector<16x128xbf16>
    %c1024_30 = arith.constant 1024 : index
    %c0_31 = arith.constant 0 : index
    %45 = vector.load %arg4[%c1024_30, %c0_31] : memref<1664x256xbf16, #tpu.memory_space<vmem>>, vector<128x256xbf16>
    %c6 = arith.constant 6 : index
    %c0_32 = arith.constant 0 : index
    %46 = vector.load %arg6[%c6, %c0_32] : memref<16x512xf32, #tpu.memory_space<vmem>>, vector<1x256xf32>
    %cst_33 = arith.constant dense<0.000000e+00> : vector<16x256xf32>
    %47 = tpu.matmul %44, %45, %cst_33 {dimension_numbers = #tpu.dot_dimension_numbers<[1], [0], [0], [1], [0, 0, 1, 1], [], []>} : vector<16x128xbf16>, vector<128x256xbf16>, vector<16x256xf32> -> vector<16x256xf32>
    %48 = vector.broadcast %46 : vector<1x256xf32> to vector<16x256xf32>
    %49 = arith.addf %47, %48 : vector<16x256xf32>
    %cst_34 = arith.constant 0.000000e+00 : f32
    %50 = vector.broadcast %cst_34 : f32 to vector<16x256xf32>
    %51 = arith.maximumf %49, %50 : vector<16x256xf32>
    %52 = arith.truncf %51 : vector<16x256xf32> to vector<16x256xbf16>
    %c512_35 = arith.constant 512 : index
    %c0_36 = arith.constant 0 : index
    %53 = vector.load %arg5[%c512_35, %c0_36] : memref<1280x128xbf16, #tpu.memory_space<vmem>>, vector<256x128xbf16>
    %c7 = arith.constant 7 : index
    %c0_37 = arith.constant 0 : index
    %54 = vector.load %arg6[%c7, %c0_37] : memref<16x512xf32, #tpu.memory_space<vmem>>, vector<1x128xf32>
    %cst_38 = arith.constant dense<0.000000e+00> : vector<16x128xf32>
    %55 = tpu.matmul %52, %53, %cst_38 {dimension_numbers = #tpu.dot_dimension_numbers<[1], [0], [0], [1], [0, 0, 1, 1], [], []>} : vector<16x256xbf16>, vector<256x128xbf16>, vector<16x128xf32> -> vector<16x128xf32>
    %56 = vector.broadcast %54 : vector<1x128xf32> to vector<16x128xf32>
    %57 = arith.addf %55, %56 : vector<16x128xf32>
    %58 = arith.truncf %21 : vector<16x128xf32> to vector<16x128xbf16>
    %c2048 = arith.constant 2048 : index
    %c0_39 = arith.constant 0 : index
    %59 = vector.load %arg3[%c2048, %c0_39] : memref<2432x512xbf16, #tpu.memory_space<vmem>>, vector<128x512xbf16>
    %cst_40 = arith.constant dense<0.000000e+00> : vector<16x512xf32>
    %60 = tpu.matmul %58, %59, %cst_40 {dimension_numbers = #tpu.dot_dimension_numbers<[1], [0], [0], [1], [0, 0, 1, 1], [], []>} : vector<16x128xbf16>, vector<128x512xbf16>, vector<16x512xf32> -> vector<16x512xf32>
    %61 = arith.truncf %43 : vector<16x128xf32> to vector<16x128xbf16>
    %c2176 = arith.constant 2176 : index
    %c0_41 = arith.constant 0 : index
    %62 = vector.load %arg3[%c2176, %c0_41] : memref<2432x512xbf16, #tpu.memory_space<vmem>>, vector<128x512xbf16>
    %cst_42 = arith.constant dense<0.000000e+00> : vector<16x512xf32>
    %63 = tpu.matmul %61, %62, %cst_42 {dimension_numbers = #tpu.dot_dimension_numbers<[1], [0], [0], [1], [0, 0, 1, 1], [], []>} : vector<16x128xbf16>, vector<128x512xbf16>, vector<16x512xf32> -> vector<16x512xf32>
    %64 = arith.addf %60, %63 : vector<16x512xf32>
    %65 = arith.truncf %57 : vector<16x128xf32> to vector<16x128xbf16>
    %c2304 = arith.constant 2304 : index
    %c0_43 = arith.constant 0 : index
    %66 = vector.load %arg3[%c2304, %c0_43] : memref<2432x512xbf16, #tpu.memory_space<vmem>>, vector<128x512xbf16>
    %cst_44 = arith.constant dense<0.000000e+00> : vector<16x512xf32>
    %67 = tpu.matmul %65, %66, %cst_44 {dimension_numbers = #tpu.dot_dimension_numbers<[1], [0], [0], [1], [0, 0, 1, 1], [], []>} : vector<16x128xbf16>, vector<128x512xbf16>, vector<16x512xf32> -> vector<16x512xf32>
    %68 = arith.addf %64, %67 : vector<16x512xf32>
    %c8 = arith.constant 8 : index
    %c0_45 = arith.constant 0 : index
    %69 = vector.load %arg6[%c8, %c0_45] : memref<16x512xf32, #tpu.memory_space<vmem>>, vector<1x512xf32>
    %70 = vector.broadcast %69 : vector<1x512xf32> to vector<16x512xf32>
    %71 = arith.addf %68, %70 : vector<16x512xf32>
    %cst_46 = arith.constant 0.000000e+00 : f32
    %72 = vector.broadcast %cst_46 : f32 to vector<16x512xf32>
    %73 = arith.maximumf %71, %72 : vector<16x512xf32>
    %74 = arith.truncf %73 : vector<16x512xf32> to vector<16x512xbf16>
    %c1152 = arith.constant 1152 : index
    %c0_47 = arith.constant 0 : index
    %75 = vector.load %arg4[%c1152, %c0_47] : memref<1664x256xbf16, #tpu.memory_space<vmem>>, vector<512x256xbf16>
    %c9 = arith.constant 9 : index
    %c0_48 = arith.constant 0 : index
    %76 = vector.load %arg6[%c9, %c0_48] : memref<16x512xf32, #tpu.memory_space<vmem>>, vector<1x256xf32>
    %cst_49 = arith.constant dense<0.000000e+00> : vector<16x256xf32>
    %77 = tpu.matmul %74, %75, %cst_49 {dimension_numbers = #tpu.dot_dimension_numbers<[1], [0], [0], [1], [0, 0, 1, 1], [], []>} : vector<16x512xbf16>, vector<512x256xbf16>, vector<16x256xf32> -> vector<16x256xf32>
    %78 = vector.broadcast %76 : vector<1x256xf32> to vector<16x256xf32>
    %79 = arith.addf %77, %78 : vector<16x256xf32>
    %cst_50 = arith.constant 0.000000e+00 : f32
    %80 = vector.broadcast %cst_50 : f32 to vector<16x256xf32>
    %81 = arith.maximumf %79, %80 : vector<16x256xf32>
    %82 = arith.truncf %81 : vector<16x256xf32> to vector<16x256xbf16>
    %c768 = arith.constant 768 : index
    %c0_51 = arith.constant 0 : index
    %83 = vector.load %arg5[%c768, %c0_51] : memref<1280x128xbf16, #tpu.memory_space<vmem>>, vector<256x128xbf16>
    %c10 = arith.constant 10 : index
    %c0_52 = arith.constant 0 : index
    %84 = vector.load %arg6[%c10, %c0_52] : memref<16x512xf32, #tpu.memory_space<vmem>>, vector<1x128xf32>
    %cst_53 = arith.constant dense<0.000000e+00> : vector<16x128xf32>
    %85 = tpu.matmul %82, %83, %cst_53 {dimension_numbers = #tpu.dot_dimension_numbers<[1], [0], [0], [1], [0, 0, 1, 1], [], []>} : vector<16x256xbf16>, vector<256x128xbf16>, vector<16x128xf32> -> vector<16x128xf32>
    %86 = vector.broadcast %84 : vector<1x128xf32> to vector<16x128xf32>
    %87 = arith.addf %85, %86 : vector<16x128xf32>
    %cst_54 = arith.constant 0.000000e+00 : f32
    %88 = vector.broadcast %cst_54 : f32 to vector<16x128xf32>
    %89 = arith.maximumf %87, %88 : vector<16x128xf32>
    %90 = arith.truncf %89 : vector<16x128xf32> to vector<16x128xbf16>
    %c1024_55 = arith.constant 1024 : index
    %c0_56 = arith.constant 0 : index
    %91 = vector.load %arg5[%c1024_55, %c0_56] : memref<1280x128xbf16, #tpu.memory_space<vmem>>, vector<128x128xbf16>
    %c11 = arith.constant 11 : index
    %c0_57 = arith.constant 0 : index
    %92 = vector.load %arg6[%c11, %c0_57] : memref<16x512xf32, #tpu.memory_space<vmem>>, vector<1x128xf32>
    %cst_58 = arith.constant dense<0.000000e+00> : vector<16x128xf32>
    %93 = tpu.matmul %90, %91, %cst_58 {dimension_numbers = #tpu.dot_dimension_numbers<[1], [0], [0], [1], [0, 0, 1, 1], [], []>} : vector<16x128xbf16>, vector<128x128xbf16>, vector<16x128xf32> -> vector<16x128xf32>
    %94 = vector.broadcast %92 : vector<1x128xf32> to vector<16x128xf32>
    %95 = arith.addf %93, %94 : vector<16x128xf32>
    %cst_59 = arith.constant 0.000000e+00 : f32
    %96 = vector.broadcast %cst_59 : f32 to vector<16x128xf32>
    %97 = arith.maximumf %95, %96 : vector<16x128xf32>
    %98 = arith.truncf %97 : vector<16x128xf32> to vector<16x128xbf16>
    %c1152_60 = arith.constant 1152 : index
    %c0_61 = arith.constant 0 : index
    %99 = vector.load %arg5[%c1152_60, %c0_61] : memref<1280x128xbf16, #tpu.memory_space<vmem>>, vector<128x128xbf16>
    %c12 = arith.constant 12 : index
    %c0_62 = arith.constant 0 : index
    %100 = vector.load %arg6[%c12, %c0_62] : memref<16x512xf32, #tpu.memory_space<vmem>>, vector<1x128xf32>
    %cst_63 = arith.constant dense<0.000000e+00> : vector<16x128xf32>
    %101 = tpu.matmul %98, %99, %cst_63 {dimension_numbers = #tpu.dot_dimension_numbers<[1], [0], [0], [1], [0, 0, 1, 1], [], []>} : vector<16x128xbf16>, vector<128x128xbf16>, vector<16x128xf32> -> vector<16x128xf32>
    %102 = vector.broadcast %100 : vector<1x128xf32> to vector<16x128xf32>
    %103 = arith.addf %101, %102 : vector<16x128xf32>
    %cst_64 = arith.constant 0.000000e+00 : f32
    %104 = vector.broadcast %cst_64 : f32 to vector<16x128xf32>
    %105 = arith.subf %104, %103 : vector<16x128xf32>
    %106 = math.exp %105 : vector<16x128xf32>
    %cst_65 = arith.constant 1.000000e+00 : f32
    %107 = vector.broadcast %cst_65 : f32 to vector<16x128xf32>
    %108 = arith.addf %107, %106 : vector<16x128xf32>
    %cst_66 = arith.constant 1.000000e+00 : f32
    %109 = vector.broadcast %cst_66 : f32 to vector<16x128xf32>
    %110 = arith.divf %109, %108 : vector<16x128xf32>
    %c0_67 = arith.constant 0 : index
    %c0_68 = arith.constant 0 : index
    %111 = vector.load %arg7[%c0_67, %c0_68] : memref<16x128xf32, #tpu.memory_space<vmem>>, vector<16x128xf32>
    tpu.vector_store %arg7[%c0_67, %c0_68], %110 {strides = array<i32>} : memref<16x128xf32, #tpu.memory_space<vmem>>, vector<16x128xf32>,
    return
  }
}

</mosaic_0001>

<bundles_post_ra>
// kernel: reward_model_forward.1
= control target key start
LH: loop header
LB: loop body
LE: loop exit
PB: predicated region body
PF: predicated region fallthrough
CT: control target
= control target key end

     0   :  { %12 = vsyncpa [#allocation3], 0  ;;  %s10345_s0 = inlined_call_operand.vmem [shape: bf16[16,1024], index: 0, kind: input, shape index: {}]   ;;  %s10346_s1 = inlined_call_operand.vmem [shape: bf16[16,1024], index: 1, kind: input, shape index: {}]   ;;  %s10347_s2 = inlined_call_operand.vmem [shape: bf16[16,128], index: 2, kind: input, shape index: {}]   ;;  %s10348_s3 = inlined_call_operand.hbm [shape: bf16[2432,512], index: 3, kind: input, shape index: {}]   ;;  %s10349_s4 = inlined_call_operand.hbm [shape: bf16[1664,256], index: 4, kind: input, shape index: {}]   ;;  %s10350_s5 = inlined_call_operand.hbm [shape: bf16[1280,128], index: 5, kind: input, shape index: {}]   ;;  %s10351_s6 = inlined_call_operand.hbm [shape: f32[16,512], index: 6, kind: input, shape index: {}]   ;;  %s10352_s7 = inlined_call_operand.vmem [shape: f32[16,128], index: 7, kind: output, shape index: {}]  }
   0x1   :  { %13 = vsyncpa [#allocation5], 0 }
   0x2   :  { %14 = vsyncpa [#allocation8], 0  ;;  %s10032_s24 = smov [#allocation4]   ;;  %s9938_s28 = scalar_lea.hbm %s10349_s4, 26624 }
   0x3   :  { %s38_s25 = sshll.u32 %s10032_s24, 4  ;;  %p9939_p0 = scmp.ne.s32.totalorder %s10349_s4, %s9938_s28  ;;  %s39_s25 = int_to_ptr.vmem [resolvable:$true] %s38_s25 }
   0x4   :  { %p9942_p1 = scmp.lt.u32.totalorder %s9938_s28, %s10349_s4 }
   0x6   :  { %p9944_p2 = pnand %p9942_p1, %p9939_p0 }
   0x8   :  { %9947 = shalt.err (!%p9944_p2)
}
   0x9   :  { %s9948_s10 = scalar_lea.vmem %s39_s25, 26624  ;;  %p9953_p4 = scmp.lt.s32.totalorder %s39_s25, %s39_s25 }
   0xa   :  { %p9949_p3 = scmp.ne.s32.totalorder %s39_s25, %s9948_s10  ;;  %p9954_p5 = scmp.lt.s32.totalorder %s9948_s10, %s9948_s10 }
   0xc   :  { %p9955_p6 = por %p9954_p5, %p9953_p4 }
   0xe   :  { %p9956_p7 = pnand %p9955_p6, %p9949_p3 }
  0x10   :  { %9959 = shalt.err (!%p9956_p7)
}
  0x11   :  { %s10033_s11 = smov 128   ;;  %s10034_s12 = smov 8  }
  0x12   :  { %44 = dma.hbm_to_vmem [thread:$0]  %s10349_s4, 26624, %s39_s25, [#allocation5], %s10033_s11, %s10033_s11, %s10034_s12  }
  0x13   :  { %s10035_s15 = smov [#allocation2]   ;;  %s9960_s19 = scalar_lea.hbm %s10348_s3, 77824 }
  0x14   :  { %s26_s16 = sshll.u32 %s10035_s15, 4  ;;  %p9961_p8 = scmp.ne.s32.totalorder %s10348_s3, %s9960_s19  ;;  %s27_s16 = int_to_ptr.vmem [resolvable:$true] %s26_s16 }
  0x15   :  { %p9964_p9 = scmp.lt.u32.totalorder %s9960_s19, %s10348_s3 }
  0x17   :  { %p9966_p10 = pnand %p9964_p9, %p9961_p8 }
  0x19   :  { %9969 = shalt.err (!%p9966_p10)
}
  0x1a   :  { %s9970_s24 = scalar_lea.vmem %s27_s16, 77824  ;;  %p9975_p12 = scmp.lt.s32.totalorder %s27_s16, %s27_s16 }
  0x1b   :  { %p9971_p11 = scmp.ne.s32.totalorder %s27_s16, %s9970_s24  ;;  %p9976_p13 = scmp.lt.s32.totalorder %s9970_s24, %s9970_s24 }
  0x1d   :  { %p9977_p0 = por %p9976_p13, %p9975_p12 }
  0x1f   :  { %p9978_p1 = pnand %p9977_p0, %p9971_p11 }
  0x21   :  { %9981 = shalt.err (!%p9978_p1)
}
  0x22   :  { %s10036_s4 = smov 256   ;;  %s10037_s25 = smov 16  }
  0x23   :  { %32 = dma.hbm_to_vmem [thread:$0]  %s10348_s3, 77824, %s27_s16, [#allocation3], %s10036_s4, %s10036_s4, %s10037_s25  }
  0x24   :  { %s10038_s28 = smov [#allocation6]   ;;  %s9982_s9 = scalar_lea.hbm %s10350_s5, 10240 }
  0x25   :  { %s50_s29 = sshll.u32 %s10038_s28, 4  ;;  %p9983_p2 = scmp.ne.s32.totalorder %s10350_s5, %s9982_s9  ;;  %s51_s29 = int_to_ptr.vmem [resolvable:$true] %s50_s29 }
  0x26   :  { %p9986_p3 = scmp.lt.u32.totalorder %s9982_s9, %s10350_s5 }
  0x28   :  { %p9988_p4 = pnand %p9986_p3, %p9983_p2 }
  0x2a   :  { %9991 = shalt.err (!%p9988_p4)
}
  0x2b   :  { %s9992_s14 = scalar_lea.vmem %s51_s29, 10240  ;;  %p9997_p6 = scmp.lt.s32.totalorder %s51_s29, %s51_s29 }
  0x2c   :  { %p9993_p5 = scmp.ne.s32.totalorder %s51_s29, %s9992_s14  ;;  %p9998_p7 = scmp.lt.s32.totalorder %s9992_s14, %s9992_s14 }
  0x2e   :  { %p9999_p8 = por %p9998_p7, %p9997_p6 }
  0x30   :  { %p10000_p9 = pnand %p9999_p8, %p9993_p5 }
  0x32   :  { %10003 = shalt.err (!%p10000_p9)
}
  0x33   :  { %s10039_s3 = smov 64   ;;  %s10040_s15 = smov 4  }
  0x34   :  { %56 = dma.hbm_to_vmem [thread:$0]  %s10350_s5, 10240, %s51_s29, [#allocation5], %s10039_s3, %s10039_s3, %s10040_s15  }
  0x35   :  { %s10041_s18 = smov [#allocation7]   ;;  %s10004_s22 = scalar_lea.hbm %s10351_s6, 1024 }
  0x36   :  { %s62_s19 = sshll.u32 %s10041_s18, 4  ;;  %p10005_p10 = scmp.ne.s32.totalorder %s10351_s6, %s10004_s22  ;;  %s63_s19 = int_to_ptr.vmem [resolvable:$true] %s62_s19 }
  0x37   :  { %p10008_p11 = scmp.lt.u32.totalorder %s10004_s22, %s10351_s6 }
  0x39   :  { %p10010_p12 = pnand %p10008_p11, %p10005_p10 }
  0x3b   :  { %10013 = shalt.err (!%p10010_p12)
}
  0x3c   :  { %s10014_s26 = scalar_lea.vmem %s63_s19, 1024  ;;  %p10019_p0 = scmp.lt.s32.totalorder %s63_s19, %s63_s19 }
  0x3d   :  { %p10015_p13 = scmp.ne.s32.totalorder %s63_s19, %s10014_s26  ;;  %p10020_p1 = scmp.lt.s32.totalorder %s10014_s26, %s10014_s26 }
  0x3f   :  { %p10021_p2 = por %p10020_p1, %p10019_p0 }
  0x41   :  { %p10022_p3 = pnand %p10021_p2, %p10015_p13 }
  0x43   :  { %10025 = shalt.err (!%p10022_p3)
}
  0x44   :  { %s10042_s5 = smov 512   ;;  %s10043_s27 = smov 32  }
  0x45   :  { %68 = dma.hbm_to_vmem [thread:$0]  %s10351_s6, 1024, %s63_s19, [#allocation8], %s10042_s5, %s10042_s5, %s10043_s27  }
  0x46   :  { %10026 = dma.done.wait [#allocation3], 77824  }
  0x47   :  { %10027 = vsyncadd [#allocation3], 4294889472 }
  0x48   :  { %10028 = dma.done.wait [#allocation5], 36864  }
  0x49   :  { %10029 = vsyncadd [#allocation5], 4294930432 }
  0x4a   :  { %10030 = dma.done.wait [#allocation8], 1024  }
  0x4b   :  { %10031 = vsyncadd [#allocation8], 4294966272  ;;  %v8625_v0 = vld [vmem:[#allocation2 + $0x4] ss:$16 sps:$4 sm:$0xff]   ;;  %v8627_v1 = vld [vmem:[#allocation2 + $0xc] ss:$16 sps:$4 sm:$0xff]  }
  0x4c   :  { %1688 = vmatprep.subr.bf16.mxu0 %v8625_v0  ;;  %v8629_v2 = vld [vmem:[#allocation2] ss:$16 sps:$4 sm:$0xff]   ;;  %v8630_v3 = vld [vmem:[#allocation2 + $0x8] ss:$16 sps:$4 sm:$0xff]   ;;  %1860 = vmatprep.subr.bf16.mxu1 %v8627_v1  ;;  %v8631_v4 = vld [vmem:[#allocation2 + $0x24] ss:$16 sps:$4 sm:$0xff]  }
  0x4d   :  { %1689 = vmatpush1.bf16.msra.mxu0 %v8629_v2  ;;  %1861 = vmatpush1.bf16.msra.mxu1 %v8630_v3  ;;  %v8633_v5 = vld [vmem:[#allocation2 + $0x2c] ss:$16 sps:$4 sm:$0xff]   ;;  %v8635_v6 = vld [vmem:[#allocation2 + $0x20] ss:$16 sps:$4 sm:$0xff]   ;;  %v8636_v7 = vld [vmem:[#allocation2 + $0x28] ss:$16 sps:$4 sm:$0xff]  }
  0x4e   :  { %1690 = vmatprep.subr.bf16.mxu0 %v8631_v4  ;;  %1862 = vmatprep.subr.bf16.mxu1 %v8633_v5  ;;  %v8637_v8 = vld [vmem:[#allocation2 + $0x44] ss:$16 sps:$4 sm:$0xff]   ;;  %v8639_v9 = vld [vmem:[#allocation2 + $0x4c] ss:$16 sps:$4 sm:$0xff]   ;;  %v8641_v10 = vld [vmem:[#allocation2 + $0x40] ss:$16 sps:$4 sm:$0xff]  }
  0x4f   :  { %v8642_v11 = vld [vmem:[#allocation2 + $0x48] ss:$16 sps:$4 sm:$0xff]   ;;  %v8643_v12 = vld [vmem:[#allocation2 + $0x64] ss:$16 sps:$4 sm:$0xff]   ;;  %v8645_v13 = vld [vmem:[#allocation2 + $0x6c] ss:$16 sps:$4 sm:$0xff]  }
  0x50   :  { %v8647_v14 = vld [vmem:[#allocation2 + $0x60] ss:$16 sps:$4 sm:$0xff]   ;;  %v8648_v15 = vld [vmem:[#allocation2 + $0x68] ss:$16 sps:$4 sm:$0xff]   ;;  %v8649_v16 = vld [vmem:[#allocation2 + $0x84] ss:$16 sps:$4 sm:$0xff]  }
  0x51   :  { %1691 = vmatpush1.bf16.msra.mxu0 %v8635_v6  ;;  %1863 = vmatpush1.bf16.msra.mxu1 %v8636_v7  ;;  %v8651_v17 = vld [vmem:[#allocation2 + $0x8c] ss:$16 sps:$4 sm:$0xff]   ;;  %v8653_v18 = vld [vmem:[#allocation2 + $0x80] ss:$16 sps:$4 sm:$0xff]   ;;  %v8654_v19 = vld [vmem:[#allocation2 + $0x88] ss:$16 sps:$4 sm:$0xff]  }
  0x52   :  { %1692 = vmatprep.subr.bf16.mxu0 %v8637_v8  ;;  %1864 = vmatprep.subr.bf16.mxu1 %v8639_v9  ;;  %v8655_v20 = vld [vmem:[#allocation2 + $0xa4] ss:$16 sps:$4 sm:$0xff]   ;;  %v8657_v21 = vld [vmem:[#allocation2 + $0xac] ss:$16 sps:$4 sm:$0xff]   ;;  %v8659_v22 = vld [vmem:[#allocation2 + $0xa0] ss:$16 sps:$4 sm:$0xff]  }
  0x53   :  { %v8660_v23 = vld [vmem:[#allocation2 + $0xa8] ss:$16 sps:$4 sm:$0xff]   ;;  %v8661_v24 = vld [vmem:[#allocation2 + $0xc4] ss:$16 sps:$4 sm:$0xff]   ;;  %v8663_v25 = vld [vmem:[#allocation2 + $0xcc] ss:$16 sps:$4 sm:$0xff]  }
  0x54   :  { %v8665_v26 = vld [vmem:[#allocation2 + $0xc0] ss:$16 sps:$4 sm:$0xff]   ;;  %v8666_v27 = vld [vmem:[#allocation2 + $0xc8] ss:$16 sps:$4 sm:$0xff]   ;;  %v8667_v28 = vld [vmem:[#allocation2 + $0xe4] ss:$16 sps:$4 sm:$0xff]  }
  0x55   :  { %1693 = vmatpush1.bf16.msra.mxu0 %v8641_v10  ;;  %1865 = vmatpush1.bf16.msra.mxu1 %v8642_v11  ;;  %v8669_v29 = vld [vmem:[#allocation2 + $0xec] ss:$16 sps:$4 sm:$0xff]   ;;  %v8671_v30 = vld [vmem:[#allocation2 + $0xe0] ss:$16 sps:$4 sm:$0xff]   ;;  %v8672_v31 = vld [vmem:[#allocation2 + $0xe8] ss:$16 sps:$4 sm:$0xff]  }
  0x56   :  { %1694 = vmatprep.subr.bf16.mxu0 %v8643_v12  ;;  %1866 = vmatprep.subr.bf16.mxu1 %v8645_v13  ;;  %v8673_v32 = vld [vmem:[#allocation2 + $0x104] ss:$16 sps:$4 sm:$0xff]   ;;  %v8675_v33 = vld [vmem:[#allocation2 + $0x10c] ss:$16 sps:$4 sm:$0xff]   ;;  %v8677_v34 = vld [vmem:[#allocation2 + $0x100] ss:$16 sps:$4 sm:$0xff]  }
  0x57   :  { %v8678_v35 = vld [vmem:[#allocation2 + $0x108] ss:$16 sps:$4 sm:$0xff]   ;;  %v8679_v36 = vld [vmem:[#allocation2 + $0x124] ss:$16 sps:$4 sm:$0xff]   ;;  %v8681_v37 = vld [vmem:[#allocation2 + $0x12c] ss:$16 sps:$4 sm:$0xff]  }
  0x58   :  { %v8683_v38 = vld [vmem:[#allocation2 + $0x120] ss:$16 sps:$4 sm:$0xff]   ;;  %v8684_v39 = vld [vmem:[#allocation2 + $0x128] ss:$16 sps:$4 sm:$0xff]   ;;  %v8685_v40 = vld [vmem:[#allocation2 + $0x144] ss:$16 sps:$4 sm:$0xff]  }
  0x59   :  { %1695 = vmatpush1.bf16.msra.mxu0 %v8647_v14  ;;  %1867 = vmatpush1.bf16.msra.mxu1 %v8648_v15  ;;  %v8687_v41 = vld [vmem:[#allocation2 + $0x14c] ss:$16 sps:$4 sm:$0xff]   ;;  %v8689_v42 = vld [vmem:[#allocation2 + $0x140] ss:$16 sps:$4 sm:$0xff]   ;;  %v8690_v43 = vld [vmem:[#allocation2 + $0x148] ss:$16 sps:$4 sm:$0xff]  }
  0x5a   :  { %1696 = vmatprep.subr.bf16.mxu0 %v8649_v16  ;;  %1868 = vmatprep.subr.bf16.mxu1 %v8651_v17  ;;  %v8691_v44 = vld [vmem:[#allocation2 + $0x164] ss:$16 sps:$4 sm:$0xff]   ;;  %v8693_v45 = vld [vmem:[#allocation2 + $0x16c] ss:$16 sps:$4 sm:$0xff]   ;;  %v8695_v48 = vld [vmem:[#allocation2 + $0x160] ss:$16 sps:$4 sm:$0xff]  }
  0x5b   :  { %v82_v46 = vld [vmem:[%s10345_s0] sm:$0xff]  ;;  %v8696_v49 = vld [vmem:[#allocation2 + $0x168] ss:$16 sps:$4 sm:$0xff]   ;;  %v8699_v52 = vld [vmem:[#allocation2 + $0x18c] ss:$16 sps:$4 sm:$0xff]   ;;  %vm10046_vm0 = vmmov 0  }
  0x5c   :  { %v86_v47 = vld [vmem:[%s10345_s0 + $0x20] sm:$0xff]  ;;  %v8702_v54 = vld [vmem:[#allocation2 + $0x188] ss:$16 sps:$4 sm:$0xff]   ;;  %v8705_v56 = vld [vmem:[#allocation2 + $0x1ac] ss:$16 sps:$4 sm:$0xff]  }
  0x5d   :  { %1697 = vmatpush1.bf16.msra.mxu0 %v8653_v18  ;;  %1869 = vmatpush1.bf16.msra.mxu1 %v8654_v19  ;;  %v7448_v50 = vcombine.high %v82_v46, %v86_v47  ;;  %v8697_v51 = vld [vmem:[#allocation2 + $0x184] ss:$16 sps:$4 sm:$0xff]   ;;  %v8701_v53 = vld [vmem:[#allocation2 + $0x180] ss:$16 sps:$4 sm:$0xff]   ;;  %v8708_v58 = vld [vmem:[#allocation2 + $0x1a8] ss:$16 sps:$4 sm:$0xff]   ;;  %v7447_v5 = vcombine.low %v82_v46, %v86_v47 }
  0x5e   :  { %1698 = vmatprep.subr.bf16.mxu0 %v8655_v20  ;;  %1870 = vmatprep.subr.bf16.mxu1 %v8657_v21  ;;  %v8703_v55 = vld [vmem:[#allocation2 + $0x1a4] ss:$16 sps:$4 sm:$0xff]   ;;  %v8707_v57 = vld [vmem:[#allocation2 + $0x1a0] ss:$16 sps:$4 sm:$0xff]   ;;  %v8711_v60 = vld [vmem:[#allocation2 + $0x1cc] ss:$16 sps:$4 sm:$0xff]  }
  0x5f   :  { %1720 = vmatprep.mubr.bf16.mxu0 %v7448_v50  ;;  %1892 = vmatprep.mubr.bf16.mxu1 %v7448_v50  ;;  %v8709_v59 = vld [vmem:[#allocation2 + $0x1c4] ss:$16 sps:$4 sm:$0xff]   ;;  %v8713_v61 = vld [vmem:[#allocation2 + $0x1c0] ss:$16 sps:$4 sm:$0xff]   ;;  %v8714_v62 = vld [vmem:[#allocation2 + $0x1c8] ss:$16 sps:$4 sm:$0xff]  }
  0x60   :  { %v8715_v63 = vld [vmem:[#allocation2 + $0x1e4] ss:$16 sps:$4 sm:$0xff]   ;;  %v8717_v0 = vld [vmem:[#allocation2 + $0x1ec] ss:$16 sps:$4 sm:$0xff]   ;;  %v8719_v1 = vld [vmem:[#allocation2 + $0x1e0] ss:$16 sps:$4 sm:$0xff]  }
  0x61   :  { %1699 = vmatpush1.bf16.msra.mxu0 %v8659_v22  ;;  %1871 = vmatpush1.bf16.msra.mxu1 %v8660_v23  ;;  %v8720_v2 = vld [vmem:[#allocation2 + $0x1e8] ss:$16 sps:$4 sm:$0xff]   ;;  %v8723_v3 = vld [vmem:[#allocation2 + $0x204] ss:$16 sps:$4 sm:$0xff]   ;;  %v8726_v4 = vld [vmem:[#allocation2 + $0x20c] ss:$16 sps:$4 sm:$0xff]  }
  0x62   :  { %1700 = vmatprep.subr.bf16.mxu0 %v8661_v24  ;;  %1872 = vmatprep.subr.bf16.mxu1 %v8663_v25  ;;  %v8721_v6 = vld [vmem:[#allocation2 + $0x200] ss:$16 sps:$4 sm:$0xff]   ;;  %v8724_v7 = vld [vmem:[#allocation2 + $0x208] ss:$16 sps:$4 sm:$0xff]   ;;  %v8729_v8 = vld [vmem:[#allocation2 + $0x224] ss:$16 sps:$4 sm:$0xff]  }
  0x63   :  { %v8732_v9 = vld [vmem:[#allocation2 + $0x22c] ss:$16 sps:$4 sm:$0xff]   ;;  %v8727_v10 = vld [vmem:[#allocation2 + $0x220] ss:$16 sps:$4 sm:$0xff]   ;;  %v8730_v11 = vld [vmem:[#allocation2 + $0x228] ss:$16 sps:$4 sm:$0xff]  }
  0x64   :  { %v8735_v12 = vld [vmem:[#allocation2 + $0x244] ss:$16 sps:$4 sm:$0xff]   ;;  %v8738_v13 = vld [vmem:[#allocation2 + $0x24c] ss:$16 sps:$4 sm:$0xff]   ;;  %v8733_v14 = vld [vmem:[#allocation2 + $0x240] ss:$16 sps:$4 sm:$0xff]  }
  0x65   :  { %1701 = vmatpush1.bf16.msra.mxu0 %v8665_v26  ;;  %1873 = vmatpush1.bf16.msra.mxu1 %v8666_v27  ;;  %v8736_v15 = vld [vmem:[#allocation2 + $0x248] ss:$16 sps:$4 sm:$0xff]   ;;  %v8741_v16 = vld [vmem:[#allocation2 + $0x264] ss:$16 sps:$4 sm:$0xff]   ;;  %v8744_v17 = vld [vmem:[#allocation2 + $0x26c] ss:$16 sps:$4 sm:$0xff]  }
  0x66   :  { %1702 = vmatprep.subr.bf16.mxu0 %v8667_v28  ;;  %1874 = vmatprep.subr.bf16.mxu1 %v8669_v29  ;;  %v8739_v18 = vld [vmem:[#allocation2 + $0x260] ss:$16 sps:$4 sm:$0xff]   ;;  %v8742_v19 = vld [vmem:[#allocation2 + $0x268] ss:$16 sps:$4 sm:$0xff]   ;;  %v8747_v20 = vld [vmem:[#allocation2 + $0x284] ss:$16 sps:$4 sm:$0xff]  }
  0x67   :  { %v8750_v21 = vld [vmem:[#allocation2 + $0x28c] ss:$16 sps:$4 sm:$0xff]   ;;  %v8745_v22 = vld [vmem:[#allocation2 + $0x280] ss:$16 sps:$4 sm:$0xff]   ;;  %v8748_v23 = vld [vmem:[#allocation2 + $0x288] ss:$16 sps:$4 sm:$0xff]  }
  0x68   :  { %v8753_v24 = vld [vmem:[#allocation2 + $0x2a4] ss:$16 sps:$4 sm:$0xff]   ;;  %v8756_v25 = vld [vmem:[#allocation2 + $0x2ac] ss:$16 sps:$4 sm:$0xff]   ;;  %v8751_v26 = vld [vmem:[#allocation2 + $0x2a0] ss:$16 sps:$4 sm:$0xff]  }
  0x69   :  { %1703 = vmatpush1.bf16.msra.mxu0 %v8671_v30  ;;  %1875 = vmatpush1.bf16.msra.mxu1 %v8672_v31  ;;  %v8754_v27 = vld [vmem:[#allocation2 + $0x2a8] ss:$16 sps:$4 sm:$0xff]   ;;  %v8759_v28 = vld [vmem:[#allocation2 + $0x2c4] ss:$16 sps:$4 sm:$0xff]   ;;  %v8762_v29 = vld [vmem:[#allocation2 + $0x2cc] ss:$16 sps:$4 sm:$0xff]  }
  0x6a   :  { %1704 = vmatprep.subr.bf16.mxu0 %v8673_v32  ;;  %1876 = vmatprep.subr.bf16.mxu1 %v8675_v33  ;;  %v10144_v30 = vld [vmem:[%s10345_s0 + $0x8] sm:$0xff]  ;;  %v8757_v32 = vld [vmem:[#allocation2 + $0x2c0] ss:$16 sps:$4 sm:$0xff]   ;;  %v8783_v47 = vld [vmem:[#allocation2 + $0x344] ss:$16 sps:$4 sm:$0xff]  }
  0x6b   :  { %v10149_v31 = vld [vmem:[%s10345_s0 + $0x28] sm:$0xff] }
  0x6c   :  { %v8760_v33 = vld [vmem:[#allocation2 + $0x2c8] ss:$16 sps:$4 sm:$0xff]  }
  0x6d   :  { %1705 = vmatpush1.bf16.msra.mxu0 %v8677_v34  ;;  %1877 = vmatpush1.bf16.msra.mxu1 %v8678_v35  ;;  %v7450_v34 = vcombine.high %v10144_v30, %v10149_v31  ;;  %v8765_v35 = vld [vmem:[#allocation2 + $0x2e4] ss:$16 sps:$4 sm:$0xff]   ;;  %v8778_v46 = vld [vmem:[#allocation2 + $0x328] ss:$16 sps:$4 sm:$0xff]  }
  0x6e   :  { %1706 = vmatprep.subr.bf16.mxu0 %v8679_v36  ;;  %1878 = vmatprep.subr.bf16.mxu1 %v8681_v37  ;;  %v8768_v36 = vld [vmem:[#allocation2 + $0x2ec] ss:$16 sps:$4 sm:$0xff]   ;;  %v8763_v37 = vld [vmem:[#allocation2 + $0x2e0] ss:$16 sps:$4 sm:$0xff]   ;;  %v8784_v50 = vld [vmem:[#allocation2 + $0x348] ss:$16 sps:$4 sm:$0xff]  }
  0x71   :  { %1707 = vmatpush1.bf16.msra.mxu0 %v8683_v38  ;;  %1879 = vmatpush1.bf16.msra.mxu1 %v8684_v39  ;;  %v8766_v38 = vld [vmem:[#allocation2 + $0x2e8] ss:$16 sps:$4 sm:$0xff]   ;;  %v8771_v39 = vld [vmem:[#allocation2 + $0x304] ss:$16 sps:$4 sm:$0xff]  }
  0x72   :  { %1708 = vmatprep.subr.bf16.mxu0 %v8685_v40  ;;  %1880 = vmatprep.subr.bf16.mxu1 %v8687_v41  ;;  %v8774_v40 = vld [vmem:[#allocation2 + $0x30c] ss:$16 sps:$4 sm:$0xff]   ;;  %v8769_v41 = vld [vmem:[#allocation2 + $0x300] ss:$16 sps:$4 sm:$0xff]  }
  0x75   :  { %1709 = vmatpush1.bf16.msra.mxu0 %v8689_v42  ;;  %1881 = vmatpush1.bf16.msra.mxu1 %v8690_v43  ;;  %v8772_v42 = vld [vmem:[#allocation2 + $0x308] ss:$16 sps:$4 sm:$0xff]   ;;  %v8777_v43 = vld [vmem:[#allocation2 + $0x324] ss:$16 sps:$4 sm:$0xff]  }
  0x76   :  { %1710 = vmatprep.subr.bf16.mxu0 %v8691_v44  ;;  %1882 = vmatprep.subr.bf16.mxu1 %v8693_v45  ;;  %v8780_v44 = vld [vmem:[#allocation2 + $0x32c] ss:$16 sps:$4 sm:$0xff]   ;;  %v8775_v45 = vld [vmem:[#allocation2 + $0x320] ss:$16 sps:$4 sm:$0xff]  }
  0x79   :  { %1711 = vmatpush1.bf16.msra.mxu0 %v8695_v48  ;;  %1883 = vmatpush1.bf16.msra.mxu1 %v8696_v49  ;;  %v8786_v48 = vld [vmem:[#allocation2 + $0x34c] ss:$16 sps:$4 sm:$0xff]   ;;  %v8781_v49 = vld [vmem:[#allocation2 + $0x340] ss:$16 sps:$4 sm:$0xff]  }
  0x7a   :  { %1712 = vmatprep.subr.bf16.mxu0 %v8697_v51  ;;  %1884 = vmatprep.subr.bf16.mxu1 %v8699_v52  ;;  %v8789_v51 = vld [vmem:[#allocation2 + $0x364] ss:$16 sps:$4 sm:$0xff]   ;;  %v8792_v52 = vld [vmem:[#allocation2 + $0x36c] ss:$16 sps:$4 sm:$0xff]  }
  0x7d   :  { %1713 = vmatpush1.bf16.msra.mxu0 %v8701_v53  ;;  %1885 = vmatpush1.bf16.msra.mxu1 %v8702_v54  ;;  %v8787_v53 = vld [vmem:[#allocation2 + $0x360] ss:$16 sps:$4 sm:$0xff]   ;;  %v8790_v54 = vld [vmem:[#allocation2 + $0x368] ss:$16 sps:$4 sm:$0xff]  }
  0x7e   :  { %1714 = vmatprep.subr.bf16.mxu0 %v8703_v55  ;;  %1886 = vmatprep.subr.bf16.mxu1 %v8705_v56  ;;  %v8795_v55 = vld [vmem:[#allocation2 + $0x384] ss:$16 sps:$4 sm:$0xff]   ;;  %v8798_v56 = vld [vmem:[#allocation2 + $0x38c] ss:$16 sps:$4 sm:$0xff]  }
  0x81   :  { %1715 = vmatpush1.bf16.msra.mxu0 %v8707_v57  ;;  %1887 = vmatpush1.bf16.msra.mxu1 %v8708_v58  ;;  %v8793_v57 = vld [vmem:[#allocation2 + $0x380] ss:$16 sps:$4 sm:$0xff]   ;;  %v8796_v58 = vld [vmem:[#allocation2 + $0x388] ss:$16 sps:$4 sm:$0xff]  }
  0x82   :  { %1716 = vmatprep.subr.bf16.mxu0 %v8709_v59  ;;  %1888 = vmatprep.subr.bf16.mxu1 %v8711_v60  ;;  %v8801_v59 = vld [vmem:[#allocation2 + $0x3a4] ss:$16 sps:$4 sm:$0xff]   ;;  %v8804_v60 = vld [vmem:[#allocation2 + $0x3ac] ss:$16 sps:$4 sm:$0xff]  }
  0x85   :  { %1717 = vmatpush1.bf16.msra.mxu0 %v8713_v61  ;;  %1889 = vmatpush1.bf16.msra.mxu1 %v8714_v62  ;;  %v8799_v61 = vld [vmem:[#allocation2 + $0x3a0] ss:$16 sps:$4 sm:$0xff]   ;;  %v8802_v62 = vld [vmem:[#allocation2 + $0x3a8] ss:$16 sps:$4 sm:$0xff]  }
  0x86   :  { %1718 = vmatprep.subr.bf16.mxu0 %v8715_v63  ;;  %1890 = vmatprep.subr.bf16.mxu1 %v8717_v0  ;;  %v8807_v63 = vld [vmem:[#allocation2 + $0x3c4] ss:$16 sps:$4 sm:$0xff]   ;;  %v8810_v0 = vld [vmem:[#allocation2 + $0x3cc] ss:$16 sps:$4 sm:$0xff]  }
  0x89   :  { %1719 = vmatpush1.bf16.msra.mxu0 %v8719_v1  ;;  %1891 = vmatpush1.bf16.msra.mxu1 %v8720_v2  ;;  %v8805_v1 = vld [vmem:[#allocation2 + $0x3c0] ss:$16 sps:$4 sm:$0xff]   ;;  %v8808_v2 = vld [vmem:[#allocation2 + $0x3c8] ss:$16 sps:$4 sm:$0xff]  }
  0x8a   :  { %1731 = vmatprep.subr.bf16.mxu0 %v8723_v3  ;;  %1903 = vmatprep.subr.bf16.mxu1 %v8726_v4  ;;  %v8813_v3 = vld [vmem:[#allocation2 + $0x3e4] ss:$16 sps:$4 sm:$0xff]   ;;  %v8816_v4 = vld [vmem:[#allocation2 + $0x3ec] ss:$16 sps:$4 sm:$0xff]  }
  0x8c   :  { %1721 = vmatmul.mubr.bf16.vlgmr.msra.gmra.mrb[0].mxu0 %v7447_v5  ;;  %1893 = vmatmul.mubr.bf16.vlgmr.msra.gmra.mrb[0].mxu1 %v7447_v5  ;;  %v8811_v5 = vld [vmem:[#allocation2 + $0x3e0] ss:$16 sps:$4 sm:$0xff]  }
  0x8d   :  { %1732 = vmatpush1.bf16.msra.mxu0 %v8721_v6  ;;  %1904 = vmatpush1.bf16.msra.mxu1 %v8724_v7  ;;  %v8814_v6 = vld [vmem:[#allocation2 + $0x3e8] ss:$16 sps:$4 sm:$0xff]   ;;  %v8819_v7 = vld [vmem:[#allocation2 + $0x404] ss:$16 sps:$4 sm:$0xff]  }
  0x8e   :  { %1733 = vmatprep.subr.bf16.mxu0 %v8729_v8  ;;  %1905 = vmatprep.subr.bf16.mxu1 %v8732_v9  ;;  %v8822_v8 = vld [vmem:[#allocation2 + $0x40c] ss:$16 sps:$4 sm:$0xff]   ;;  %v7449_v9 = vcombine.low %v10144_v30, %v10149_v31  ;;  %v8844_v30 = vld [vmem:[#allocation2 + $0x488] ss:$16 sps:$4 sm:$0xff]   ;;  %v8849_v31 = vld [vmem:[#allocation2 + $0x4a4] ss:$16 sps:$4 sm:$0xff]  }
  0x8f   :  { %1763 = vmatprep.mubr.bf16.mxu0 %v7450_v34  ;;  %1935 = vmatprep.mubr.bf16.mxu1 %v7450_v34  ;;  %v8850_v34 = vld [vmem:[#allocation2 + $0x4a8] ss:$16 sps:$4 sm:$0xff]  }
  0x91   :  { %1734 = vmatpush1.bf16.msra.mxu0 %v8727_v10  ;;  %1906 = vmatpush1.bf16.msra.mxu1 %v8730_v11  ;;  %v8817_v10 = vld [vmem:[#allocation2 + $0x400] ss:$16 sps:$4 sm:$0xff]   ;;  %v8820_v11 = vld [vmem:[#allocation2 + $0x408] ss:$16 sps:$4 sm:$0xff]  }
  0x92   :  { %1735 = vmatprep.subr.bf16.mxu0 %v8735_v12  ;;  %1907 = vmatprep.subr.bf16.mxu1 %v8738_v13  ;;  %v8825_v12 = vld [vmem:[#allocation2 + $0x424] ss:$16 sps:$4 sm:$0xff]   ;;  %v8828_v13 = vld [vmem:[#allocation2 + $0x42c] ss:$16 sps:$4 sm:$0xff]  }
  0x95   :  { %1736 = vmatpush1.bf16.msra.mxu0 %v8733_v14  ;;  %1908 = vmatpush1.bf16.msra.mxu1 %v8736_v15  ;;  %v10158_v14 = vld [vmem:[%s10345_s0 + $0x10] sm:$0xff] }
  0x96   :  { %1737 = vmatprep.subr.bf16.mxu0 %v8741_v16  ;;  %1909 = vmatprep.subr.bf16.mxu1 %v8744_v17  ;;  %v10163_v15 = vld [vmem:[%s10345_s0 + $0x30] sm:$0xff] }
  0x97   :  { %v7452_v16 = vcombine.high %v10158_v14, %v10163_v15  ;;  %v8823_v17 = vld [vmem:[#allocation2 + $0x420] ss:$16 sps:$4 sm:$0xff]  }
  0x99   :  { %1738 = vmatpush1.bf16.msra.mxu0 %v8739_v18  ;;  %1910 = vmatpush1.bf16.msra.mxu1 %v8742_v19  ;;  %v8826_v18 = vld [vmem:[#allocation2 + $0x428] ss:$16 sps:$4 sm:$0xff]   ;;  %v8831_v19 = vld [vmem:[#allocation2 + $0x444] ss:$16 sps:$4 sm:$0xff]  }
  0x9a   :  { %1739 = vmatprep.subr.bf16.mxu0 %v8747_v20  ;;  %1911 = vmatprep.subr.bf16.mxu1 %v8750_v21  ;;  %v8834_v20 = vld [vmem:[#allocation2 + $0x44c] ss:$16 sps:$4 sm:$0xff]   ;;  %v8829_v21 = vld [vmem:[#allocation2 + $0x440] ss:$16 sps:$4 sm:$0xff]  }
  0x9d   :  { %1740 = vmatpush1.bf16.msra.mxu0 %v8745_v22  ;;  %1912 = vmatpush1.bf16.msra.mxu1 %v8748_v23  ;;  %v8832_v22 = vld [vmem:[#allocation2 + $0x448] ss:$16 sps:$4 sm:$0xff]   ;;  %v8837_v23 = vld [vmem:[#allocation2 + $0x464] ss:$16 sps:$4 sm:$0xff]  }
  0x9e   :  { %1741 = vmatprep.subr.bf16.mxu0 %v8753_v24  ;;  %1913 = vmatprep.subr.bf16.mxu1 %v8756_v25  ;;  %v8840_v24 = vld [vmem:[#allocation2 + $0x46c] ss:$16 sps:$4 sm:$0xff]   ;;  %v8835_v25 = vld [vmem:[#allocation2 + $0x460] ss:$16 sps:$4 sm:$0xff]  }
  0xa1   :  { %1742 = vmatpush1.bf16.msra.mxu0 %v8751_v26  ;;  %1914 = vmatpush1.bf16.msra.mxu1 %v8754_v27  ;;  %v8838_v26 = vld [vmem:[#allocation2 + $0x468] ss:$16 sps:$4 sm:$0xff]   ;;  %v8843_v27 = vld [vmem:[#allocation2 + $0x484] ss:$16 sps:$4 sm:$0xff]  }
  0xa2   :  { %1743 = vmatprep.subr.bf16.mxu0 %v8759_v28  ;;  %1915 = vmatprep.subr.bf16.mxu1 %v8762_v29  ;;  %v8846_v28 = vld [vmem:[#allocation2 + $0x48c] ss:$16 sps:$4 sm:$0xff]   ;;  %v8841_v29 = vld [vmem:[#allocation2 + $0x480] ss:$16 sps:$4 sm:$0xff]  }
  0xa5   :  { %1744 = vmatpush1.bf16.msra.mxu0 %v8757_v32  ;;  %1916 = vmatpush1.bf16.msra.mxu1 %v8760_v33  ;;  %v8852_v32 = vld [vmem:[#allocation2 + $0x4ac] ss:$16 sps:$4 sm:$0xff]   ;;  %v8847_v33 = vld [vmem:[#allocation2 + $0x4a0] ss:$16 sps:$4 sm:$0xff]  }
  0xa6   :  { %1745 = vmatprep.subr.bf16.mxu0 %v8765_v35  ;;  %1917 = vmatprep.subr.bf16.mxu1 %v8768_v36  ;;  %v8855_v35 = vld [vmem:[#allocation2 + $0x4c4] ss:$16 sps:$4 sm:$0xff]   ;;  %v8858_v36 = vld [vmem:[#allocation2 + $0x4cc] ss:$16 sps:$4 sm:$0xff]  }
  0xa9   :  { %1746 = vmatpush1.bf16.msra.mxu0 %v8763_v37  ;;  %1918 = vmatpush1.bf16.msra.mxu1 %v8766_v38  ;;  %v8853_v37 = vld [vmem:[#allocation2 + $0x4c0] ss:$16 sps:$4 sm:$0xff]   ;;  %v8856_v38 = vld [vmem:[#allocation2 + $0x4c8] ss:$16 sps:$4 sm:$0xff]  }
  0xaa   :  { %1747 = vmatprep.subr.bf16.mxu0 %v8771_v39  ;;  %1919 = vmatprep.subr.bf16.mxu1 %v8774_v40  ;;  %v8861_v39 = vld [vmem:[#allocation2 + $0x4e4] ss:$16 sps:$4 sm:$0xff]   ;;  %v8864_v40 = vld [vmem:[#allocation2 + $0x4ec] ss:$16 sps:$4 sm:$0xff]  }
  0xad   :  { %1748 = vmatpush1.bf16.msra.mxu0 %v8769_v41  ;;  %1920 = vmatpush1.bf16.msra.mxu1 %v8772_v42  ;;  %v8859_v41 = vld [vmem:[#allocation2 + $0x4e0] ss:$16 sps:$4 sm:$0xff]   ;;  %v8862_v42 = vld [vmem:[#allocation2 + $0x4e8] ss:$16 sps:$4 sm:$0xff]  }
  0xae   :  { %1749 = vmatprep.subr.bf16.mxu0 %v8777_v43  ;;  %1921 = vmatprep.subr.bf16.mxu1 %v8780_v44  ;;  %v8867_v43 = vld [vmem:[#allocation2 + $0x504] ss:$16 sps:$4 sm:$0xff]   ;;  %v8870_v44 = vld [vmem:[#allocation2 + $0x50c] ss:$16 sps:$4 sm:$0xff]  }
  0xb1   :  { %1750 = vmatpush1.bf16.msra.mxu0 %v8775_v45  ;;  %1922 = vmatpush1.bf16.msra.mxu1 %v8778_v46  ;;  %v8865_v45 = vld [vmem:[#allocation2 + $0x500] ss:$16 sps:$4 sm:$0xff]   ;;  %v8868_v46 = vld [vmem:[#allocation2 + $0x508] ss:$16 sps:$4 sm:$0xff]  }
  0xb2   :  { %1751 = vmatprep.subr.bf16.mxu0 %v8783_v47  ;;  %1923 = vmatprep.subr.bf16.mxu1 %v8786_v48  ;;  %v8873_v47 = vld [vmem:[#allocation2 + $0x524] ss:$16 sps:$4 sm:$0xff]   ;;  %v8876_v48 = vld [vmem:[#allocation2 + $0x52c] ss:$16 sps:$4 sm:$0xff]  }
  0xb5   :  { %1752 = vmatpush1.bf16.msra.mxu0 %v8781_v49  ;;  %1924 = vmatpush1.bf16.msra.mxu1 %v8784_v50  ;;  %v8871_v49 = vld [vmem:[#allocation2 + $0x520] ss:$16 sps:$4 sm:$0xff]   ;;  %v8874_v50 = vld [vmem:[#allocation2 + $0x528] ss:$16 sps:$4 sm:$0xff]  }
  0xb6   :  { %1753 = vmatprep.subr.bf16.mxu0 %v8789_v51  ;;  %1925 = vmatprep.subr.bf16.mxu1 %v8792_v52  ;;  %v8879_v51 = vld [vmem:[#allocation2 + $0x544] ss:$16 sps:$4 sm:$0xff]   ;;  %v8882_v52 = vld [vmem:[#allocation2 + $0x54c] ss:$16 sps:$4 sm:$0xff]  }
  0xb9   :  { %1754 = vmatpush1.bf16.msra.mxu0 %v8787_v53  ;;  %1926 = vmatpush1.bf16.msra.mxu1 %v8790_v54  ;;  %v8877_v53 = vld [vmem:[#allocation2 + $0x540] ss:$16 sps:$4 sm:$0xff]   ;;  %v8880_v54 = vld [vmem:[#allocation2 + $0x548] ss:$16 sps:$4 sm:$0xff]  }
  0xba   :  { %1755 = vmatprep.subr.bf16.mxu0 %v8795_v55  ;;  %1927 = vmatprep.subr.bf16.mxu1 %v8798_v56  ;;  %v8885_v55 = vld [vmem:[#allocation2 + $0x564] ss:$16 sps:$4 sm:$0xff]   ;;  %v8888_v56 = vld [vmem:[#allocation2 + $0x56c] ss:$16 sps:$4 sm:$0xff]  }
  0xbd   :  { %1756 = vmatpush1.bf16.msra.mxu0 %v8793_v57  ;;  %1928 = vmatpush1.bf16.msra.mxu1 %v8796_v58  ;;  %v8883_v57 = vld [vmem:[#allocation2 + $0x560] ss:$16 sps:$4 sm:$0xff]   ;;  %v8886_v58 = vld [vmem:[#allocation2 + $0x568] ss:$16 sps:$4 sm:$0xff]  }
  0xbe   :  { %1757 = vmatprep.subr.bf16.mxu0 %v8801_v59  ;;  %1929 = vmatprep.subr.bf16.mxu1 %v8804_v60  ;;  %v8891_v59 = vld [vmem:[#allocation2 + $0x584] ss:$16 sps:$4 sm:$0xff]   ;;  %v8894_v60 = vld [vmem:[#allocation2 + $0x58c] ss:$16 sps:$4 sm:$0xff]  }
  0xc1   :  { %1758 = vmatpush1.bf16.msra.mxu0 %v8799_v61  ;;  %1930 = vmatpush1.bf16.msra.mxu1 %v8802_v62  ;;  %v8889_v61 = vld [vmem:[#allocation2 + $0x580] ss:$16 sps:$4 sm:$0xff]   ;;  %v8892_v62 = vld [vmem:[#allocation2 + $0x588] ss:$16 sps:$4 sm:$0xff]  }
  0xc2   :  { %1759 = vmatprep.subr.bf16.mxu0 %v8807_v63  ;;  %1931 = vmatprep.subr.bf16.mxu1 %v8810_v0  ;;  %v8897_v63 = vld [vmem:[#allocation2 + $0x5a4] ss:$16 sps:$4 sm:$0xff]   ;;  %v8900_v0 = vld [vmem:[#allocation2 + $0x5ac] ss:$16 sps:$4 sm:$0xff]  }
  0xc5   :  { %1760 = vmatpush1.bf16.msra.mxu0 %v8805_v1  ;;  %1932 = vmatpush1.bf16.msra.mxu1 %v8808_v2  ;;  %v8895_v1 = vld [vmem:[#allocation2 + $0x5a0] ss:$16 sps:$4 sm:$0xff]   ;;  %v8898_v2 = vld [vmem:[#allocation2 + $0x5a8] ss:$16 sps:$4 sm:$0xff]  }
  0xc6   :  { %1761 = vmatprep.subr.bf16.mxu0 %v8813_v3  ;;  %1933 = vmatprep.subr.bf16.mxu1 %v8816_v4  ;;  %v8903_v3 = vld [vmem:[#allocation2 + $0x5c4] ss:$16 sps:$4 sm:$0xff]   ;;  %v8906_v4 = vld [vmem:[#allocation2 + $0x5cc] ss:$16 sps:$4 sm:$0xff]  }
  0xc9   :  { %1762 = vmatpush1.bf16.msra.mxu0 %v8811_v5  ;;  %1934 = vmatpush1.bf16.msra.mxu1 %v8814_v6  ;;  %v8901_v5 = vld [vmem:[#allocation2 + $0x5c0] ss:$16 sps:$4 sm:$0xff]   ;;  %v8904_v6 = vld [vmem:[#allocation2 + $0x5c8] ss:$16 sps:$4 sm:$0xff]  }
  0xca   :  { %1774 = vmatprep.subr.bf16.mxu0 %v8819_v7  ;;  %1946 = vmatprep.subr.bf16.mxu1 %v8822_v8  ;;  %v8909_v7 = vld [vmem:[#allocation2 + $0x5e4] ss:$16 sps:$4 sm:$0xff]   ;;  %v8912_v8 = vld [vmem:[#allocation2 + $0x5ec] ss:$16 sps:$4 sm:$0xff]  }
  0xcc   :  { %1764 = vmatmul.mubr.bf16.vlgmr.msra.gmra.mrb[0].mxu0 %v7449_v9  ;;  %1936 = vmatmul.mubr.bf16.vlgmr.msra.gmra.mrb[0].mxu1 %v7449_v9  ;;  %v8907_v9 = vld [vmem:[#allocation2 + $0x5e0] ss:$16 sps:$4 sm:$0xff]  }
  0xcd   :  { %1775 = vmatpush1.bf16.msra.mxu0 %v8817_v10  ;;  %1947 = vmatpush1.bf16.msra.mxu1 %v8820_v11  ;;  %v8910_v10 = vld [vmem:[#allocation2 + $0x5e8] ss:$16 sps:$4 sm:$0xff]   ;;  %v8915_v11 = vld [vmem:[#allocation2 + $0x604] ss:$16 sps:$4 sm:$0xff]  }
  0xce   :  { %1776 = vmatprep.subr.bf16.mxu0 %v8825_v12  ;;  %1948 = vmatprep.subr.bf16.mxu1 %v8828_v13  ;;  %v8918_v12 = vld [vmem:[#allocation2 + $0x60c] ss:$16 sps:$4 sm:$0xff]   ;;  %v8913_v13 = vld [vmem:[#allocation2 + $0x600] ss:$16 sps:$4 sm:$0xff]  }
  0xcf   :  { %1806 = vmatprep.mubr.bf16.mxu0 %v7452_v16  ;;  %1978 = vmatprep.mubr.bf16.mxu1 %v7452_v16  ;;  %v8916_v16 = vld [vmem:[#allocation2 + $0x608] ss:$16 sps:$4 sm:$0xff]  }
  0xd1   :  { %1777 = vmatpush1.bf16.msra.mxu0 %v8823_v17  ;;  %1949 = vmatpush1.bf16.msra.mxu1 %v8826_v18  ;;  %v7451_v17 = vcombine.low %v10158_v14, %v10163_v15  ;;  %v8921_v18 = vld [vmem:[#allocation2 + $0x624] ss:$16 sps:$4 sm:$0xff]  }
  0xd2   :  { %1778 = vmatprep.subr.bf16.mxu0 %v8831_v19  ;;  %1950 = vmatprep.subr.bf16.mxu1 %v8834_v20  ;;  %v10172_v19 = vld [vmem:[%s10345_s0 + $0x18] sm:$0xff]  ;;  %v8927_v15 = vld [vmem:[#allocation2 + $0x644] ss:$16 sps:$4 sm:$0xff]  }
  0xd3   :  { %v10177_v20 = vld [vmem:[%s10345_s0 + $0x38] sm:$0xff] }
  0xd4   :  { %v7454_v14 = vcombine.high %v10172_v19, %v10177_v20 }
  0xd5   :  { %1779 = vmatpush1.bf16.msra.mxu0 %v8829_v21  ;;  %1951 = vmatpush1.bf16.msra.mxu1 %v8832_v22  ;;  %v8924_v21 = vld [vmem:[#allocation2 + $0x62c] ss:$16 sps:$4 sm:$0xff]   ;;  %v8919_v22 = vld [vmem:[#allocation2 + $0x620] ss:$16 sps:$4 sm:$0xff]  }
  0xd6   :  { %1780 = vmatprep.subr.bf16.mxu0 %v8837_v23  ;;  %1952 = vmatprep.subr.bf16.mxu1 %v8840_v24  ;;  %v8922_v23 = vld [vmem:[#allocation2 + $0x628] ss:$16 sps:$4 sm:$0xff]   ;;  %v8930_v24 = vld [vmem:[#allocation2 + $0x64c] ss:$16 sps:$4 sm:$0xff]  }
  0xd9   :  { %1781 = vmatpush1.bf16.msra.mxu0 %v8835_v25  ;;  %1953 = vmatpush1.bf16.msra.mxu1 %v8838_v26  ;;  %v8925_v25 = vld [vmem:[#allocation2 + $0x640] ss:$16 sps:$4 sm:$0xff]   ;;  %v8928_v26 = vld [vmem:[#allocation2 + $0x648] ss:$16 sps:$4 sm:$0xff]  }
  0xda   :  { %1782 = vmatprep.subr.bf16.mxu0 %v8843_v27  ;;  %1954 = vmatprep.subr.bf16.mxu1 %v8846_v28  ;;  %v8933_v27 = vld [vmem:[#allocation2 + $0x664] ss:$16 sps:$4 sm:$0xff]   ;;  %v8936_v28 = vld [vmem:[#allocation2 + $0x66c] ss:$16 sps:$4 sm:$0xff]  }
  0xdd   :  { %1783 = vmatpush1.bf16.msra.mxu0 %v8841_v29  ;;  %1955 = vmatpush1.bf16.msra.mxu1 %v8844_v30  ;;  %v8931_v29 = vld [vmem:[#allocation2 + $0x660] ss:$16 sps:$4 sm:$0xff]   ;;  %v8934_v30 = vld [vmem:[#allocation2 + $0x668] ss:$16 sps:$4 sm:$0xff]  }
  0xde   :  { %1784 = vmatprep.subr.bf16.mxu0 %v8849_v31  ;;  %1956 = vmatprep.subr.bf16.mxu1 %v8852_v32  ;;  %v8939_v31 = vld [vmem:[#allocation2 + $0x684] ss:$16 sps:$4 sm:$0xff]   ;;  %v8942_v32 = vld [vmem:[#allocation2 + $0x68c] ss:$16 sps:$4 sm:$0xff]  }
  0xe1   :  { %1785 = vmatpush1.bf16.msra.mxu0 %v8847_v33  ;;  %1957 = vmatpush1.bf16.msra.mxu1 %v8850_v34  ;;  %v8937_v33 = vld [vmem:[#allocation2 + $0x680] ss:$16 sps:$4 sm:$0xff]   ;;  %v8940_v34 = vld [vmem:[#allocation2 + $0x688] ss:$16 sps:$4 sm:$0xff]  }
  0xe2   :  { %1786 = vmatprep.subr.bf16.mxu0 %v8855_v35  ;;  %1958 = vmatprep.subr.bf16.mxu1 %v8858_v36  ;;  %v8945_v35 = vld [vmem:[#allocation2 + $0x6a4] ss:$16 sps:$4 sm:$0xff]   ;;  %v8948_v36 = vld [vmem:[#allocation2 + $0x6ac] ss:$16 sps:$4 sm:$0xff]  }
  0xe5   :  { %1787 = vmatpush1.bf16.msra.mxu0 %v8853_v37  ;;  %1959 = vmatpush1.bf16.msra.mxu1 %v8856_v38  ;;  %v8943_v37 = vld [vmem:[#allocation2 + $0x6a0] ss:$16 sps:$4 sm:$0xff]   ;;  %v8946_v38 = vld [vmem:[#allocation2 + $0x6a8] ss:$16 sps:$4 sm:$0xff]  }
  0xe6   :  { %1788 = vmatprep.subr.bf16.mxu0 %v8861_v39  ;;  %1960 = vmatprep.subr.bf16.mxu1 %v8864_v40  ;;  %v8951_v39 = vld [vmem:[#allocation2 + $0x6c4] ss:$16 sps:$4 sm:$0xff]   ;;  %v8954_v40 = vld [vmem:[#allocation2 + $0x6cc] ss:$16 sps:$4 sm:$0xff]  }
  0xe9   :  { %1789 = vmatpush1.bf16.msra.mxu0 %v8859_v41  ;;  %1961 = vmatpush1.bf16.msra.mxu1 %v8862_v42  ;;  %v8949_v41 = vld [vmem:[#allocation2 + $0x6c0] ss:$16 sps:$4 sm:$0xff]   ;;  %v8952_v42 = vld [vmem:[#allocation2 + $0x6c8] ss:$16 sps:$4 sm:$0xff]  }
  0xea   :  { %1790 = vmatprep.subr.bf16.mxu0 %v8867_v43  ;;  %1962 = vmatprep.subr.bf16.mxu1 %v8870_v44  ;;  %v8957_v43 = vld [vmem:[#allocation2 + $0x6e4] ss:$16 sps:$4 sm:$0xff]   ;;  %v8960_v44 = vld [vmem:[#allocation2 + $0x6ec] ss:$16 sps:$4 sm:$0xff]  }
  0xed   :  { %1791 = vmatpush1.bf16.msra.mxu0 %v8865_v45  ;;  %1963 = vmatpush1.bf16.msra.mxu1 %v8868_v46  ;;  %v8955_v45 = vld [vmem:[#allocation2 + $0x6e0] ss:$16 sps:$4 sm:$0xff]   ;;  %v8958_v46 = vld [vmem:[#allocation2 + $0x6e8] ss:$16 sps:$4 sm:$0xff]  }
  0xee   :  { %1792 = vmatprep.subr.bf16.mxu0 %v8873_v47  ;;  %1964 = vmatprep.subr.bf16.mxu1 %v8876_v48  ;;  %v8963_v47 = vld [vmem:[#allocation2 + $0x704] ss:$16 sps:$4 sm:$0xff]   ;;  %v8966_v48 = vld [vmem:[#allocation2 + $0x70c] ss:$16 sps:$4 sm:$0xff]  }
  0xf1   :  { %1793 = vmatpush1.bf16.msra.mxu0 %v8871_v49  ;;  %1965 = vmatpush1.bf16.msra.mxu1 %v8874_v50  ;;  %v8961_v49 = vld [vmem:[#allocation2 + $0x700] ss:$16 sps:$4 sm:$0xff]   ;;  %v8964_v50 = vld [vmem:[#allocation2 + $0x708] ss:$16 sps:$4 sm:$0xff]  }
  0xf2   :  { %1794 = vmatprep.subr.bf16.mxu0 %v8879_v51  ;;  %1966 = vmatprep.subr.bf16.mxu1 %v8882_v52  ;;  %v8969_v51 = vld [vmem:[#allocation2 + $0x724] ss:$16 sps:$4 sm:$0xff]   ;;  %v8972_v52 = vld [vmem:[#allocation2 + $0x72c] ss:$16 sps:$4 sm:$0xff]  }
  0xf5   :  { %1795 = vmatpush1.bf16.msra.mxu0 %v8877_v53  ;;  %1967 = vmatpush1.bf16.msra.mxu1 %v8880_v54  ;;  %v8967_v53 = vld [vmem:[#allocation2 + $0x720] ss:$16 sps:$4 sm:$0xff]   ;;  %v8970_v54 = vld [vmem:[#allocation2 + $0x728] ss:$16 sps:$4 sm:$0xff]  }
  0xf6   :  { %1796 = vmatprep.subr.bf16.mxu0 %v8885_v55  ;;  %1968 = vmatprep.subr.bf16.mxu1 %v8888_v56  ;;  %v8975_v55 = vld [vmem:[#allocation2 + $0x744] ss:$16 sps:$4 sm:$0xff]   ;;  %v8978_v56 = vld [vmem:[#allocation2 + $0x74c] ss:$16 sps:$4 sm:$0xff]  }
  0xf9   :  { %1797 = vmatpush1.bf16.msra.mxu0 %v8883_v57  ;;  %1969 = vmatpush1.bf16.msra.mxu1 %v8886_v58  ;;  %v8973_v57 = vld [vmem:[#allocation2 + $0x740] ss:$16 sps:$4 sm:$0xff]   ;;  %v8976_v58 = vld [vmem:[#allocation2 + $0x748] ss:$16 sps:$4 sm:$0xff]  }
  0xfa   :  { %1798 = vmatprep.subr.bf16.mxu0 %v8891_v59  ;;  %1970 = vmatprep.subr.bf16.mxu1 %v8894_v60  ;;  %v8981_v59 = vld [vmem:[#allocation2 + $0x764] ss:$16 sps:$4 sm:$0xff]   ;;  %v8984_v60 = vld [vmem:[#allocation2 + $0x76c] ss:$16 sps:$4 sm:$0xff]  }
  0xfd   :  { %1799 = vmatpush1.bf16.msra.mxu0 %v8889_v61  ;;  %1971 = vmatpush1.bf16.msra.mxu1 %v8892_v62  ;;  %v8979_v61 = vld [vmem:[#allocation2 + $0x760] ss:$16 sps:$4 sm:$0xff]   ;;  %v8982_v62 = vld [vmem:[#allocation2 + $0x768] ss:$16 sps:$4 sm:$0xff]  }
  0xfe   :  { %1800 = vmatprep.subr.bf16.mxu0 %v8897_v63  ;;  %1972 = vmatprep.subr.bf16.mxu1 %v8900_v0  ;;  %v8987_v63 = vld [vmem:[#allocation2 + $0x784] ss:$16 sps:$4 sm:$0xff]   ;;  %v8990_v0 = vld [vmem:[#allocation2 + $0x78c] ss:$16 sps:$4 sm:$0xff]  }
 0x101   :  { %1801 = vmatpush1.bf16.msra.mxu0 %v8895_v1  ;;  %1973 = vmatpush1.bf16.msra.mxu1 %v8898_v2  ;;  %v8985_v1 = vld [vmem:[#allocation2 + $0x780] ss:$16 sps:$4 sm:$0xff]   ;;  %v8988_v2 = vld [vmem:[#allocation2 + $0x788] ss:$16 sps:$4 sm:$0xff]  }
 0x102   :  { %1802 = vmatprep.subr.bf16.mxu0 %v8903_v3  ;;  %1974 = vmatprep.subr.bf16.mxu1 %v8906_v4  ;;  %v8993_v3 = vld [vmem:[#allocation2 + $0x7a4] ss:$16 sps:$4 sm:$0xff]   ;;  %v8996_v4 = vld [vmem:[#allocation2 + $0x7ac] ss:$16 sps:$4 sm:$0xff]  }
 0x105   :  { %1803 = vmatpush1.bf16.msra.mxu0 %v8901_v5  ;;  %1975 = vmatpush1.bf16.msra.mxu1 %v8904_v6  ;;  %v8991_v5 = vld [vmem:[#allocation2 + $0x7a0] ss:$16 sps:$4 sm:$0xff]   ;;  %v8994_v6 = vld [vmem:[#allocation2 + $0x7a8] ss:$16 sps:$4 sm:$0xff]  }
 0x106   :  { %1804 = vmatprep.subr.bf16.mxu0 %v8909_v7  ;;  %1976 = vmatprep.subr.bf16.mxu1 %v8912_v8  ;;  %v8999_v7 = vld [vmem:[#allocation2 + $0x7c4] ss:$16 sps:$4 sm:$0xff]   ;;  %v9002_v8 = vld [vmem:[#allocation2 + $0x7cc] ss:$16 sps:$4 sm:$0xff]  }
 0x109   :  { %1805 = vmatpush1.bf16.msra.mxu0 %v8907_v9  ;;  %1977 = vmatpush1.bf16.msra.mxu1 %v8910_v10  ;;  %v8997_v9 = vld [vmem:[#allocation2 + $0x7c0] ss:$16 sps:$4 sm:$0xff]   ;;  %v9000_v10 = vld [vmem:[#allocation2 + $0x7c8] ss:$16 sps:$4 sm:$0xff]  }
 0x10a   :  { %1817 = vmatprep.subr.bf16.mxu0 %v8915_v11  ;;  %1989 = vmatprep.subr.bf16.mxu1 %v8918_v12  ;;  %v9005_v11 = vld [vmem:[#allocation2 + $0x7e4] ss:$16 sps:$4 sm:$0xff]   ;;  %v9008_v12 = vld [vmem:[#allocation2 + $0x7ec] ss:$16 sps:$4 sm:$0xff]  }
 0x10c   :  { %1807 = vmatmul.mubr.bf16.vlgmr.msra.gmra.mrb[0].mxu0 %v7451_v17  ;;  %1979 = vmatmul.mubr.bf16.vlgmr.msra.gmra.mrb[0].mxu1 %v7451_v17  ;;  %v9011_v17 = vld [vmem:[#allocation4 + $0x4] ss:$8 sps:$4 sm:$0xff]  }
 0x10d   :  { %1818 = vmatpush1.bf16.msra.mxu0 %v8913_v13  ;;  %1990 = vmatpush1.bf16.msra.mxu1 %v8916_v16  ;;  %v9003_v13 = vld [vmem:[#allocation2 + $0x7e0] ss:$16 sps:$4 sm:$0xff]   ;;  %v9006_v16 = vld [vmem:[#allocation2 + $0x7e8] ss:$16 sps:$4 sm:$0xff]  }
 0x10e   :  { %1819 = vmatprep.subr.bf16.mxu0 %v8921_v18  ;;  %1991 = vmatprep.subr.bf16.mxu1 %v8924_v21  ;;  %v9009_v18 = vld [vmem:[#allocation4] ss:$8 sps:$4 sm:$0xff]   ;;  %v7453_v21 = vcombine.low %v10172_v19, %v10177_v20  ;;  %v9026_v19 = vld [vmem:[#allocation4 + $0x54] ss:$8 sps:$4 sm:$0xff]   ;;  %v9024_v20 = vld [vmem:[#allocation4 + $0x50] ss:$8 sps:$4 sm:$0xff]  }
 0x10f   :  { %1849 = vmatprep.mubr.bf16.mxu0 %v7454_v14  ;;  %2021 = vmatprep.mubr.bf16.mxu1 %v7454_v14  ;;  %v9017_v14 = vld [vmem:[#allocation4 + $0x24] ss:$8 sps:$4 sm:$0xff]  }
 0x111   :  { %1820 = vmatpush1.bf16.msra.mxu0 %v8919_v22  ;;  %1992 = vmatpush1.bf16.msra.mxu1 %v8922_v23  ;;  %v9014_v22 = vld [vmem:[#allocation4 + $0x14] ss:$8 sps:$4 sm:$0xff]   ;;  %v9012_v23 = vld [vmem:[#allocation4 + $0x10] ss:$8 sps:$4 sm:$0xff]  }
 0x112   :  { %1821 = vmatprep.subr.bf16.mxu0 %v8927_v15  ;;  %1993 = vmatprep.subr.bf16.mxu1 %v8930_v24  ;;  %v9015_v15 = vld [vmem:[#allocation4 + $0x20] ss:$8 sps:$4 sm:$0xff]   ;;  %v9020_v24 = vld [vmem:[#allocation4 + $0x34] ss:$8 sps:$4 sm:$0xff]  }
 0x115   :  { %1822 = vmatpush1.bf16.msra.mxu0 %v8925_v25  ;;  %1994 = vmatpush1.bf16.msra.mxu1 %v8928_v26  ;;  %v9018_v25 = vld [vmem:[#allocation4 + $0x30] ss:$8 sps:$4 sm:$0xff]   ;;  %v9023_v26 = vld [vmem:[#allocation4 + $0x44] ss:$8 sps:$4 sm:$0xff]  }
 0x116   :  { %1823 = vmatprep.subr.bf16.mxu0 %v8933_v27  ;;  %1995 = vmatprep.subr.bf16.mxu1 %v8936_v28  ;;  %v9021_v27 = vld [vmem:[#allocation4 + $0x40] ss:$8 sps:$4 sm:$0xff]   ;;  %v9029_v28 = vld [vmem:[#allocation4 + $0x64] ss:$8 sps:$4 sm:$0xff]  }
 0x119   :  { %1824 = vmatpush1.bf16.msra.mxu0 %v8931_v29  ;;  %1996 = vmatpush1.bf16.msra.mxu1 %v8934_v30  ;;  %v9027_v29 = vld [vmem:[#allocation4 + $0x60] ss:$8 sps:$4 sm:$0xff]   ;;  %v9032_v30 = vld [vmem:[#allocation4 + $0x74] ss:$8 sps:$4 sm:$0xff]  }
 0x11a   :  { %1825 = vmatprep.subr.bf16.mxu0 %v8939_v31  ;;  %1997 = vmatprep.subr.bf16.mxu1 %v8942_v32  ;;  %v9030_v31 = vld [vmem:[#allocation4 + $0x70] ss:$8 sps:$4 sm:$0xff]   ;;  %v9035_v32 = vld [vmem:[#allocation4 + $0x84] ss:$8 sps:$4 sm:$0xff]  }
 0x11d   :  { %1826 = vmatpush1.bf16.msra.mxu0 %v8937_v33  ;;  %1998 = vmatpush1.bf16.msra.mxu1 %v8940_v34  ;;  %v9033_v33 = vld [vmem:[#allocation4 + $0x80] ss:$8 sps:$4 sm:$0xff]   ;;  %v9038_v34 = vld [vmem:[#allocation4 + $0x94] ss:$8 sps:$4 sm:$0xff]  }
 0x11e   :  { %1827 = vmatprep.subr.bf16.mxu0 %v8945_v35  ;;  %1999 = vmatprep.subr.bf16.mxu1 %v8948_v36  ;;  %v9036_v35 = vld [vmem:[#allocation4 + $0x90] ss:$8 sps:$4 sm:$0xff]   ;;  %v9041_v36 = vld [vmem:[#allocation4 + $0xa4] ss:$8 sps:$4 sm:$0xff]  }
 0x121   :  { %1828 = vmatpush1.bf16.msra.mxu0 %v8943_v37  ;;  %2000 = vmatpush1.bf16.msra.mxu1 %v8946_v38  ;;  %v9039_v37 = vld [vmem:[#allocation4 + $0xa0] ss:$8 sps:$4 sm:$0xff]   ;;  %v9044_v38 = vld [vmem:[#allocation4 + $0xb4] ss:$8 sps:$4 sm:$0xff]  }
 0x122   :  { %1829 = vmatprep.subr.bf16.mxu0 %v8951_v39  ;;  %2001 = vmatprep.subr.bf16.mxu1 %v8954_v40  ;;  %v9042_v39 = vld [vmem:[#allocation4 + $0xb0] ss:$8 sps:$4 sm:$0xff]   ;;  %v9047_v40 = vld [vmem:[#allocation4 + $0xc4] ss:$8 sps:$4 sm:$0xff]  }
 0x125   :  { %1830 = vmatpush1.bf16.msra.mxu0 %v8949_v41  ;;  %2002 = vmatpush1.bf16.msra.mxu1 %v8952_v42  ;;  %v9045_v41 = vld [vmem:[#allocation4 + $0xc0] ss:$8 sps:$4 sm:$0xff]   ;;  %v9050_v42 = vld [vmem:[#allocation4 + $0xd4] ss:$8 sps:$4 sm:$0xff]  }
 0x126   :  { %1831 = vmatprep.subr.bf16.mxu0 %v8957_v43  ;;  %2003 = vmatprep.subr.bf16.mxu1 %v8960_v44  ;;  %v9048_v43 = vld [vmem:[#allocation4 + $0xd0] ss:$8 sps:$4 sm:$0xff]   ;;  %v9053_v44 = vld [vmem:[#allocation4 + $0xe4] ss:$8 sps:$4 sm:$0xff]  }
 0x129   :  { %1832 = vmatpush1.bf16.msra.mxu0 %v8955_v45  ;;  %2004 = vmatpush1.bf16.msra.mxu1 %v8958_v46  ;;  %v9051_v45 = vld [vmem:[#allocation4 + $0xe0] ss:$8 sps:$4 sm:$0xff]   ;;  %v9056_v46 = vld [vmem:[#allocation4 + $0xf4] ss:$8 sps:$4 sm:$0xff]  }
 0x12a   :  { %1833 = vmatprep.subr.bf16.mxu0 %v8963_v47  ;;  %2005 = vmatprep.subr.bf16.mxu1 %v8966_v48  ;;  %v9054_v47 = vld [vmem:[#allocation4 + $0xf0] ss:$8 sps:$4 sm:$0xff]   ;;  %v9059_v48 = vld [vmem:[#allocation4 + $0x104] ss:$8 sps:$4 sm:$0xff]  }
 0x12d   :  { %1834 = vmatpush1.bf16.msra.mxu0 %v8961_v49  ;;  %2006 = vmatpush1.bf16.msra.mxu1 %v8964_v50  ;;  %v348_v49 = vlaneseq }
 0x12e   :  { %1835 = vmatprep.subr.bf16.mxu0 %v8969_v51  ;;  %2007 = vmatprep.subr.bf16.mxu1 %v8972_v52 }
 0x12f   :  { %v349_v50 = vshrl.u32 %v348_v49, 7  ;;  %v9092_v49 = vld [vmem:[#allocation4 + $0x1b4] ss:$8 sps:$4 sm:$0xff]  }
 0x131   :  { %1836 = vmatpush1.bf16.msra.mxu0 %v8967_v53  ;;  %2008 = vmatpush1.bf16.msra.mxu1 %v8970_v54  ;;  %v10183_v51 = vsub.s32 0, %v349_v50  ;;  %v10185_v52 = vsub.s32 2, %v349_v50  ;;  %v346_v53 = vld [vmem:[#allocation7] ss:$8 sm:$0xf]  ;;  %v10187_v54 = vsub.s32 1, %v349_v50 }
 0x132   :  { %1837 = vmatprep.subr.bf16.mxu0 %v8975_v55  ;;  %2009 = vmatprep.subr.bf16.mxu1 %v8978_v56  ;;  %v10189_v55 = vsub.s32 3, %v349_v50  ;;  %v9090_v50 = vld [vmem:[#allocation4 + $0x1b0] ss:$8 sps:$4 sm:$0xff]  }
 0x133   :  { %v351_v56 = vrot.slane %v346_v53, %v10183_v51 }
 0x135   :  { %1838 = vmatpush1.bf16.msra.mxu0 %v8973_v57  ;;  %2010 = vmatpush1.bf16.msra.mxu1 %v8976_v58  ;;  %v359_v57 = vrot.slane %v346_v53, %v10185_v52  ;;  %v355_v58 = vrot.slane %v346_v53, %v10187_v54 }
 0x136   :  { %1839 = vmatprep.subr.bf16.mxu0 %v8981_v59  ;;  %2011 = vmatprep.subr.bf16.mxu1 %v8984_v60  ;;  %v363_v59 = vrot.slane %v346_v53, %v10189_v55  ;;  %v9190_v53 = vld [vmem:[#allocation6 + $0x50] sm:$0xff]  }
 0x139   :  { %1840 = vmatpush1.bf16.msra.mxu0 %v8979_v61  ;;  %2012 = vmatpush1.bf16.msra.mxu1 %v8982_v62 }
 0x13a   :  { %1841 = vmatprep.subr.bf16.mxu0 %v8987_v63  ;;  %2013 = vmatprep.subr.bf16.mxu1 %v8990_v0 }
 0x13d   :  { %1842 = vmatpush1.bf16.msra.mxu0 %v8985_v1  ;;  %2014 = vmatpush1.bf16.msra.mxu1 %v8988_v2 }
 0x13e   :  { %1843 = vmatprep.subr.bf16.mxu0 %v8993_v3  ;;  %2015 = vmatprep.subr.bf16.mxu1 %v8996_v4 }
 0x141   :  { %1844 = vmatpush1.bf16.msra.mxu0 %v8991_v5  ;;  %2016 = vmatpush1.bf16.msra.mxu1 %v8994_v6 }
 0x142   :  { %1845 = vmatprep.subr.bf16.mxu0 %v8999_v7  ;;  %2017 = vmatprep.subr.bf16.mxu1 %v9002_v8 }
 0x145   :  { %1846 = vmatpush1.bf16.msra.mxu0 %v8997_v9  ;;  %2018 = vmatpush1.bf16.msra.mxu1 %v9000_v10 }
 0x146   :  { %1847 = vmatprep.subr.bf16.mxu0 %v9005_v11  ;;  %2019 = vmatprep.subr.bf16.mxu1 %v9008_v12 }
 0x149   :  { %1848 = vmatpush1.bf16.msra.mxu0 %v9003_v13  ;;  %2020 = vmatpush1.bf16.msra.mxu1 %v9006_v16 }
 0x14a   :  { %2441 = vmatprep.subr.bf16.mxu0 %v9011_v17 }
 0x14c   :  { %1850 = vmatmul.mubr.bf16.vlgmr.msra.gmra.mrb[0].mxu0 %v7453_v21  ;;  %2022 = vmatmul.mubr.bf16.vlgmr.msra.gmra.mrb[0].mxu1 %v7453_v21 }
 0x14d   :  { %2442 = vmatpush1.bf16.msra.mxu0 %v9009_v18 }
 0x14e   :  { %2443 = vmatprep.subr.bf16.mxu0 %v9014_v22 }
 0x151   :  { %2444 = vmatpush1.bf16.msra.mxu0 %v9012_v23 }
 0x152   :  { %2445 = vmatprep.subr.bf16.mxu0 %v9017_v14 }
 0x155   :  { %2446 = vmatpush1.bf16.msra.mxu0 %v9015_v15 }
 0x156   :  { %2447 = vmatprep.subr.bf16.mxu0 %v9020_v24 }
 0x159   :  { %2448 = vmatpush1.bf16.msra.mxu0 %v9018_v25 }
 0x15a   :  { %2449 = vmatprep.subr.bf16.mxu0 %v9023_v26  ;;  %v9057_v26 = vld [vmem:[#allocation4 + $0x100] ss:$8 sps:$4 sm:$0xff]  }
 0x15d   :  { %2450 = vmatpush1.bf16.msra.mxu0 %v9021_v27  ;;  %v9062_v27 = vld [vmem:[#allocation4 + $0x114] ss:$8 sps:$4 sm:$0xff]  }
 0x15e   :  { %2451 = vmatprep.subr.bf16.mxu0 %v9026_v19  ;;  %v9060_v19 = vld [vmem:[#allocation4 + $0x110] ss:$8 sps:$4 sm:$0xff]  }
 0x161   :  { %2452 = vmatpush1.bf16.msra.mxu0 %v9024_v20  ;;  %v9065_v20 = vld [vmem:[#allocation4 + $0x124] ss:$8 sps:$4 sm:$0xff]  }
 0x162   :  { %2453 = vmatprep.subr.bf16.mxu0 %v9029_v28  ;;  %v9063_v28 = vld [vmem:[#allocation4 + $0x120] ss:$8 sps:$4 sm:$0xff]  }
 0x165   :  { %2454 = vmatpush1.bf16.msra.mxu0 %v9027_v29  ;;  %v9068_v29 = vld [vmem:[#allocation4 + $0x134] ss:$8 sps:$4 sm:$0xff]  }
 0x166   :  { %2455 = vmatprep.subr.bf16.mxu0 %v9032_v30  ;;  %v9066_v30 = vld [vmem:[#allocation4 + $0x130] ss:$8 sps:$4 sm:$0xff]  }
 0x169   :  { %2456 = vmatpush1.bf16.msra.mxu0 %v9030_v31  ;;  %v9071_v31 = vld [vmem:[#allocation4 + $0x144] ss:$8 sps:$4 sm:$0xff]  }
 0x16a   :  { %2457 = vmatprep.subr.bf16.mxu0 %v9035_v32  ;;  %v9069_v32 = vld [vmem:[#allocation4 + $0x140] ss:$8 sps:$4 sm:$0xff]  }
 0x16d   :  { %2458 = vmatpush1.bf16.msra.mxu0 %v9033_v33  ;;  %v9074_v33 = vld [vmem:[#allocation4 + $0x154] ss:$8 sps:$4 sm:$0xff]  }
 0x16e   :  { %2459 = vmatprep.subr.bf16.mxu0 %v9038_v34  ;;  %v9072_v34 = vld [vmem:[#allocation4 + $0x150] ss:$8 sps:$4 sm:$0xff]  }
 0x171   :  { %2460 = vmatpush1.bf16.msra.mxu0 %v9036_v35  ;;  %v9077_v35 = vld [vmem:[#allocation4 + $0x164] ss:$8 sps:$4 sm:$0xff]  }
 0x172   :  { %2461 = vmatprep.subr.bf16.mxu0 %v9041_v36  ;;  %v9075_v36 = vld [vmem:[#allocation4 + $0x160] ss:$8 sps:$4 sm:$0xff]  }
 0x175   :  { %2462 = vmatpush1.bf16.msra.mxu0 %v9039_v37  ;;  %v9080_v37 = vld [vmem:[#allocation4 + $0x174] ss:$8 sps:$4 sm:$0xff]  }
 0x176   :  { %2463 = vmatprep.subr.bf16.mxu0 %v9044_v38  ;;  %v9078_v38 = vld [vmem:[#allocation4 + $0x170] ss:$8 sps:$4 sm:$0xff]  }
 0x179   :  { %2464 = vmatpush1.bf16.msra.mxu0 %v9042_v39  ;;  %v9083_v39 = vld [vmem:[#allocation4 + $0x184] ss:$8 sps:$4 sm:$0xff]  }
 0x17a   :  { %2465 = vmatprep.subr.bf16.mxu0 %v9047_v40  ;;  %v9081_v40 = vld [vmem:[#allocation4 + $0x180] ss:$8 sps:$4 sm:$0xff]  }
 0x17d   :  { %2466 = vmatpush1.bf16.msra.mxu0 %v9045_v41  ;;  %v9086_v41 = vld [vmem:[#allocation4 + $0x194] ss:$8 sps:$4 sm:$0xff]  }
 0x17e   :  { %2467 = vmatprep.subr.bf16.mxu0 %v9050_v42  ;;  %v9084_v42 = vld [vmem:[#allocation4 + $0x190] ss:$8 sps:$4 sm:$0xff]  }
 0x181   :  { %2468 = vmatpush1.bf16.msra.mxu0 %v9048_v43  ;;  %v9180_v43 = vld [vmem:[#allocation6 + $0x40] sm:$0xff]  }
 0x182   :  { %2469 = vmatprep.subr.bf16.mxu0 %v9053_v44  ;;  %v9181_v44 = vld [vmem:[#allocation6] sm:$0xff]   ;;  %8360 = vmatprep.subr.bf16.mxu1 %v9180_v43 }
 0x183   :  { %8361 = vmatpush3.bf16.msra.mxu1 %v9181_v44  ;;  %v9153_v44 = vld [vmem:[#allocation2 + $0xa08] ss:$16 sps:$4 sm:$0xff]  }
 0x185   :  { %2470 = vmatpush1.bf16.msra.mxu0 %v9051_v45  ;;  %v9089_v45 = vld [vmem:[#allocation4 + $0x1a4] ss:$8 sps:$4 sm:$0xff]  }
 0x186   :  { %2471 = vmatprep.subr.bf16.mxu0 %v9056_v46  ;;  %v9087_v46 = vld [vmem:[#allocation4 + $0x1a0] ss:$8 sps:$4 sm:$0xff]  }
 0x189   :  { %2472 = vmatpush1.bf16.msra.mxu0 %v9054_v47  ;;  %v9185_v47 = vld [vmem:[#allocation6 + $0x48] sm:$0xff]  }
 0x18a   :  { %2484 = vmatprep.subr.bf16.mxu0 %v9059_v48  ;;  %v9186_v48 = vld [vmem:[#allocation6 + $0x8] sm:$0xff]   ;;  %8362 = vmatprep.subr.bf16.mxu1 %v9185_v47 }
 0x18b   :  { %8363 = vmatpush3.bf16.msra.mxu1 %v9186_v48  ;;  %v9161_v47 = vld [vmem:[#allocation2 + $0xa4c] ss:$16 sps:$4 sm:$0xff]   ;;  %v9159_v48 = vld [vmem:[#allocation2 + $0xa48] ss:$16 sps:$4 sm:$0xff]  }
 0x18c   :  { %8364 = vmatprep.subr.bf16.mxu1 %v9190_v53  ;;  %v9167_v53 = vld [vmem:[#allocation2 + $0xa8c] ss:$16 sps:$4 sm:$0xff]  }
 0x21f   :  { %v1851_v60 = vpop.f32.mrb[0].mxu0  ;;  %v2023_v61 = vpop.f32.mrb[0].mxu1 }
 0x220   :  { %v8506_v62 = vadd.f32 %v1851_v60, %v351_v56  ;;  %v8510_v63 = vadd.f32 %v2023_v61, %v359_v57  ;;  %v1853_v0 = vpop.f32.mrb[1].mxu0  ;;  %v2025_v1 = vpop.f32.mrb[1].mxu1  ;;  %v9196_v60 = vld [vmem:[#allocation6 + $0x18] sm:$0xff]  }
 0x221   :  { %v8507_v2 = vadd.f32 %v1853_v0, %v355_v58  ;;  %v8511_v3 = vadd.f32 %v2025_v1, %v363_v59  ;;  %v1855_v4 = vpop.f32.mrb[2].mxu0  ;;  %v2027_v5 = vpop.f32.mrb[2].mxu1  ;;  %v9098_v61 = vld [vmem:[#allocation4 + $0x1d4] ss:$8 sps:$4 sm:$0xff]   ;;  %v9201_v0 = vld [vmem:[#allocation6 + $0x20] sm:$0xff]  }
 0x222   :  { %v8508_v6 = vadd.f32 %v1855_v4, %v351_v56  ;;  %v8512_v7 = vadd.f32 %v2027_v5, %v359_v57  ;;  %v1857_v8 = vpop.f32.mrb[3].mxu0  ;;  %v2029_v9 = vpop.f32.mrb[3].mxu1  ;;  %v2032_v12 = vmax.f32 %v8506_v62, 0.0  ;;  %v2034_v13 = vmax.f32 %v8510_v63, 0.0  ;;  %v9191_v56 = vld [vmem:[#allocation6 + $0x10] sm:$0xff]   ;;  %v9200_v63 = vld [vmem:[#allocation6 + $0x60] sm:$0xff]  }
 0x223   :  { %v8509_v10 = vadd.f32 %v1857_v8, %v355_v58  ;;  %v8513_v11 = vadd.f32 %v2029_v9, %v363_v59  ;;  %v2033_v18 = vmax.f32 %v8507_v2, 0.0  ;;  %v2035_v21 = vmax.f32 %v8511_v3, 0.0  ;;  %v9095_v57 = vld [vmem:[#allocation4 + $0x1c4] ss:$8 sps:$4 sm:$0xff]   ;;  %8365 = vmatpush3.bf16.msra.mxu1 %v9191_v56  ;;  %v9093_v58 = vld [vmem:[#allocation4 + $0x1c0] ss:$8 sps:$4 sm:$0xff]  }
 0x224   :  { %v2036_v16 = vmax.f32 %v8508_v6, 0.0  ;;  %v2038_v17 = vmax.f32 %v8512_v7, 0.0  ;;  %v9195_v59 = vld [vmem:[#allocation6 + $0x58] sm:$0xff]   ;;  %v9101_v1 = vld [vmem:[#allocation4 + $0x1e4] ss:$8 sps:$4 sm:$0xff]  }
 0x225   :  { %v2037_v22 = vmax.f32 %v8509_v10, 0.0  ;;  %v2039_v23 = vmax.f32 %v8513_v11, 0.0  ;;  %8366 = vmatprep.subr.bf16.mxu1 %v9195_v59  ;;  %v9096_v62 = vld [vmem:[#allocation4 + $0x1d0] ss:$8 sps:$4 sm:$0xff]   ;;  %v9099_v2 = vld [vmem:[#allocation4 + $0x1e0] ss:$8 sps:$4 sm:$0xff]  }
 0x226   :  { %v2040_v14 = vpack.c.bf16 %v2036_v16, %v2032_v12  ;;  %v10195_v15 = vpack.c.bf16 %v2038_v17, %v2034_v13  ;;  %v9205_v3 = vld [vmem:[#allocation6 + $0x68] sm:$0xff]   ;;  %v9104_v5 = vld [vmem:[#allocation4 + $0x1f4] ss:$8 sps:$4 sm:$0xff]   ;;  %v9102_v6 = vld [vmem:[#allocation4 + $0x1f0] ss:$8 sps:$4 sm:$0xff]  }
 0x227   :  { %v2041_v24 = vpack.c.bf16 %v2037_v22, %v2033_v18  ;;  %v2043_v25 = vpack.c.bf16 %v2039_v23, %v2035_v21  ;;  %8367 = vmatpush3.bf16.msra.mxu1 %v9196_v60  ;;  %v9206_v4 = vld [vmem:[#allocation6 + $0x28] sm:$0xff]   ;;  %v10200_v8 = vld [vmem:[%s10346_s1] sm:$0xff]  ;;  %v9210_v60 = vld [vmem:[#allocation6 + $0x70] sm:$0xff]  }
 0x228   :  { %8368 = vmatprep.subr.bf16.mxu1 %v9200_v63  ;;  %v9107_v7 = vld [vmem:[#allocation2 + $0x80c] ss:$16 sps:$4 sm:$0xff]   ;;  %v10205_v9 = vld [vmem:[%s10346_s1 + $0x20] sm:$0xff]  ;;  %v9105_v10 = vld [vmem:[#allocation2 + $0x808] ss:$16 sps:$4 sm:$0xff]  }
 0x229   :  { %2473 = vmatprep.mubr.bf16.mxu0 %v2041_v24  ;;  %v10209_v11 = vcombine.high %v10200_v8, %v10205_v9  ;;  %v9110_v12 = vld [vmem:[#allocation2 + $0x82c] ss:$16 sps:$4 sm:$0xff]   ;;  %v9108_v13 = vld [vmem:[#allocation2 + $0x828] ss:$16 sps:$4 sm:$0xff]   ;;  %v10215_v43 = vcombine.low %v10200_v8, %v10205_v9 }
 0x22a   :  { %2474 = vmatmul.mubr.bf16.vlgmr.msra.gmra.mrb[4].mxu0 %v2040_v14  ;;  %v9113_v16 = vld [vmem:[#allocation2 + $0x84c] ss:$16 sps:$4 sm:$0xff]   ;;  %v9111_v17 = vld [vmem:[#allocation2 + $0x848] ss:$16 sps:$4 sm:$0xff]  }
 0x22b   :  { %2485 = vmatpush1.bf16.msra.mxu0 %v9057_v26  ;;  %2516 = vmatprep.mubr.bf16.mxu0 %v2043_v25  ;;  %v9116_v18 = vld [vmem:[#allocation2 + $0x86c] ss:$16 sps:$4 sm:$0xff]   ;;  %v9114_v21 = vld [vmem:[#allocation2 + $0x868] ss:$16 sps:$4 sm:$0xff]  }
 0x22c   :  { %2486 = vmatprep.subr.bf16.mxu0 %v9062_v27  ;;  %8369 = vmatpush3.bf16.msra.mxu1 %v9201_v0  ;;  %v9119_v22 = vld [vmem:[#allocation2 + $0x88c] ss:$16 sps:$4 sm:$0xff]   ;;  %v9117_v23 = vld [vmem:[#allocation2 + $0x888] ss:$16 sps:$4 sm:$0xff]  }
 0x22d   :  { %8370 = vmatprep.subr.bf16.mxu1 %v9205_v3  ;;  %v9122_v14 = vld [vmem:[#allocation2 + $0x8ac] ss:$16 sps:$4 sm:$0xff]   ;;  %v9123_v25 = vld [vmem:[#allocation2 + $0x8c8] ss:$16 sps:$4 sm:$0xff]  }
 0x22e   :  { %v9125_v24 = vld [vmem:[#allocation2 + $0x8cc] ss:$16 sps:$4 sm:$0xff]   ;;  %v9126_v27 = vld [vmem:[#allocation2 + $0x8e8] ss:$16 sps:$4 sm:$0xff]  }
 0x22f   :  { %2487 = vmatpush1.bf16.msra.mxu0 %v9060_v19  ;;  %v9128_v26 = vld [vmem:[#allocation2 + $0x8ec] ss:$16 sps:$4 sm:$0xff]   ;;  %v9165_v56 = vld [vmem:[#allocation2 + $0xa88] ss:$16 sps:$4 sm:$0xff]  }
 0x230   :  { %2488 = vmatprep.subr.bf16.mxu0 %v9065_v20  ;;  %8371 = vmatpush3.bf16.msra.mxu1 %v9206_v4  ;;  %v9131_v19 = vld [vmem:[#allocation2 + $0x90c] ss:$16 sps:$4 sm:$0xff]   ;;  %v9129_v20 = vld [vmem:[#allocation2 + $0x908] ss:$16 sps:$4 sm:$0xff]  }
 0x231   :  { %v9173_v59 = vld [vmem:[#allocation2 + $0xacc] ss:$16 sps:$4 sm:$0xff]   ;;  %8372 = vmatprep.subr.bf16.mxu1 %v9210_v60  ;;  %v9177_v8 = vld [vmem:[#allocation2 + $0xb08] ss:$16 sps:$4 sm:$0xff]  }
 0x232   :  { %v9176_v63 = vld [vmem:[#allocation2 + $0xaec] ss:$16 sps:$4 sm:$0xff]   ;;  %v9295_v60 = vld [vmem:[#allocation2 + $0xda8] ss:$16 sps:$4 sm:$0xff]  }
 0x233   :  { %2489 = vmatpush1.bf16.msra.mxu0 %v9063_v28  ;;  %v9134_v28 = vld [vmem:[#allocation2 + $0x92c] ss:$16 sps:$4 sm:$0xff]  }
 0x234   :  { %2490 = vmatprep.subr.bf16.mxu0 %v9068_v29  ;;  %v9132_v29 = vld [vmem:[#allocation2 + $0x928] ss:$16 sps:$4 sm:$0xff]   ;;  %v9184_v9 = vld [vmem:[#allocation2 + $0xb2c] ss:$16 sps:$4 sm:$0xff]  }
 0x235   :  { %v9215_v0 = vld [vmem:[#allocation6 + $0x78] sm:$0xff]  }
 0x236   :  { %v9216_v3 = vld [vmem:[#allocation6 + $0x38] sm:$0xff]  }
 0x237   :  { %2491 = vmatpush1.bf16.msra.mxu0 %v9066_v30  ;;  %v9137_v30 = vld [vmem:[#allocation2 + $0x94c] ss:$16 sps:$4 sm:$0xff]  }
 0x238   :  { %2492 = vmatprep.subr.bf16.mxu0 %v9071_v31  ;;  %v9135_v31 = vld [vmem:[#allocation2 + $0x948] ss:$16 sps:$4 sm:$0xff]  }
 0x23b   :  { %2493 = vmatpush1.bf16.msra.mxu0 %v9069_v32  ;;  %v9140_v32 = vld [vmem:[#allocation2 + $0x96c] ss:$16 sps:$4 sm:$0xff]  }
 0x23c   :  { %2494 = vmatprep.subr.bf16.mxu0 %v9074_v33  ;;  %v9138_v33 = vld [vmem:[#allocation2 + $0x968] ss:$16 sps:$4 sm:$0xff]  }
 0x23f   :  { %2495 = vmatpush1.bf16.msra.mxu0 %v9072_v34  ;;  %v9143_v34 = vld [vmem:[#allocation2 + $0x98c] ss:$16 sps:$4 sm:$0xff]  }
 0x240   :  { %2496 = vmatprep.subr.bf16.mxu0 %v9077_v35  ;;  %v9141_v35 = vld [vmem:[#allocation2 + $0x988] ss:$16 sps:$4 sm:$0xff]  }
 0x243   :  { %2497 = vmatpush1.bf16.msra.mxu0 %v9075_v36  ;;  %v9146_v36 = vld [vmem:[#allocation2 + $0x9ac] ss:$16 sps:$4 sm:$0xff]  }
 0x244   :  { %2498 = vmatprep.subr.bf16.mxu0 %v9080_v37  ;;  %v9144_v37 = vld [vmem:[#allocation2 + $0x9a8] ss:$16 sps:$4 sm:$0xff]  }
 0x247   :  { %2499 = vmatpush1.bf16.msra.mxu0 %v9078_v38  ;;  %v9149_v38 = vld [vmem:[#allocation2 + $0x9cc] ss:$16 sps:$4 sm:$0xff]  }
 0x248   :  { %2500 = vmatprep.subr.bf16.mxu0 %v9083_v39  ;;  %v9147_v39 = vld [vmem:[#allocation2 + $0x9c8] ss:$16 sps:$4 sm:$0xff]  }
 0x24b   :  { %2501 = vmatpush1.bf16.msra.mxu0 %v9081_v40  ;;  %v9152_v40 = vld [vmem:[#allocation2 + $0x9ec] ss:$16 sps:$4 sm:$0xff]  }
 0x24c   :  { %2502 = vmatprep.subr.bf16.mxu0 %v9086_v41  ;;  %v9150_v41 = vld [vmem:[#allocation2 + $0x9e8] ss:$16 sps:$4 sm:$0xff]  }
 0x24f   :  { %2503 = vmatpush1.bf16.msra.mxu0 %v9084_v42  ;;  %v9155_v42 = vld [vmem:[#allocation2 + $0xa0c] ss:$16 sps:$4 sm:$0xff]  }
 0x250   :  { %2504 = vmatprep.subr.bf16.mxu0 %v9089_v45  ;;  %v9158_v45 = vld [vmem:[#allocation2 + $0xa2c] ss:$16 sps:$4 sm:$0xff]  }
 0x253   :  { %2505 = vmatpush1.bf16.msra.mxu0 %v9087_v46  ;;  %v9156_v46 = vld [vmem:[#allocation2 + $0xa28] ss:$16 sps:$4 sm:$0xff]  }
 0x254   :  { %2506 = vmatprep.subr.bf16.mxu0 %v9092_v49  ;;  %v9164_v49 = vld [vmem:[#allocation2 + $0xa6c] ss:$16 sps:$4 sm:$0xff]  }
 0x257   :  { %2507 = vmatpush1.bf16.msra.mxu0 %v9090_v50  ;;  %v9162_v50 = vld [vmem:[#allocation2 + $0xa68] ss:$16 sps:$4 sm:$0xff]  }
 0x258   :  { %2508 = vmatprep.subr.bf16.mxu0 %v9095_v57  ;;  %v9170_v57 = vld [vmem:[#allocation2 + $0xaac] ss:$16 sps:$4 sm:$0xff]  }
 0x25b   :  { %2509 = vmatpush1.bf16.msra.mxu0 %v9093_v58  ;;  %v9168_v58 = vld [vmem:[#allocation2 + $0xaa8] ss:$16 sps:$4 sm:$0xff]  }
 0x25c   :  { %2510 = vmatprep.subr.bf16.mxu0 %v9098_v61  ;;  %v9211_v61 = vld [vmem:[#allocation6 + $0x30] sm:$0xff]  }
 0x25d   :  { %8373 = vmatpush3.bf16.msra.mxu1 %v9211_v61  ;;  %v9303_v61 = vld [vmem:[#allocation2 + $0xdcc] ss:$16 sps:$4 sm:$0xff]  }
 0x25e   :  { %8374 = vmatprep.subr.bf16.mxu1 %v9215_v0  ;;  %v9307_v0 = vld [vmem:[#allocation2 + $0xde8] ss:$16 sps:$4 sm:$0xff]  }
 0x25f   :  { %2511 = vmatpush1.bf16.msra.mxu0 %v9096_v62  ;;  %v9171_v62 = vld [vmem:[#allocation2 + $0xac8] ss:$16 sps:$4 sm:$0xff]  }
 0x260   :  { %2512 = vmatprep.subr.bf16.mxu0 %v9101_v1  ;;  %v2704_v1 = vld [vmem:[%s10346_s1 + $0x8] sm:$0xff] }
 0x261   :  { %8375 = vmatpush3.bf16.msra.mxu1 %v9216_v3  ;;  %v9313_v3 = vld [vmem:[#allocation2 + $0xe08] ss:$16 sps:$4 sm:$0xff]  }
 0x263   :  { %2513 = vmatpush1.bf16.msra.mxu0 %v9099_v2  ;;  %v2708_v2 = vld [vmem:[%s10346_s1 + $0x28] sm:$0xff] }
 0x264   :  { %2514 = vmatprep.subr.bf16.mxu0 %v9104_v5  ;;  %v10224_v4 = vcombine.high %v2704_v1, %v2708_v2  ;;  %v9174_v5 = vld [vmem:[#allocation2 + $0xae8] ss:$16 sps:$4 sm:$0xff]  }
 0x267   :  { %2515 = vmatpush1.bf16.msra.mxu0 %v9102_v6  ;;  %v9179_v6 = vld [vmem:[#allocation2 + $0xb0c] ss:$16 sps:$4 sm:$0xff]  }
 0x268   :  { %4482 = vmatprep.subr.bf16.mxu0 %v9107_v7  ;;  %v9222_v7 = vld [vmem:[#allocation2 + $0x804] ss:$16 sps:$4 sm:$0xff]  }
 0x269   :  { %4310 = vmatprep.subr.bf16.mxu1 %v9222_v7  ;;  %v9327_v7 = vld [vmem:[#allocation2 + $0xe4c] ss:$16 sps:$4 sm:$0xff]  }
 0x26a   :  { %2517 = vmatmul.mubr.bf16.vlgmr.msra.gmra.mrb[4].mxu0 %v10195_v15  ;;  %v9120_v15 = vld [vmem:[#allocation2 + $0x8a8] ss:$16 sps:$4 sm:$0xff]  }
 0x26b   :  { %4483 = vmatpush1.bf16.msra.mxu0 %v9105_v10  ;;  %4514 = vmatprep.mubr.bf16.mxu0 %v10209_v11  ;;  %v9182_v10 = vld [vmem:[#allocation2 + $0xb28] ss:$16 sps:$4 sm:$0xff]  }
 0x26c   :  { %4484 = vmatprep.subr.bf16.mxu0 %v9110_v12  ;;  %v9189_v12 = vld [vmem:[#allocation2 + $0xb4c] ss:$16 sps:$4 sm:$0xff]  }
 0x26f   :  { %4485 = vmatpush1.bf16.msra.mxu0 %v9108_v13  ;;  %v9187_v13 = vld [vmem:[#allocation2 + $0xb48] ss:$16 sps:$4 sm:$0xff]  }
 0x270   :  { %4486 = vmatprep.subr.bf16.mxu0 %v9113_v16  ;;  %v9194_v16 = vld [vmem:[#allocation2 + $0xb6c] ss:$16 sps:$4 sm:$0xff]  }
 0x273   :  { %4487 = vmatpush1.bf16.msra.mxu0 %v9111_v17  ;;  %v9192_v17 = vld [vmem:[#allocation2 + $0xb68] ss:$16 sps:$4 sm:$0xff]  }
 0x274   :  { %4488 = vmatprep.subr.bf16.mxu0 %v9116_v18  ;;  %v9199_v18 = vld [vmem:[#allocation2 + $0xb8c] ss:$16 sps:$4 sm:$0xff]  }
 0x277   :  { %4489 = vmatpush1.bf16.msra.mxu0 %v9114_v21  ;;  %v9197_v21 = vld [vmem:[#allocation2 + $0xb88] ss:$16 sps:$4 sm:$0xff]  }
 0x278   :  { %4490 = vmatprep.subr.bf16.mxu0 %v9119_v22  ;;  %v9204_v22 = vld [vmem:[#allocation2 + $0xbac] ss:$16 sps:$4 sm:$0xff]  }
 0x27b   :  { %4491 = vmatpush1.bf16.msra.mxu0 %v9117_v23  ;;  %v9202_v23 = vld [vmem:[#allocation2 + $0xba8] ss:$16 sps:$4 sm:$0xff]  }
 0x27c   :  { %4492 = vmatprep.subr.bf16.mxu0 %v9122_v14  ;;  %v9209_v14 = vld [vmem:[#allocation2 + $0xbcc] ss:$16 sps:$4 sm:$0xff]  }
 0x27f   :  { %4493 = vmatpush1.bf16.msra.mxu0 %v9120_v15  ;;  %v9207_v15 = vld [vmem:[#allocation2 + $0xbc8] ss:$16 sps:$4 sm:$0xff]  }
 0x280   :  { %4494 = vmatprep.subr.bf16.mxu0 %v9125_v24  ;;  %v9214_v24 = vld [vmem:[#allocation2 + $0xbec] ss:$16 sps:$4 sm:$0xff]  }
 0x283   :  { %4495 = vmatpush1.bf16.msra.mxu0 %v9123_v25  ;;  %v9212_v25 = vld [vmem:[#allocation2 + $0xbe8] ss:$16 sps:$4 sm:$0xff]  }
 0x284   :  { %4496 = vmatprep.subr.bf16.mxu0 %v9128_v26  ;;  %v9219_v26 = vld [vmem:[#allocation2 + $0xc0c] ss:$16 sps:$4 sm:$0xff]  }
 0x287   :  { %4497 = vmatpush1.bf16.msra.mxu0 %v9126_v27  ;;  %v10227_v27 = vcombine.low %v2704_v1, %v2708_v2  ;;  %v9315_v1 = vld [vmem:[#allocation2 + $0xe0c] ss:$16 sps:$4 sm:$0xff]  }
 0x288   :  { %4498 = vmatprep.subr.bf16.mxu0 %v9131_v19  ;;  %v9217_v19 = vld [vmem:[#allocation2 + $0xc08] ss:$16 sps:$4 sm:$0xff]  }
 0x28b   :  { %4499 = vmatpush1.bf16.msra.mxu0 %v9129_v20  ;;  %v9225_v20 = vld [vmem:[#allocation2 + $0xc2c] ss:$16 sps:$4 sm:$0xff]  }
 0x28c   :  { %4500 = vmatprep.subr.bf16.mxu0 %v9134_v28  ;;  %v9223_v28 = vld [vmem:[#allocation2 + $0xc28] ss:$16 sps:$4 sm:$0xff]  }
 0x28f   :  { %4501 = vmatpush1.bf16.msra.mxu0 %v9132_v29  ;;  %v9231_v29 = vld [vmem:[#allocation2 + $0xc4c] ss:$16 sps:$4 sm:$0xff]  }
 0x290   :  { %4502 = vmatprep.subr.bf16.mxu0 %v9137_v30  ;;  %v9229_v30 = vld [vmem:[#allocation2 + $0xc48] ss:$16 sps:$4 sm:$0xff]  }
 0x293   :  { %4503 = vmatpush1.bf16.msra.mxu0 %v9135_v31  ;;  %v9237_v31 = vld [vmem:[#allocation2 + $0xc6c] ss:$16 sps:$4 sm:$0xff]  }
 0x294   :  { %4504 = vmatprep.subr.bf16.mxu0 %v9140_v32  ;;  %v9235_v32 = vld [vmem:[#allocation2 + $0xc68] ss:$16 sps:$4 sm:$0xff]  }
 0x297   :  { %4505 = vmatpush1.bf16.msra.mxu0 %v9138_v33  ;;  %v9243_v33 = vld [vmem:[#allocation2 + $0xc8c] ss:$16 sps:$4 sm:$0xff]  }
 0x298   :  { %4506 = vmatprep.subr.bf16.mxu0 %v9143_v34  ;;  %v9241_v34 = vld [vmem:[#allocation2 + $0xc88] ss:$16 sps:$4 sm:$0xff]  }
 0x29b   :  { %4507 = vmatpush1.bf16.msra.mxu0 %v9141_v35  ;;  %v9249_v35 = vld [vmem:[#allocation2 + $0xcac] ss:$16 sps:$4 sm:$0xff]  }
 0x29c   :  { %4508 = vmatprep.subr.bf16.mxu0 %v9146_v36  ;;  %v9247_v36 = vld [vmem:[#allocation2 + $0xca8] ss:$16 sps:$4 sm:$0xff]  }
 0x29f   :  { %4509 = vmatpush1.bf16.msra.mxu0 %v9144_v37  ;;  %v9255_v37 = vld [vmem:[#allocation2 + $0xccc] ss:$16 sps:$4 sm:$0xff]  }
 0x2a0   :  { %4510 = vmatprep.subr.bf16.mxu0 %v9149_v38  ;;  %v9253_v38 = vld [vmem:[#allocation2 + $0xcc8] ss:$16 sps:$4 sm:$0xff]  }
 0x2a3   :  { %4511 = vmatpush1.bf16.msra.mxu0 %v9147_v39  ;;  %v9261_v39 = vld [vmem:[#allocation2 + $0xcec] ss:$16 sps:$4 sm:$0xff]  }
 0x2a4   :  { %4512 = vmatprep.subr.bf16.mxu0 %v9152_v40  ;;  %v2705_v40 = vld [vmem:[%s10346_s1 + $0x10] sm:$0xff] }
 0x2a7   :  { %4513 = vmatpush1.bf16.msra.mxu0 %v9150_v41  ;;  %v2709_v41 = vld [vmem:[%s10346_s1 + $0x30] sm:$0xff] }
 0x2a8   :  { %4525 = vmatprep.subr.bf16.mxu0 %v9155_v42  ;;  %v9259_v42 = vld [vmem:[#allocation2 + $0xce8] ss:$16 sps:$4 sm:$0xff]   ;;  %v10239_v2 = vcombine.low %v2705_v40, %v2709_v41 }
 0x2aa   :  { %4515 = vmatmul.mubr.bf16.vlgmr.msra.gmra.mrb[8].mxu0 %v10215_v43 }
 0x2ab   :  { %4526 = vmatpush1.bf16.msra.mxu0 %v9153_v44  ;;  %4557 = vmatprep.mubr.bf16.mxu0 %v10224_v4  ;;  %v10236_v44 = vcombine.high %v2705_v40, %v2709_v41  ;;  %v9363_v40 = vld [vmem:[#allocation2 + $0xf0c] ss:$16 sps:$4 sm:$0xff]  }
 0x2ac   :  { %4527 = vmatprep.subr.bf16.mxu0 %v9158_v45  ;;  %v9267_v45 = vld [vmem:[#allocation2 + $0xd0c] ss:$16 sps:$4 sm:$0xff]  }
 0x2af   :  { %4528 = vmatpush1.bf16.msra.mxu0 %v9156_v46  ;;  %v9265_v46 = vld [vmem:[#allocation2 + $0xd08] ss:$16 sps:$4 sm:$0xff]  }
 0x2b0   :  { %4529 = vmatprep.subr.bf16.mxu0 %v9161_v47  ;;  %v9273_v47 = vld [vmem:[#allocation2 + $0xd2c] ss:$16 sps:$4 sm:$0xff]  }
 0x2b3   :  { %4530 = vmatpush1.bf16.msra.mxu0 %v9159_v48  ;;  %v9271_v48 = vld [vmem:[#allocation2 + $0xd28] ss:$16 sps:$4 sm:$0xff]  }
 0x2b4   :  { %4531 = vmatprep.subr.bf16.mxu0 %v9164_v49  ;;  %v9279_v49 = vld [vmem:[#allocation2 + $0xd4c] ss:$16 sps:$4 sm:$0xff]  }
 0x2b7   :  { %4532 = vmatpush1.bf16.msra.mxu0 %v9162_v50  ;;  %v9277_v50 = vld [vmem:[#allocation2 + $0xd48] ss:$16 sps:$4 sm:$0xff]  }
 0x2b8   :  { %4533 = vmatprep.subr.bf16.mxu0 %v9167_v53  ;;  %v9285_v53 = vld [vmem:[#allocation2 + $0xd6c] ss:$16 sps:$4 sm:$0xff]  }
 0x2bb   :  { %4534 = vmatpush1.bf16.msra.mxu0 %v9165_v56  ;;  %v9283_v56 = vld [vmem:[#allocation2 + $0xd68] ss:$16 sps:$4 sm:$0xff]  }
 0x2bc   :  { %4535 = vmatprep.subr.bf16.mxu0 %v9170_v57  ;;  %v9291_v57 = vld [vmem:[#allocation2 + $0xd8c] ss:$16 sps:$4 sm:$0xff]  }
 0x2bf   :  { %4536 = vmatpush1.bf16.msra.mxu0 %v9168_v58  ;;  %v9289_v58 = vld [vmem:[#allocation2 + $0xd88] ss:$16 sps:$4 sm:$0xff]  }
 0x2c0   :  { %4537 = vmatprep.subr.bf16.mxu0 %v9173_v59  ;;  %v9297_v59 = vld [vmem:[#allocation2 + $0xdac] ss:$16 sps:$4 sm:$0xff]  }
 0x2c3   :  { %4538 = vmatpush1.bf16.msra.mxu0 %v9171_v62  ;;  %v9301_v62 = vld [vmem:[#allocation2 + $0xdc8] ss:$16 sps:$4 sm:$0xff]  }
 0x2c4   :  { %4539 = vmatprep.subr.bf16.mxu0 %v9176_v63  ;;  %v9309_v63 = vld [vmem:[#allocation2 + $0xdec] ss:$16 sps:$4 sm:$0xff]  }
 0x2c7   :  { %4540 = vmatpush1.bf16.msra.mxu0 %v9174_v5  ;;  %v9321_v5 = vld [vmem:[#allocation2 + $0xe2c] ss:$16 sps:$4 sm:$0xff]  }
 0x2c8   :  { %4541 = vmatprep.subr.bf16.mxu0 %v9179_v6  ;;  %v9319_v6 = vld [vmem:[#allocation2 + $0xe28] ss:$16 sps:$4 sm:$0xff]  }
 0x2cb   :  { %4542 = vmatpush1.bf16.msra.mxu0 %v9177_v8  ;;  %v9325_v8 = vld [vmem:[#allocation2 + $0xe48] ss:$16 sps:$4 sm:$0xff]  }
 0x2cc   :  { %4543 = vmatprep.subr.bf16.mxu0 %v9184_v9  ;;  %v9333_v9 = vld [vmem:[#allocation2 + $0xe6c] ss:$16 sps:$4 sm:$0xff]  }
 0x2cf   :  { %4544 = vmatpush1.bf16.msra.mxu0 %v9182_v10  ;;  %v9331_v10 = vld [vmem:[#allocation2 + $0xe68] ss:$16 sps:$4 sm:$0xff]  }
 0x2d0   :  { %4545 = vmatprep.subr.bf16.mxu0 %v9189_v12  ;;  %v9339_v12 = vld [vmem:[#allocation2 + $0xe8c] ss:$16 sps:$4 sm:$0xff]  }
 0x2d3   :  { %4546 = vmatpush1.bf16.msra.mxu0 %v9187_v13  ;;  %v2109_v13 = vld [vmem:[#allocation7 + $0x1] ss:$8 sm:$0x3] }
 0x2d4   :  { %4547 = vmatprep.subr.bf16.mxu0 %v9194_v16  ;;  %v9337_v16 = vld [vmem:[#allocation2 + $0xe88] ss:$16 sps:$4 sm:$0xff]  }
 0x2d7   :  { %4548 = vmatpush1.bf16.msra.mxu0 %v9192_v17  ;;  %v9345_v17 = vld [vmem:[#allocation2 + $0xeac] ss:$16 sps:$4 sm:$0xff]  }
 0x2d8   :  { %4549 = vmatprep.subr.bf16.mxu0 %v9199_v18  ;;  %v2114_v18 = vrot.slane %v2109_v13, %v10183_v51 }
 0x2db   :  { %4550 = vmatpush1.bf16.msra.mxu0 %v9197_v21  ;;  %v2118_v21 = vrot.slane %v2109_v13, %v10187_v54  ;;  %v9405_v13 = vld [vmem:[#allocation2 + $0xfec] ss:$16 sps:$4 sm:$0xff]  }
 0x2dc   :  { %4551 = vmatprep.subr.bf16.mxu0 %v9204_v22  ;;  %v9343_v22 = vld [vmem:[#allocation2 + $0xea8] ss:$16 sps:$4 sm:$0xff]  }
 0x2df   :  { %4552 = vmatpush1.bf16.msra.mxu0 %v9202_v23  ;;  %v9351_v23 = vld [vmem:[#allocation2 + $0xecc] ss:$16 sps:$4 sm:$0xff]  }
 0x2e0   :  { %4553 = vmatprep.subr.bf16.mxu0 %v9209_v14 }
 0x2e3   :  { %4554 = vmatpush1.bf16.msra.mxu0 %v9207_v15 }
 0x2e4   :  { %4555 = vmatprep.subr.bf16.mxu0 %v9214_v24 }
 0x2e7   :  { %4556 = vmatpush1.bf16.msra.mxu0 %v9212_v25 }
 0x2e8   :  { %4568 = vmatprep.subr.bf16.mxu0 %v9219_v26 }
 0x2ea   :  { %4558 = vmatmul.mubr.bf16.vlgmr.msra.gmra.mrb[8].mxu0 %v10227_v27 }
 0x2eb   :  { %4569 = vmatpush1.bf16.msra.mxu0 %v9217_v19  ;;  %4600 = vmatprep.mubr.bf16.mxu0 %v10236_v44  ;;  %v9349_v19 = vld [vmem:[#allocation2 + $0xec8] ss:$16 sps:$4 sm:$0xff]  }
 0x2ec   :  { %4570 = vmatprep.subr.bf16.mxu0 %v9225_v20 }
 0x2ef   :  { %4571 = vmatpush1.bf16.msra.mxu0 %v9223_v28 }
 0x2f0   :  { %4572 = vmatprep.subr.bf16.mxu0 %v9231_v29  ;;  %v9357_v29 = vld [vmem:[#allocation2 + $0xeec] ss:$16 sps:$4 sm:$0xff]  }
 0x2f3   :  { %4573 = vmatpush1.bf16.msra.mxu0 %v9229_v30 }
 0x2f4   :  { %4574 = vmatprep.subr.bf16.mxu0 %v9237_v31  ;;  %v10247_v31 = vld [vmem:[%s10346_s1 + $0x18] sm:$0xff] }
 0x2f7   :  { %4575 = vmatpush1.bf16.msra.mxu0 %v9235_v32 }
 0x2f8   :  { %4576 = vmatprep.subr.bf16.mxu0 %v9243_v33 }
 0x2fb   :  { %4577 = vmatpush1.bf16.msra.mxu0 %v9241_v34  ;;  %v10252_v34 = vld [vmem:[%s10346_s1 + $0x38] sm:$0xff] }
 0x2fc   :  { %4578 = vmatprep.subr.bf16.mxu0 %v9249_v35 }
 0x2ff   :  { %4579 = vmatpush1.bf16.msra.mxu0 %v9247_v36 }
 0x300   :  { %4580 = vmatprep.subr.bf16.mxu0 %v9255_v37  ;;  %v9355_v37 = vld [vmem:[#allocation2 + $0xee8] ss:$16 sps:$4 sm:$0xff]  }
 0x303   :  { %4581 = vmatpush1.bf16.msra.mxu0 %v9253_v38  ;;  %v10256_v38 = vcombine.high %v10247_v31, %v10252_v34 }
 0x304   :  { %4582 = vmatprep.subr.bf16.mxu0 %v9261_v39 }
 0x307   :  { %4583 = vmatpush1.bf16.msra.mxu0 %v9259_v42  ;;  %v9220_v42 = vld [vmem:[#allocation2 + $0x800] ss:$16 sps:$4 sm:$0xff]  }
 0x308   :  { %4584 = vmatprep.subr.bf16.mxu0 %v9267_v45  ;;  %v9228_v45 = vld [vmem:[#allocation2 + $0x824] ss:$16 sps:$4 sm:$0xff]  }
 0x30b   :  { %4585 = vmatpush1.bf16.msra.mxu0 %v9265_v46  ;;  %v9361_v46 = vld [vmem:[#allocation2 + $0xf08] ss:$16 sps:$4 sm:$0xff]  }
 0x30c   :  { %4586 = vmatprep.subr.bf16.mxu0 %v9273_v47  ;;  %v9369_v47 = vld [vmem:[#allocation2 + $0xf2c] ss:$16 sps:$4 sm:$0xff]  }
 0x30f   :  { %4587 = vmatpush1.bf16.msra.mxu0 %v9271_v48  ;;  %v9226_v48 = vld [vmem:[#allocation2 + $0x820] ss:$16 sps:$4 sm:$0xff]  }
 0x310   :  { %4588 = vmatprep.subr.bf16.mxu0 %v9279_v49  ;;  %v9234_v49 = vld [vmem:[#allocation2 + $0x844] ss:$16 sps:$4 sm:$0xff]  }
 0x313   :  { %4589 = vmatpush1.bf16.msra.mxu0 %v9277_v50  ;;  %v9367_v50 = vld [vmem:[#allocation2 + $0xf28] ss:$16 sps:$4 sm:$0xff]  }
 0x314   :  { %4590 = vmatprep.subr.bf16.mxu0 %v9285_v53  ;;  %v9375_v53 = vld [vmem:[#allocation2 + $0xf4c] ss:$16 sps:$4 sm:$0xff]  }
 0x317   :  { %4591 = vmatpush1.bf16.msra.mxu0 %v9283_v56  ;;  %v9232_v56 = vld [vmem:[#allocation2 + $0x840] ss:$16 sps:$4 sm:$0xff]  }
 0x318   :  { %4592 = vmatprep.subr.bf16.mxu0 %v9291_v57  ;;  %v9240_v57 = vld [vmem:[#allocation2 + $0x864] ss:$16 sps:$4 sm:$0xff]  }
 0x31b   :  { %4593 = vmatpush1.bf16.msra.mxu0 %v9289_v58  ;;  %v9373_v58 = vld [vmem:[#allocation2 + $0xf48] ss:$16 sps:$4 sm:$0xff]  }
 0x31c   :  { %4594 = vmatprep.subr.bf16.mxu0 %v9297_v59  ;;  %v9381_v59 = vld [vmem:[#allocation2 + $0xf6c] ss:$16 sps:$4 sm:$0xff]  }
 0x31f   :  { %4595 = vmatpush1.bf16.msra.mxu0 %v9295_v60  ;;  %v9238_v60 = vld [vmem:[#allocation2 + $0x860] ss:$16 sps:$4 sm:$0xff]  }
 0x320   :  { %4596 = vmatprep.subr.bf16.mxu0 %v9303_v61  ;;  %v9246_v61 = vld [vmem:[#allocation2 + $0x884] ss:$16 sps:$4 sm:$0xff]  }
 0x323   :  { %4597 = vmatpush1.bf16.msra.mxu0 %v9301_v62  ;;  %v9387_v62 = vld [vmem:[#allocation2 + $0xf8c] ss:$16 sps:$4 sm:$0xff]  }
 0x324   :  { %4598 = vmatprep.subr.bf16.mxu0 %v9309_v63  ;;  %v9244_v63 = vld [vmem:[#allocation2 + $0x880] ss:$16 sps:$4 sm:$0xff]  }
 0x327   :  { %4599 = vmatpush1.bf16.msra.mxu0 %v9307_v0  ;;  %v9252_v0 = vld [vmem:[#allocation2 + $0x8a4] ss:$16 sps:$4 sm:$0xff]  }
 0x328   :  { %4611 = vmatprep.subr.bf16.mxu0 %v9315_v1  ;;  %v9385_v1 = vld [vmem:[#allocation2 + $0xf88] ss:$16 sps:$4 sm:$0xff]  }
 0x32a   :  { %4601 = vmatmul.mubr.bf16.vlgmr.msra.gmra.mrb[8].mxu0 %v10239_v2 }
 0x32b   :  { %4612 = vmatpush1.bf16.msra.mxu0 %v9313_v3  ;;  %4643 = vmatprep.mubr.bf16.mxu0 %v10256_v38  ;;  %v9393_v3 = vld [vmem:[#allocation2 + $0xfac] ss:$16 sps:$4 sm:$0xff]  }
 0x32c   :  { %4613 = vmatprep.subr.bf16.mxu0 %v9321_v5  ;;  %v9250_v5 = vld [vmem:[#allocation2 + $0x8a0] ss:$16 sps:$4 sm:$0xff]  }
 0x32f   :  { %4614 = vmatpush1.bf16.msra.mxu0 %v9319_v6  ;;  %v9258_v6 = vld [vmem:[#allocation2 + $0x8c4] ss:$16 sps:$4 sm:$0xff]  }
 0x330   :  { %4615 = vmatprep.subr.bf16.mxu0 %v9327_v7  ;;  %v9391_v7 = vld [vmem:[#allocation2 + $0xfa8] ss:$16 sps:$4 sm:$0xff]  }
 0x333   :  { %4616 = vmatpush1.bf16.msra.mxu0 %v9325_v8  ;;  %v9399_v8 = vld [vmem:[#allocation2 + $0xfcc] ss:$16 sps:$4 sm:$0xff]  }
 0x334   :  { %4617 = vmatprep.subr.bf16.mxu0 %v9333_v9  ;;  %v9256_v9 = vld [vmem:[#allocation2 + $0x8c0] ss:$16 sps:$4 sm:$0xff]  }
 0x337   :  { %4618 = vmatpush1.bf16.msra.mxu0 %v9331_v10  ;;  %v9264_v10 = vld [vmem:[#allocation2 + $0x8e4] ss:$16 sps:$4 sm:$0xff]  }
 0x338   :  { %4619 = vmatprep.subr.bf16.mxu0 %v9339_v12  ;;  %v9397_v12 = vld [vmem:[#allocation2 + $0xfc8] ss:$16 sps:$4 sm:$0xff]  }
 0x33b   :  { %4620 = vmatpush1.bf16.msra.mxu0 %v9337_v16  ;;  %v9262_v16 = vld [vmem:[#allocation2 + $0x8e0] ss:$16 sps:$4 sm:$0xff]  }
 0x33c   :  { %4621 = vmatprep.subr.bf16.mxu0 %v9345_v17  ;;  %v9270_v17 = vld [vmem:[#allocation2 + $0x904] ss:$16 sps:$4 sm:$0xff]  }
 0x33d   :  { %v2518_v14 = vpop.f32.mrb[4].mxu0 }
 0x33e   :  { %v8514_v15 = vadd.f32 %v2518_v14, %v2114_v18  ;;  %v2520_v24 = vpop.f32.mrb[5].mxu0  ;;  %v9274_v14 = vld [vmem:[#allocation2 + $0x920] ss:$16 sps:$4 sm:$0xff]  }
 0x33f   :  { %v8515_v25 = vadd.f32 %v2520_v24, %v2118_v21  ;;  %v2522_v26 = vpop.f32.mrb[6].mxu0  ;;  %4622 = vmatpush1.bf16.msra.mxu0 %v9343_v22  ;;  %v9276_v22 = vld [vmem:[#allocation2 + $0x924] ss:$16 sps:$4 sm:$0xff]   ;;  %v9280_v24 = vld [vmem:[#allocation2 + $0x940] ss:$16 sps:$4 sm:$0xff]  }
 0x340   :  { %v8516_v20 = vadd.f32 %v2522_v26, %v2114_v18  ;;  %v2524_v28 = vpop.f32.mrb[7].mxu0  ;;  %4623 = vmatprep.subr.bf16.mxu0 %v9351_v23  ;;  %v2527_v32 = vmax.f32 %v8514_v15, 0.0  ;;  %v9403_v18 = vld [vmem:[#allocation2 + $0xfe8] ss:$16 sps:$4 sm:$0xff]   ;;  %v10262_v23 = vcombine.low %v10247_v31, %v10252_v34  ;;  %v9282_v15 = vld [vmem:[#allocation2 + $0x944] ss:$16 sps:$4 sm:$0xff]  }
 0x341   :  { %v8517_v30 = vadd.f32 %v2524_v28, %v2118_v21  ;;  %v2528_v35 = vmax.f32 %v8515_v25, 0.0  ;;  %v9268_v21 = vld [vmem:[#allocation2 + $0x900] ss:$16 sps:$4 sm:$0xff]   ;;  %v9288_v25 = vld [vmem:[#allocation2 + $0x964] ss:$16 sps:$4 sm:$0xff]  }
 0x342   :  { %v2529_v33 = vmax.f32 %v8516_v20, 0.0  ;;  %v9286_v26 = vld [vmem:[#allocation2 + $0x960] ss:$16 sps:$4 sm:$0xff]   ;;  %v9300_v28 = vld [vmem:[#allocation2 + $0x9a4] ss:$16 sps:$4 sm:$0xff]  }
 0x343   :  { %v2530_v36 = vmax.f32 %v8517_v30, 0.0  ;;  %4624 = vmatpush1.bf16.msra.mxu0 %v9349_v19  ;;  %v9294_v19 = vld [vmem:[#allocation2 + $0x984] ss:$16 sps:$4 sm:$0xff]   ;;  %v9292_v20 = vld [vmem:[#allocation2 + $0x980] ss:$16 sps:$4 sm:$0xff]  }
 0x344   :  { %v2531_v39 = vpack.c.bf16 %v2529_v33, %v2527_v32  ;;  %4625 = vmatprep.subr.bf16.mxu0 %v9357_v29  ;;  %v9298_v29 = vld [vmem:[#allocation2 + $0x9a0] ss:$16 sps:$4 sm:$0xff]   ;;  %v9306_v30 = vld [vmem:[#allocation2 + $0x9c4] ss:$16 sps:$4 sm:$0xff]  }
 0x345   :  { %v2532_v41 = vpack.c.bf16 %v2530_v36, %v2528_v35  ;;  %v9304_v31 = vld [vmem:[#allocation2 + $0x9c0] ss:$16 sps:$4 sm:$0xff]   ;;  %v9312_v32 = vld [vmem:[#allocation2 + $0x9e4] ss:$16 sps:$4 sm:$0xff]  }
 0x346   :  { %v9310_v33 = vld [vmem:[#allocation2 + $0x9e0] ss:$16 sps:$4 sm:$0xff]   ;;  %v9318_v34 = vld [vmem:[#allocation2 + $0xa04] ss:$16 sps:$4 sm:$0xff]  }
 0x347   :  { %2694 = vmatprep.mubr.bf16.mxu1 %v2532_v41  ;;  %4626 = vmatpush1.bf16.msra.mxu0 %v9355_v37  ;;  %v9316_v35 = vld [vmem:[#allocation2 + $0xa00] ss:$16 sps:$4 sm:$0xff]   ;;  %v9324_v36 = vld [vmem:[#allocation2 + $0xa24] ss:$16 sps:$4 sm:$0xff]  }
 0x348   :  { %2695 = vmatmul.mubr.bf16.vlgmr.msra.gmra.mrb[4].mxu1 %v2531_v39  ;;  %4627 = vmatprep.subr.bf16.mxu0 %v9363_v40  ;;  %v9322_v37 = vld [vmem:[#allocation2 + $0xa20] ss:$16 sps:$4 sm:$0xff]   ;;  %v9330_v39 = vld [vmem:[#allocation2 + $0xa44] ss:$16 sps:$4 sm:$0xff]  }
 0x349   :  { %4311 = vmatpush1.bf16.msra.mxu1 %v9220_v42  ;;  %4342 = vmatprep.mubr.bf16.mxu1 %v10209_v11  ;;  %v9379_v11 = vld [vmem:[#allocation2 + $0xf68] ss:$16 sps:$4 sm:$0xff]   ;;  %v9328_v40 = vld [vmem:[#allocation2 + $0xa40] ss:$16 sps:$4 sm:$0xff]   ;;  %v9336_v41 = vld [vmem:[#allocation2 + $0xa64] ss:$16 sps:$4 sm:$0xff]  }
 0x34a   :  { %4312 = vmatprep.subr.bf16.mxu1 %v9228_v45  ;;  %v9334_v42 = vld [vmem:[#allocation2 + $0xa60] ss:$16 sps:$4 sm:$0xff]   ;;  %v9342_v45 = vld [vmem:[#allocation2 + $0xa84] ss:$16 sps:$4 sm:$0xff]  }
 0x34b   :  { %4628 = vmatpush1.bf16.msra.mxu0 %v9361_v46  ;;  %v9340_v46 = vld [vmem:[#allocation2 + $0xa80] ss:$16 sps:$4 sm:$0xff]  }
 0x34c   :  { %4629 = vmatprep.subr.bf16.mxu0 %v9369_v47  ;;  %v9348_v47 = vld [vmem:[#allocation2 + $0xaa4] ss:$16 sps:$4 sm:$0xff]  }
 0x34d   :  { %4313 = vmatpush1.bf16.msra.mxu1 %v9226_v48  ;;  %v9354_v48 = vld [vmem:[#allocation2 + $0xac4] ss:$16 sps:$4 sm:$0xff]  }
 0x34e   :  { %4314 = vmatprep.subr.bf16.mxu1 %v9234_v49  ;;  %v9360_v49 = vld [vmem:[#allocation2 + $0xae4] ss:$16 sps:$4 sm:$0xff]  }
 0x34f   :  { %4630 = vmatpush1.bf16.msra.mxu0 %v9367_v50  ;;  %v9358_v50 = vld [vmem:[#allocation2 + $0xae0] ss:$16 sps:$4 sm:$0xff]  }
 0x350   :  { %4631 = vmatprep.subr.bf16.mxu0 %v9375_v53  ;;  %v9366_v53 = vld [vmem:[#allocation2 + $0xb04] ss:$16 sps:$4 sm:$0xff]  }
 0x351   :  { %4315 = vmatpush1.bf16.msra.mxu1 %v9232_v56  ;;  %v9364_v56 = vld [vmem:[#allocation2 + $0xb00] ss:$16 sps:$4 sm:$0xff]  }
 0x352   :  { %4316 = vmatprep.subr.bf16.mxu1 %v9240_v57  ;;  %v9372_v57 = vld [vmem:[#allocation2 + $0xb24] ss:$16 sps:$4 sm:$0xff]  }
 0x353   :  { %4632 = vmatpush1.bf16.msra.mxu0 %v9373_v58  ;;  %v9370_v58 = vld [vmem:[#allocation2 + $0xb20] ss:$16 sps:$4 sm:$0xff]  }
 0x354   :  { %4633 = vmatprep.subr.bf16.mxu0 %v9381_v59  ;;  %v9378_v59 = vld [vmem:[#allocation2 + $0xb44] ss:$16 sps:$4 sm:$0xff]  }
 0x355   :  { %4317 = vmatpush1.bf16.msra.mxu1 %v9238_v60  ;;  %v9376_v60 = vld [vmem:[#allocation2 + $0xb40] ss:$16 sps:$4 sm:$0xff]  }
 0x356   :  { %4318 = vmatprep.subr.bf16.mxu1 %v9246_v61  ;;  %v9384_v61 = vld [vmem:[#allocation2 + $0xb64] ss:$16 sps:$4 sm:$0xff]  }
 0x357   :  { %4634 = vmatpush1.bf16.msra.mxu0 %v9379_v11  ;;  %v9382_v11 = vld [vmem:[#allocation2 + $0xb60] ss:$16 sps:$4 sm:$0xff]  }
 0x358   :  { %4635 = vmatprep.subr.bf16.mxu0 %v9387_v62  ;;  %v9390_v62 = vld [vmem:[#allocation2 + $0xb84] ss:$16 sps:$4 sm:$0xff]  }
 0x359   :  { %4319 = vmatpush1.bf16.msra.mxu1 %v9244_v63  ;;  %v9388_v63 = vld [vmem:[#allocation2 + $0xb80] ss:$16 sps:$4 sm:$0xff]  }
 0x35a   :  { %4320 = vmatprep.subr.bf16.mxu1 %v9252_v0  ;;  %v9396_v0 = vld [vmem:[#allocation2 + $0xba4] ss:$16 sps:$4 sm:$0xff]  }
 0x35b   :  { %4636 = vmatpush1.bf16.msra.mxu0 %v9385_v1  ;;  %v9394_v1 = vld [vmem:[#allocation2 + $0xba0] ss:$16 sps:$4 sm:$0xff]  }
 0x35c   :  { %4637 = vmatprep.subr.bf16.mxu0 %v9393_v3  ;;  %v9402_v3 = vld [vmem:[#allocation2 + $0xbc4] ss:$16 sps:$4 sm:$0xff]  }
 0x35d   :  { %4321 = vmatpush1.bf16.msra.mxu1 %v9250_v5  ;;  %v9400_v5 = vld [vmem:[#allocation2 + $0xbc0] ss:$16 sps:$4 sm:$0xff]  }
 0x35e   :  { %4322 = vmatprep.subr.bf16.mxu1 %v9258_v6  ;;  %v9408_v6 = vld [vmem:[#allocation2 + $0xbe4] ss:$16 sps:$4 sm:$0xff]  }
 0x35f   :  { %4638 = vmatpush1.bf16.msra.mxu0 %v9391_v7  ;;  %v9406_v7 = vld [vmem:[#allocation2 + $0xbe0] ss:$16 sps:$4 sm:$0xff]  }
 0x360   :  { %4639 = vmatprep.subr.bf16.mxu0 %v9399_v8  ;;  %v9411_v8 = vld [vmem:[#allocation2 + $0xc04] ss:$16 sps:$4 sm:$0xff]  }
 0x361   :  { %4323 = vmatpush1.bf16.msra.mxu1 %v9256_v9  ;;  %v9409_v9 = vld [vmem:[#allocation2 + $0xc00] ss:$16 sps:$4 sm:$0xff]  }
 0x362   :  { %4324 = vmatprep.subr.bf16.mxu1 %v9264_v10  ;;  %v9414_v10 = vld [vmem:[#allocation2 + $0xc24] ss:$16 sps:$4 sm:$0xff]  }
 0x363   :  { %4640 = vmatpush1.bf16.msra.mxu0 %v9397_v12  ;;  %v9412_v12 = vld [vmem:[#allocation2 + $0xc20] ss:$16 sps:$4 sm:$0xff]  }
 0x364   :  { %4641 = vmatprep.subr.bf16.mxu0 %v9405_v13  ;;  %v9417_v13 = vld [vmem:[#allocation2 + $0xc44] ss:$16 sps:$4 sm:$0xff]  }
 0x365   :  { %4325 = vmatpush1.bf16.msra.mxu1 %v9262_v16  ;;  %v9415_v16 = vld [vmem:[#allocation2 + $0xc40] ss:$16 sps:$4 sm:$0xff]  }
 0x366   :  { %4326 = vmatprep.subr.bf16.mxu1 %v9270_v17  ;;  %v9420_v17 = vld [vmem:[#allocation2 + $0xc64] ss:$16 sps:$4 sm:$0xff]  }
 0x367   :  { %4642 = vmatpush1.bf16.msra.mxu0 %v9403_v18  ;;  %v9418_v18 = vld [vmem:[#allocation2 + $0xc60] ss:$16 sps:$4 sm:$0xff]  }
 0x369   :  { %4327 = vmatpush1.bf16.msra.mxu1 %v9268_v21  ;;  %v9423_v21 = vld [vmem:[#allocation2 + $0xc84] ss:$16 sps:$4 sm:$0xff]  }
 0x36a   :  { %4328 = vmatprep.subr.bf16.mxu1 %v9276_v22  ;;  %4644 = vmatmul.mubr.bf16.vlgmr.msra.gmra.mrb[8].mxu0 %v10262_v23  ;;  %v9421_v22 = vld [vmem:[#allocation2 + $0xc80] ss:$16 sps:$4 sm:$0xff]  }
 0x36d   :  { %4329 = vmatpush1.bf16.msra.mxu1 %v9274_v14  ;;  %v9426_v14 = vld [vmem:[#allocation2 + $0xca4] ss:$16 sps:$4 sm:$0xff]  }
 0x36e   :  { %4330 = vmatprep.subr.bf16.mxu1 %v9282_v15  ;;  %v9429_v15 = vld [vmem:[#allocation2 + $0xcc4] ss:$16 sps:$4 sm:$0xff]  }
 0x371   :  { %4331 = vmatpush1.bf16.msra.mxu1 %v9280_v24  ;;  %v9432_v24 = vld [vmem:[#allocation2 + $0xce4] ss:$16 sps:$4 sm:$0xff]  }
 0x372   :  { %4332 = vmatprep.subr.bf16.mxu1 %v9288_v25  ;;  %v9430_v25 = vld [vmem:[#allocation2 + $0xce0] ss:$16 sps:$4 sm:$0xff]  }
 0x375   :  { %4333 = vmatpush1.bf16.msra.mxu1 %v9286_v26  ;;  %v9435_v26 = vld [vmem:[#allocation2 + $0xd04] ss:$16 sps:$4 sm:$0xff]  }
 0x376   :  { %4334 = vmatprep.subr.bf16.mxu1 %v9294_v19  ;;  %v9433_v19 = vld [vmem:[#allocation2 + $0xd00] ss:$16 sps:$4 sm:$0xff]  }
 0x379   :  { %4335 = vmatpush1.bf16.msra.mxu1 %v9292_v20  ;;  %v9438_v20 = vld [vmem:[#allocation2 + $0xd24] ss:$16 sps:$4 sm:$0xff]  }
 0x37a   :  { %4336 = vmatprep.subr.bf16.mxu1 %v9300_v28  ;;  %v9436_v28 = vld [vmem:[#allocation2 + $0xd20] ss:$16 sps:$4 sm:$0xff]  }
 0x37d   :  { %4337 = vmatpush1.bf16.msra.mxu1 %v9298_v29  ;;  %v9441_v29 = vld [vmem:[#allocation2 + $0xd44] ss:$16 sps:$4 sm:$0xff]  }
 0x37e   :  { %4338 = vmatprep.subr.bf16.mxu1 %v9306_v30  ;;  %v9439_v30 = vld [vmem:[#allocation2 + $0xd40] ss:$16 sps:$4 sm:$0xff]  }
 0x381   :  { %4339 = vmatpush1.bf16.msra.mxu1 %v9304_v31  ;;  %v9444_v31 = vld [vmem:[#allocation2 + $0xd64] ss:$16 sps:$4 sm:$0xff]  }
 0x382   :  { %4340 = vmatprep.subr.bf16.mxu1 %v9312_v32  ;;  %v9442_v32 = vld [vmem:[#allocation2 + $0xd60] ss:$16 sps:$4 sm:$0xff]  }
 0x385   :  { %4341 = vmatpush1.bf16.msra.mxu1 %v9310_v33  ;;  %v9447_v33 = vld [vmem:[#allocation2 + $0xd84] ss:$16 sps:$4 sm:$0xff]  }
 0x386   :  { %4353 = vmatprep.subr.bf16.mxu1 %v9318_v34  ;;  %v9445_v34 = vld [vmem:[#allocation2 + $0xd80] ss:$16 sps:$4 sm:$0xff]  }
 0x388   :  { %4343 = vmatmul.mubr.bf16.vlgmr.msra.gmra.mrb[8].mxu1 %v10215_v43  ;;  %v9346_v43 = vld [vmem:[#allocation2 + $0xaa0] ss:$16 sps:$4 sm:$0xff]  }
 0x389   :  { %4354 = vmatpush1.bf16.msra.mxu1 %v9316_v35  ;;  %4385 = vmatprep.mubr.bf16.mxu1 %v10224_v4  ;;  %v9352_v4 = vld [vmem:[#allocation2 + $0xac0] ss:$16 sps:$4 sm:$0xff]   ;;  %v9450_v35 = vld [vmem:[#allocation2 + $0xda4] ss:$16 sps:$4 sm:$0xff]  }
 0x38a   :  { %4355 = vmatprep.subr.bf16.mxu1 %v9324_v36  ;;  %v9448_v36 = vld [vmem:[#allocation2 + $0xda0] ss:$16 sps:$4 sm:$0xff]  }
 0x38d   :  { %4356 = vmatpush1.bf16.msra.mxu1 %v9322_v37  ;;  %v9453_v37 = vld [vmem:[#allocation2 + $0xdc4] ss:$16 sps:$4 sm:$0xff]  }
 0x38e   :  { %4357 = vmatprep.subr.bf16.mxu1 %v9330_v39  ;;  %v9451_v39 = vld [vmem:[#allocation2 + $0xdc0] ss:$16 sps:$4 sm:$0xff]  }
 0x391   :  { %4358 = vmatpush1.bf16.msra.mxu1 %v9328_v40  ;;  %v9456_v40 = vld [vmem:[#allocation2 + $0xde4] ss:$16 sps:$4 sm:$0xff]  }
 0x392   :  { %4359 = vmatprep.subr.bf16.mxu1 %v9336_v41  ;;  %v9454_v41 = vld [vmem:[#allocation2 + $0xde0] ss:$16 sps:$4 sm:$0xff]  }
 0x395   :  { %4360 = vmatpush1.bf16.msra.mxu1 %v9334_v42  ;;  %v9459_v42 = vld [vmem:[#allocation2 + $0xe04] ss:$16 sps:$4 sm:$0xff]  }
 0x396   :  { %4361 = vmatprep.subr.bf16.mxu1 %v9342_v45  ;;  %v9457_v45 = vld [vmem:[#allocation2 + $0xe00] ss:$16 sps:$4 sm:$0xff]  }
 0x399   :  { %4362 = vmatpush1.bf16.msra.mxu1 %v9340_v46  ;;  %v9462_v46 = vld [vmem:[#allocation2 + $0xe24] ss:$16 sps:$4 sm:$0xff]  }
 0x39a   :  { %4363 = vmatprep.subr.bf16.mxu1 %v9348_v47  ;;  %v9460_v47 = vld [vmem:[#allocation2 + $0xe20] ss:$16 sps:$4 sm:$0xff]  }
 0x39d   :  { %4364 = vmatpush1.bf16.msra.mxu1 %v9346_v43  ;;  %v9465_v43 = vld [vmem:[#allocation2 + $0xe44] ss:$16 sps:$4 sm:$0xff]  }
 0x39e   :  { %4365 = vmatprep.subr.bf16.mxu1 %v9354_v48  ;;  %v9463_v48 = vld [vmem:[#allocation2 + $0xe40] ss:$16 sps:$4 sm:$0xff]  }
 0x3a1   :  { %4366 = vmatpush1.bf16.msra.mxu1 %v9352_v4  ;;  %v9468_v4 = vld [vmem:[#allocation2 + $0xe64] ss:$16 sps:$4 sm:$0xff]  }
 0x3a2   :  { %4367 = vmatprep.subr.bf16.mxu1 %v9360_v49  ;;  %v9466_v49 = vld [vmem:[#allocation2 + $0xe60] ss:$16 sps:$4 sm:$0xff]  }
 0x3a5   :  { %4368 = vmatpush1.bf16.msra.mxu1 %v9358_v50  ;;  %v9471_v50 = vld [vmem:[#allocation2 + $0xe84] ss:$16 sps:$4 sm:$0xff]  }
 0x3a6   :  { %4369 = vmatprep.subr.bf16.mxu1 %v9366_v53  ;;  %v9469_v53 = vld [vmem:[#allocation2 + $0xe80] ss:$16 sps:$4 sm:$0xff]  }
 0x3a9   :  { %4370 = vmatpush1.bf16.msra.mxu1 %v9364_v56  ;;  %v9474_v56 = vld [vmem:[#allocation2 + $0xea4] ss:$16 sps:$4 sm:$0xff]  }
 0x3aa   :  { %4371 = vmatprep.subr.bf16.mxu1 %v9372_v57  ;;  %v9477_v57 = vld [vmem:[#allocation2 + $0xec4] ss:$16 sps:$4 sm:$0xff]  }
 0x3ad   :  { %4372 = vmatpush1.bf16.msra.mxu1 %v9370_v58 }
 0x3ae   :  { %4373 = vmatprep.subr.bf16.mxu1 %v9378_v59 }
 0x3b1   :  { %4374 = vmatpush1.bf16.msra.mxu1 %v9376_v60 }
 0x3b2   :  { %4375 = vmatprep.subr.bf16.mxu1 %v9384_v61  ;;  %v9475_v61 = vld [vmem:[#allocation2 + $0xec0] ss:$16 sps:$4 sm:$0xff]  }
 0x3b5   :  { %4376 = vmatpush1.bf16.msra.mxu1 %v9382_v11  ;;  %v2565_v11 = vld [vmem:[#allocation7 + $0x2] ss:$0 sm:$0xff] }
 0x3b6   :  { %4377 = vmatprep.subr.bf16.mxu1 %v9390_v62 }
 0x3b9   :  { %4378 = vmatpush1.bf16.msra.mxu1 %v9388_v63  ;;  %v9480_v63 = vld [vmem:[#allocation2 + $0xee4] ss:$16 sps:$4 sm:$0xff]  }
 0x3ba   :  { %4379 = vmatprep.subr.bf16.mxu1 %v9396_v0 }
 0x3bd   :  { %4380 = vmatpush1.bf16.msra.mxu1 %v9394_v1 }
 0x3be   :  { %4381 = vmatprep.subr.bf16.mxu1 %v9402_v3 }
 0x3c1   :  { %4382 = vmatpush1.bf16.msra.mxu1 %v9400_v5  ;;  %v9478_v5 = vld [vmem:[#allocation2 + $0xee0] ss:$16 sps:$4 sm:$0xff]  }
 0x3c2   :  { %4383 = vmatprep.subr.bf16.mxu1 %v9408_v6  ;;  %v9483_v6 = vld [vmem:[#allocation2 + $0xf04] ss:$16 sps:$4 sm:$0xff]  }
 0x3c5   :  { %4384 = vmatpush1.bf16.msra.mxu1 %v9406_v7 }
 0x3c6   :  { %4396 = vmatprep.subr.bf16.mxu1 %v9411_v8  ;;  %v9481_v8 = vld [vmem:[#allocation2 + $0xf00] ss:$16 sps:$4 sm:$0xff]  }
 0x3c8   :  { %4386 = vmatmul.mubr.bf16.vlgmr.msra.gmra.mrb[8].mxu1 %v10227_v27  ;;  %v9424_v27 = vld [vmem:[#allocation2 + $0xca0] ss:$16 sps:$4 sm:$0xff]  }
 0x3c9   :  { %4397 = vmatpush1.bf16.msra.mxu1 %v9409_v9  ;;  %4428 = vmatprep.mubr.bf16.mxu1 %v10236_v44  ;;  %v9427_v44 = vld [vmem:[#allocation2 + $0xcc0] ss:$16 sps:$4 sm:$0xff]   ;;  %v9486_v9 = vld [vmem:[#allocation2 + $0xf24] ss:$16 sps:$4 sm:$0xff]  }
 0x3ca   :  { %4398 = vmatprep.subr.bf16.mxu1 %v9414_v10  ;;  %v9484_v10 = vld [vmem:[#allocation2 + $0xf20] ss:$16 sps:$4 sm:$0xff]  }
 0x3cd   :  { %4399 = vmatpush1.bf16.msra.mxu1 %v9412_v12  ;;  %v9489_v12 = vld [vmem:[#allocation2 + $0xf44] ss:$16 sps:$4 sm:$0xff]  }
 0x3ce   :  { %4400 = vmatprep.subr.bf16.mxu1 %v9417_v13  ;;  %v9487_v13 = vld [vmem:[#allocation2 + $0xf40] ss:$16 sps:$4 sm:$0xff]  }
 0x3d1   :  { %4401 = vmatpush1.bf16.msra.mxu1 %v9415_v16  ;;  %v9492_v16 = vld [vmem:[#allocation2 + $0xf64] ss:$16 sps:$4 sm:$0xff]  }
 0x3d2   :  { %4402 = vmatprep.subr.bf16.mxu1 %v9420_v17  ;;  %v9490_v17 = vld [vmem:[#allocation2 + $0xf60] ss:$16 sps:$4 sm:$0xff]  }
 0x3d5   :  { %4403 = vmatpush1.bf16.msra.mxu1 %v9418_v18  ;;  %v9495_v18 = vld [vmem:[#allocation2 + $0xf84] ss:$16 sps:$4 sm:$0xff]  }
 0x3d6   :  { %4404 = vmatprep.subr.bf16.mxu1 %v9423_v21  ;;  %v9493_v21 = vld [vmem:[#allocation2 + $0xf80] ss:$16 sps:$4 sm:$0xff]  }
 0x3d9   :  { %4405 = vmatpush1.bf16.msra.mxu1 %v9421_v22  ;;  %v9498_v22 = vld [vmem:[#allocation2 + $0xfa4] ss:$16 sps:$4 sm:$0xff]  }
 0x3da   :  { %4406 = vmatprep.subr.bf16.mxu1 %v9426_v14  ;;  %v10273_v14 = vld [vmem:[#allocation7 + $0x3] ss:$8 sm:$0xf] }
 0x3dd   :  { %4407 = vmatpush1.bf16.msra.mxu1 %v9424_v27  ;;  %v9496_v27 = vld [vmem:[#allocation2 + $0xfa0] ss:$16 sps:$4 sm:$0xff]  }
 0x3de   :  { %4408 = vmatprep.subr.bf16.mxu1 %v9429_v15  ;;  %v9501_v15 = vld [vmem:[#allocation2 + $0xfc4] ss:$16 sps:$4 sm:$0xff]  }
 0x3e1   :  { %4409 = vmatpush1.bf16.msra.mxu1 %v9427_v44  ;;  %v2981_v44 = vrot.slane %v10273_v14, %v10185_v52 }
 0x3e2   :  { %4410 = vmatprep.subr.bf16.mxu1 %v9432_v24  ;;  %v2985_v24 = vrot.slane %v10273_v14, %v10189_v55 }
 0x3e5   :  { %4411 = vmatpush1.bf16.msra.mxu1 %v9430_v25  ;;  %v9499_v25 = vld [vmem:[#allocation2 + $0xfc0] ss:$16 sps:$4 sm:$0xff]  }
 0x3e6   :  { %4412 = vmatprep.subr.bf16.mxu1 %v9435_v26 }
 0x3e9   :  { %4413 = vmatpush1.bf16.msra.mxu1 %v9433_v19  ;;  %v9504_v19 = vld [vmem:[#allocation2 + $0xfe4] ss:$16 sps:$4 sm:$0xff]  }
 0x3ea   :  { %4414 = vmatprep.subr.bf16.mxu1 %v9438_v20 }
 0x3ed   :  { %4415 = vmatpush1.bf16.msra.mxu1 %v9436_v28 }
 0x3ee   :  { %4416 = vmatprep.subr.bf16.mxu1 %v9441_v29 }
 0x3f1   :  { %4417 = vmatpush1.bf16.msra.mxu1 %v9439_v30 }
 0x3f2   :  { %4418 = vmatprep.subr.bf16.mxu1 %v9444_v31 }
 0x3f5   :  { %4419 = vmatpush1.bf16.msra.mxu1 %v9442_v32 }
 0x3f6   :  { %4420 = vmatprep.subr.bf16.mxu1 %v9447_v33 }
 0x3f9   :  { %4421 = vmatpush1.bf16.msra.mxu1 %v9445_v34  ;;  %v9502_v34 = vld [vmem:[#allocation2 + $0xfe0] ss:$16 sps:$4 sm:$0xff]  }
 0x3fa   :  { %4422 = vmatprep.subr.bf16.mxu1 %v9450_v35 }
 0x3fd   :  { %4423 = vmatpush1.bf16.msra.mxu1 %v9448_v36 }
 0x3fe   :  { %4424 = vmatprep.subr.bf16.mxu1 %v9453_v37 }
 0x401   :  { %4425 = vmatpush1.bf16.msra.mxu1 %v9451_v39  ;;  %v9507_v39 = vld [vmem:[#allocation4 + $0x204] ss:$8 sps:$4 sm:$0xff]  }
 0x402   :  { %4426 = vmatprep.subr.bf16.mxu1 %v9456_v40 }
 0x405   :  { %4427 = vmatpush1.bf16.msra.mxu1 %v9454_v41 }
 0x406   :  { %4439 = vmatprep.subr.bf16.mxu1 %v9459_v42 }
 0x408   :  { %4429 = vmatmul.mubr.bf16.vlgmr.msra.gmra.mrb[8].mxu1 %v10239_v2  ;;  %v9472_v2 = vld [vmem:[#allocation2 + $0xea0] ss:$16 sps:$4 sm:$0xff]  }
 0x409   :  { %4440 = vmatpush1.bf16.msra.mxu1 %v9457_v45  ;;  %4471 = vmatprep.mubr.bf16.mxu1 %v10256_v38  ;;  %v9505_v45 = vld [vmem:[#allocation4 + $0x200] ss:$8 sps:$4 sm:$0xff]  }
 0x40a   :  { %4441 = vmatprep.subr.bf16.mxu1 %v9462_v46  ;;  %v9510_v46 = vld [vmem:[#allocation4 + $0x214] ss:$8 sps:$4 sm:$0xff]  }
 0x40d   :  { %4442 = vmatpush1.bf16.msra.mxu1 %v9460_v47  ;;  %v9508_v47 = vld [vmem:[#allocation4 + $0x210] ss:$8 sps:$4 sm:$0xff]  }
 0x40e   :  { %4443 = vmatprep.subr.bf16.mxu1 %v9465_v43  ;;  %v9513_v43 = vld [vmem:[#allocation4 + $0x224] ss:$8 sps:$4 sm:$0xff]  }
 0x411   :  { %4444 = vmatpush1.bf16.msra.mxu1 %v9463_v48  ;;  %v9511_v48 = vld [vmem:[#allocation4 + $0x220] ss:$8 sps:$4 sm:$0xff]  }
 0x412   :  { %4445 = vmatprep.subr.bf16.mxu1 %v9468_v4  ;;  %v9516_v4 = vld [vmem:[#allocation4 + $0x234] ss:$8 sps:$4 sm:$0xff]  }
 0x415   :  { %4446 = vmatpush1.bf16.msra.mxu1 %v9466_v49  ;;  %v9514_v49 = vld [vmem:[#allocation4 + $0x230] ss:$8 sps:$4 sm:$0xff]  }
 0x416   :  { %4447 = vmatprep.subr.bf16.mxu1 %v9471_v50  ;;  %v9519_v50 = vld [vmem:[#allocation4 + $0x244] ss:$8 sps:$4 sm:$0xff]  }
 0x419   :  { %4448 = vmatpush1.bf16.msra.mxu1 %v9469_v53  ;;  %v9517_v53 = vld [vmem:[#allocation4 + $0x240] ss:$8 sps:$4 sm:$0xff]  }
 0x41a   :  { %4449 = vmatprep.subr.bf16.mxu1 %v9474_v56  ;;  %v9522_v56 = vld [vmem:[#allocation4 + $0x254] ss:$8 sps:$4 sm:$0xff]  }
 0x41b   :  { %v8376_v58 = vpop.f32.mrb[4].mxu1 }
 0x41c   :  { %v8377_v38 = vpop.f32.mrb[5].mxu1 }
 0x41d   :  { %v8378_v59 = vadd.f32 %v8377_v38, %v8376_v58  ;;  %4450 = vmatpush1.bf16.msra.mxu1 %v9472_v2  ;;  %v8379_v60 = vpop.f32.mrb[6].mxu1  ;;  %v9520_v2 = vld [vmem:[#allocation4 + $0x250] ss:$8 sps:$4 sm:$0xff]   ;;  %v9528_v58 = vld [vmem:[#allocation4 + $0x274] ss:$8 sps:$4 sm:$0xff]  }
 0x41e   :  { %v8380_v62 = vpop.f32.mrb[7].mxu1  ;;  %4451 = vmatprep.subr.bf16.mxu1 %v9477_v57  ;;  %v9523_v57 = vld [vmem:[#allocation4 + $0x260] ss:$8 sps:$4 sm:$0xff]   ;;  %v9526_v38 = vld [vmem:[#allocation4 + $0x270] ss:$8 sps:$4 sm:$0xff]  }
 0x41f   :  { %v8381_v0 = vadd.f32 %v8380_v62, %v8379_v60  ;;  %v2697_v1 = vadd.f32 %v8378_v59, %v2565_v11  ;;  %v9531_v59 = vld [vmem:[#allocation4 + $0x284] ss:$8 sps:$4 sm:$0xff]   ;;  %v9529_v60 = vld [vmem:[#allocation4 + $0x280] ss:$8 sps:$4 sm:$0xff]  }
 0x420   :  { %v9537_v62 = vld [vmem:[#allocation4 + $0x2a4] ss:$8 sps:$4 sm:$0xff]  }
 0x421   :  { %v2700_v3 = vadd.f32 %v8381_v0, %v2565_v11  ;;  %4452 = vmatpush1.bf16.msra.mxu1 %v9475_v61  ;;  %v9534_v61 = vld [vmem:[#allocation4 + $0x294] ss:$8 sps:$4 sm:$0xff]   ;;  %v9532_v11 = vld [vmem:[#allocation4 + $0x290] ss:$8 sps:$4 sm:$0xff]  }
 0x422   :  { %4453 = vmatprep.subr.bf16.mxu1 %v9480_v63  ;;  %v9535_v63 = vld [vmem:[#allocation4 + $0x2a0] ss:$8 sps:$4 sm:$0xff]   ;;  %v9540_v0 = vld [vmem:[#allocation4 + $0x2b4] ss:$8 sps:$4 sm:$0xff]  }
 0x423   :  { %v10271_v7 = vpack.c.bf16 %v2700_v3, %v2697_v1  ;;  %v9538_v1 = vld [vmem:[#allocation4 + $0x2b0] ss:$8 sps:$4 sm:$0xff]   ;;  %v9543_v3 = vld [vmem:[#allocation4 + $0x2c4] ss:$8 sps:$4 sm:$0xff]  }
 0x425   :  { %4454 = vmatpush1.bf16.msra.mxu1 %v9478_v5  ;;  %v9541_v5 = vld [vmem:[#allocation4 + $0x2c0] ss:$8 sps:$4 sm:$0xff]  }
 0x426   :  { %4455 = vmatprep.subr.bf16.mxu1 %v9483_v6  ;;  %v9546_v6 = vld [vmem:[#allocation4 + $0x2d4] ss:$8 sps:$4 sm:$0xff]  }
 0x429   :  { %4456 = vmatpush1.bf16.msra.mxu1 %v9481_v8  ;;  %v9544_v8 = vld [vmem:[#allocation4 + $0x2d0] ss:$8 sps:$4 sm:$0xff]  }
 0x42a   :  { %4457 = vmatprep.subr.bf16.mxu1 %v9486_v9  ;;  %v9549_v9 = vld [vmem:[#allocation4 + $0x2e4] ss:$8 sps:$4 sm:$0xff]  }
 0x42d   :  { %4458 = vmatpush1.bf16.msra.mxu1 %v9484_v10  ;;  %v9547_v10 = vld [vmem:[#allocation4 + $0x2e0] ss:$8 sps:$4 sm:$0xff]  }
 0x42e   :  { %4459 = vmatprep.subr.bf16.mxu1 %v9489_v12  ;;  %v9552_v12 = vld [vmem:[#allocation4 + $0x2f4] ss:$8 sps:$4 sm:$0xff]  }
 0x431   :  { %4460 = vmatpush1.bf16.msra.mxu1 %v9487_v13  ;;  %v9550_v13 = vld [vmem:[#allocation4 + $0x2f0] ss:$8 sps:$4 sm:$0xff]  }
 0x432   :  { %4461 = vmatprep.subr.bf16.mxu1 %v9492_v16  ;;  %v9555_v16 = vld [vmem:[#allocation4 + $0x304] ss:$8 sps:$4 sm:$0xff]  }
 0x435   :  { %4462 = vmatpush1.bf16.msra.mxu1 %v9490_v17  ;;  %v9601_v17 = vld [vmem:[#allocation6 + $0xc0] sm:$0xff]  }
 0x436   :  { %4463 = vmatprep.subr.bf16.mxu1 %v9495_v18  ;;  %v9602_v18 = vld [vmem:[#allocation6 + $0x80] sm:$0xff]   ;;  %8382 = vmatprep.subr.bf16.mxu0 %v9601_v17  ;;  %v9598_v17 = vld [vmem:[#allocation4 + $0x3f0] ss:$8 sps:$4 sm:$0xff]  }
 0x437   :  { %8383 = vmatpush3.bf16.msra.mxu0 %v9602_v18  ;;  %v9613_v18 = vld [vmem:[#allocation6 + $0xf0] sm:$0xff]  }
 0x439   :  { %4464 = vmatpush1.bf16.msra.mxu1 %v9493_v21  ;;  %v9603_v21 = vld [vmem:[#allocation6 + $0xc8] sm:$0xff]  }
 0x43a   :  { %4465 = vmatprep.subr.bf16.mxu1 %v9498_v22  ;;  %v9604_v22 = vld [vmem:[#allocation6 + $0x88] sm:$0xff]   ;;  %8384 = vmatprep.subr.bf16.mxu0 %v9603_v21  ;;  %v9614_v21 = vld [vmem:[#allocation6 + $0xb0] sm:$0xff]  }
 0x43b   :  { %8385 = vmatpush3.bf16.msra.mxu0 %v9604_v22  ;;  %v9615_v22 = vld [vmem:[#allocation6 + $0xf8] sm:$0xff]  }
 0x43d   :  { %4466 = vmatpush1.bf16.msra.mxu1 %v9496_v27  ;;  %v4645_v26 = vpop.f32.mrb[8].mxu0  ;;  %v9605_v27 = vld [vmem:[#allocation6 + $0xd0] sm:$0xff]  }
 0x43e   :  { %4467 = vmatprep.subr.bf16.mxu1 %v9501_v15  ;;  %v8522_v20 = vadd.f32 %v4645_v26, %v2981_v44  ;;  %v4647_v28 = vpop.f32.mrb[9].mxu0  ;;  %v9606_v15 = vld [vmem:[#allocation6 + $0x90] sm:$0xff]   ;;  %8386 = vmatprep.subr.bf16.mxu0 %v9605_v27  ;;  %v9610_v26 = vld [vmem:[#allocation6 + $0xa0] sm:$0xff]   ;;  %v9616_v27 = vld [vmem:[#allocation6 + $0xb8] sm:$0xff]  }
 0x43f   :  { %v8523_v29 = vadd.f32 %v4647_v28, %v2985_v24  ;;  %v4649_v30 = vpop.f32.mrb[10].mxu0  ;;  %8387 = vmatpush3.bf16.msra.mxu0 %v9606_v15  ;;  %v2973_v28 = vrot.slane %v10273_v14, %v10183_v51  ;;  %v9619_v15 = vld [vmem:[#allocation4 + $0x404] ss:$8 sps:$4 sm:$0xff]  }
 0x440   :  { %v4656_v31 = vmax.f32 %v8522_v20, 0.0  ;;  %v8524_v32 = vadd.f32 %v4649_v30, %v2981_v44  ;;  %v4651_v33 = vpop.f32.mrb[11].mxu0  ;;  %v9607_v44 = vld [vmem:[#allocation6 + $0xd8] sm:$0xff]   ;;  %v9612_v20 = vld [vmem:[#allocation6 + $0xa8] sm:$0xff]  }
 0x441   :  { %4468 = vmatpush1.bf16.msra.mxu1 %v9499_v25  ;;  %v4657_v35 = vmax.f32 %v8523_v29, 0.0  ;;  %v8525_v36 = vadd.f32 %v4651_v33, %v2985_v24  ;;  %v9608_v24 = vld [vmem:[#allocation6 + $0x98] sm:$0xff]   ;;  %8388 = vmatprep.subr.bf16.mxu0 %v9607_v44  ;;  %v9609_v25 = vld [vmem:[#allocation6 + $0xe0] sm:$0xff]   ;;  %v2977_v29 = vrot.slane %v10273_v14, %v10187_v54 }
 0x442   :  { %4469 = vmatprep.subr.bf16.mxu1 %v9504_v19  ;;  %v4660_v37 = vmax.f32 %v8524_v32, 0.0  ;;  %v9611_v19 = vld [vmem:[#allocation6 + $0xe8] sm:$0xff]   ;;  %v9556_v14 = vld [vmem:[#allocation4 + $0x310] ss:$8 sps:$4 sm:$0xff]  }
 0x443   :  { %v4661_v40 = vmax.f32 %v8525_v36, 0.0  ;;  %8389 = vmatpush3.bf16.msra.mxu0 %v9608_v24  ;;  %v4731_v44 = vld [vmem:[#allocation7 + $0x4] ss:$8 sm:$0x3] }
 0x444   :  { %v10279_v41 = vpack.c.bf16 %v4660_v37, %v4656_v31  ;;  %8390 = vmatprep.subr.bf16.mxu0 %v9609_v25  ;;  %v4736_v24 = vrot.slane %v4731_v44, %v10183_v51  ;;  %v4740_v25 = vrot.slane %v4731_v44, %v10187_v54  ;;  %v9686_v44 = vld [vmem:[#allocation6 + $0x160] sm:$0xff]  }
 0x445   :  { %4470 = vmatpush1.bf16.msra.mxu1 %v9502_v34  ;;  %v10281_v42 = vpack.c.bf16 %v4661_v40, %v4657_v35 }
 0x446   :  { %5063 = vmatprep.subr.bf16.mxu1 %v9507_v39 }
 0x447   :  { %8391 = vmatpush3.bf16.msra.mxu0 %v9610_v26 }
 0x448   :  { %4472 = vmatmul.mubr.bf16.vlgmr.msra.gmra.mrb[8].mxu1 %v10262_v23  ;;  %v9525_v23 = vld [vmem:[#allocation4 + $0x264] ss:$8 sps:$4 sm:$0xff]   ;;  %8392 = vmatprep.subr.bf16.mxu0 %v9611_v19 }
 0x449   :  { %5064 = vmatpush1.bf16.msra.mxu1 %v9505_v45 }
 0x44a   :  { %5065 = vmatprep.subr.bf16.mxu1 %v9510_v46 }
 0x44b   :  { %8393 = vmatpush3.bf16.msra.mxu0 %v9612_v20 }
 0x44c   :  { %8394 = vmatprep.subr.bf16.mxu0 %v9613_v18  ;;  %v9675_v18 = vld [vmem:[#allocation6 + $0x108] sm:$0xff]  }
 0x44d   :  { %5066 = vmatpush1.bf16.msra.mxu1 %v9508_v47 }
 0x44e   :  { %5067 = vmatprep.subr.bf16.mxu1 %v9513_v43 }
 0x44f   :  { %8395 = vmatpush3.bf16.msra.mxu0 %v9614_v21  ;;  %v9676_v21 = vld [vmem:[#allocation6 + $0x150] sm:$0xff]  }
 0x450   :  { %8396 = vmatprep.subr.bf16.mxu0 %v9615_v22  ;;  %v9680_v22 = vld [vmem:[#allocation6 + $0x110] sm:$0xff]  }
 0x451   :  { %5068 = vmatpush1.bf16.msra.mxu1 %v9511_v48  ;;  %v9553_v48 = vld [vmem:[#allocation4 + $0x300] ss:$8 sps:$4 sm:$0xff]  }
 0x452   :  { %5069 = vmatprep.subr.bf16.mxu1 %v9516_v4  ;;  %v9558_v4 = vld [vmem:[#allocation4 + $0x314] ss:$8 sps:$4 sm:$0xff]  }
 0x453   :  { %8397 = vmatpush3.bf16.msra.mxu0 %v9616_v27  ;;  %v9681_v27 = vld [vmem:[#allocation6 + $0x158] sm:$0xff]  }
 0x454   :  { %5442 = vmatprep.subr.bf16.mxu0 %v9619_v15  ;;  %v9685_v15 = vld [vmem:[#allocation6 + $0x118] sm:$0xff]  }
 0x455   :  { %5070 = vmatpush1.bf16.msra.mxu1 %v9514_v49  ;;  %v9561_v49 = vld [vmem:[#allocation4 + $0x324] ss:$8 sps:$4 sm:$0xff]  }
 0x456   :  { %5071 = vmatprep.subr.bf16.mxu1 %v9519_v50  ;;  %v9559_v50 = vld [vmem:[#allocation4 + $0x320] ss:$8 sps:$4 sm:$0xff]  }
 0x459   :  { %5072 = vmatpush1.bf16.msra.mxu1 %v9517_v53  ;;  %v9564_v53 = vld [vmem:[#allocation4 + $0x334] ss:$8 sps:$4 sm:$0xff]  }
 0x45a   :  { %5073 = vmatprep.subr.bf16.mxu1 %v9522_v56  ;;  %v9562_v56 = vld [vmem:[#allocation4 + $0x330] ss:$8 sps:$4 sm:$0xff]  }
 0x45d   :  { %5074 = vmatpush1.bf16.msra.mxu1 %v9520_v2  ;;  %v9567_v2 = vld [vmem:[#allocation4 + $0x344] ss:$8 sps:$4 sm:$0xff]  }
 0x45e   :  { %5075 = vmatprep.subr.bf16.mxu1 %v9525_v23  ;;  %v9565_v23 = vld [vmem:[#allocation4 + $0x340] ss:$8 sps:$4 sm:$0xff]  }
 0x461   :  { %5076 = vmatpush1.bf16.msra.mxu1 %v9523_v57  ;;  %v9570_v57 = vld [vmem:[#allocation4 + $0x354] ss:$8 sps:$4 sm:$0xff]  }
 0x462   :  { %5077 = vmatprep.subr.bf16.mxu1 %v9528_v58  ;;  %v9568_v58 = vld [vmem:[#allocation4 + $0x350] ss:$8 sps:$4 sm:$0xff]  }
 0x465   :  { %5078 = vmatpush1.bf16.msra.mxu1 %v9526_v38  ;;  %v9573_v38 = vld [vmem:[#allocation4 + $0x364] ss:$8 sps:$4 sm:$0xff]  }
 0x466   :  { %5079 = vmatprep.subr.bf16.mxu1 %v9531_v59  ;;  %v9576_v59 = vld [vmem:[#allocation4 + $0x374] ss:$8 sps:$4 sm:$0xff]  }
 0x469   :  { %5080 = vmatpush1.bf16.msra.mxu1 %v9529_v60  ;;  %v9574_v60 = vld [vmem:[#allocation4 + $0x370] ss:$8 sps:$4 sm:$0xff]  }
 0x46a   :  { %5081 = vmatprep.subr.bf16.mxu1 %v9534_v61  ;;  %v9579_v61 = vld [vmem:[#allocation4 + $0x384] ss:$8 sps:$4 sm:$0xff]  }
 0x46d   :  { %5082 = vmatpush1.bf16.msra.mxu1 %v9532_v11  ;;  %v9577_v11 = vld [vmem:[#allocation4 + $0x380] ss:$8 sps:$4 sm:$0xff]  }
 0x46e   :  { %5083 = vmatprep.subr.bf16.mxu1 %v9537_v62  ;;  %v9582_v62 = vld [vmem:[#allocation4 + $0x394] ss:$8 sps:$4 sm:$0xff]  }
 0x471   :  { %5084 = vmatpush1.bf16.msra.mxu1 %v9535_v63  ;;  %v9580_v63 = vld [vmem:[#allocation4 + $0x390] ss:$8 sps:$4 sm:$0xff]  }
 0x472   :  { %5085 = vmatprep.subr.bf16.mxu1 %v9540_v0  ;;  %v9585_v0 = vld [vmem:[#allocation4 + $0x3a4] ss:$8 sps:$4 sm:$0xff]  }
 0x475   :  { %5086 = vmatpush1.bf16.msra.mxu1 %v9538_v1  ;;  %v9583_v1 = vld [vmem:[#allocation4 + $0x3a0] ss:$8 sps:$4 sm:$0xff]  }
 0x476   :  { %5087 = vmatprep.subr.bf16.mxu1 %v9543_v3  ;;  %v9588_v3 = vld [vmem:[#allocation4 + $0x3b4] ss:$8 sps:$4 sm:$0xff]  }
 0x479   :  { %5088 = vmatpush1.bf16.msra.mxu1 %v9541_v5  ;;  %v9586_v5 = vld [vmem:[#allocation4 + $0x3b0] ss:$8 sps:$4 sm:$0xff]  }
 0x47a   :  { %5089 = vmatprep.subr.bf16.mxu1 %v9546_v6  ;;  %v9591_v6 = vld [vmem:[#allocation4 + $0x3c4] ss:$8 sps:$4 sm:$0xff]  }
 0x47d   :  { %5090 = vmatpush1.bf16.msra.mxu1 %v9544_v8  ;;  %v9589_v8 = vld [vmem:[#allocation4 + $0x3c0] ss:$8 sps:$4 sm:$0xff]  }
 0x47e   :  { %5091 = vmatprep.subr.bf16.mxu1 %v9549_v9  ;;  %v9594_v9 = vld [vmem:[#allocation4 + $0x3d4] ss:$8 sps:$4 sm:$0xff]  }
 0x481   :  { %5092 = vmatpush1.bf16.msra.mxu1 %v9547_v10  ;;  %v9592_v10 = vld [vmem:[#allocation4 + $0x3d0] ss:$8 sps:$4 sm:$0xff]  }
 0x482   :  { %5093 = vmatprep.subr.bf16.mxu1 %v9552_v12  ;;  %v9597_v12 = vld [vmem:[#allocation4 + $0x3e4] ss:$8 sps:$4 sm:$0xff]  }
 0x485   :  { %5094 = vmatpush1.bf16.msra.mxu1 %v9550_v13  ;;  %v9595_v13 = vld [vmem:[#allocation4 + $0x3e0] ss:$8 sps:$4 sm:$0xff]  }
 0x486   :  { %5106 = vmatprep.subr.bf16.mxu1 %v9555_v16  ;;  %v9600_v16 = vld [vmem:[#allocation4 + $0x3f4] ss:$8 sps:$4 sm:$0xff]  }
 0x51b   :  { %v4473_v30 = vpop.f32.mrb[8].mxu1 }
 0x51c   :  { %v8518_v31 = vadd.f32 %v4473_v30, %v2973_v28  ;;  %v4475_v32 = vpop.f32.mrb[9].mxu1 }
 0x51d   :  { %v8519_v33 = vadd.f32 %v4475_v32, %v2977_v29  ;;  %v4477_v34 = vpop.f32.mrb[10].mxu1 }
 0x51e   :  { %v8520_v35 = vadd.f32 %v4477_v34, %v2973_v28  ;;  %v4479_v36 = vpop.f32.mrb[11].mxu1  ;;  %v4654_v39 = vmax.f32 %v8518_v31, 0.0 }
 0x51f   :  { %v8521_v37 = vadd.f32 %v4479_v36, %v2977_v29  ;;  %v4655_v45 = vmax.f32 %v8519_v33, 0.0 }
 0x520   :  { %v4658_v40 = vmax.f32 %v8520_v35, 0.0 }
 0x521   :  { %v4659_v46 = vmax.f32 %v8521_v37, 0.0 }
 0x522   :  { %v4662_v47 = vpack.c.bf16 %v4658_v40, %v4654_v39  ;;  %v9617_v39 = vld [vmem:[#allocation4 + $0x400] ss:$8 sps:$4 sm:$0xff]   ;;  %v9622_v40 = vld [vmem:[#allocation4 + $0x414] ss:$8 sps:$4 sm:$0xff]  }
 0x523   :  { %v4663_v43 = vpack.c.bf16 %v4659_v46, %v4655_v45  ;;  %v9620_v45 = vld [vmem:[#allocation4 + $0x410] ss:$8 sps:$4 sm:$0xff]   ;;  %v10044_v46 = vmov 0  }
 0x525   :  { %5095 = vmatprep.mubr.bf16.mxu1 %v4663_v43  ;;  %v9623_v43 = vld [vmem:[#allocation4 + $0x420] ss:$8 sps:$4 sm:$0xff]  }
 0x526   :  { %5096 = vmatmul.mubr.bf16.vlgmr.msra.gmra.mrb[12].mxu1 %v4662_v47  ;;  %v9625_v47 = vld [vmem:[#allocation4 + $0x424] ss:$8 sps:$4 sm:$0xff]  }
 0x527   :  { %5107 = vmatpush1.bf16.msra.mxu1 %v9553_v48  ;;  %5138 = vmatprep.mubr.bf16.mxu1 %v10281_v42  ;;  %v9571_v42 = vld [vmem:[#allocation4 + $0x360] ss:$8 sps:$4 sm:$0xff]   ;;  %v9628_v48 = vld [vmem:[#allocation4 + $0x434] ss:$8 sps:$4 sm:$0xff]  }
 0x528   :  { %5108 = vmatprep.subr.bf16.mxu1 %v9558_v4  ;;  %v9626_v4 = vld [vmem:[#allocation4 + $0x430] ss:$8 sps:$4 sm:$0xff]  }
 0x52b   :  { %5109 = vmatpush1.bf16.msra.mxu1 %v9556_v14  ;;  %v9631_v14 = vld [vmem:[#allocation4 + $0x444] ss:$8 sps:$4 sm:$0xff]  }
 0x52c   :  { %5110 = vmatprep.subr.bf16.mxu1 %v9561_v49  ;;  %v9629_v49 = vld [vmem:[#allocation4 + $0x440] ss:$8 sps:$4 sm:$0xff]  }
 0x52f   :  { %5111 = vmatpush1.bf16.msra.mxu1 %v9559_v50  ;;  %v9634_v50 = vld [vmem:[#allocation4 + $0x454] ss:$8 sps:$4 sm:$0xff]  }
 0x530   :  { %5112 = vmatprep.subr.bf16.mxu1 %v9564_v53  ;;  %v9632_v53 = vld [vmem:[#allocation4 + $0x450] ss:$8 sps:$4 sm:$0xff]  }
 0x533   :  { %5113 = vmatpush1.bf16.msra.mxu1 %v9562_v56  ;;  %v9637_v56 = vld [vmem:[#allocation4 + $0x464] ss:$8 sps:$4 sm:$0xff]  }
 0x534   :  { %5114 = vmatprep.subr.bf16.mxu1 %v9567_v2  ;;  %v9635_v2 = vld [vmem:[#allocation4 + $0x460] ss:$8 sps:$4 sm:$0xff]  }
 0x537   :  { %5115 = vmatpush1.bf16.msra.mxu1 %v9565_v23  ;;  %v9640_v23 = vld [vmem:[#allocation4 + $0x474] ss:$8 sps:$4 sm:$0xff]  }
 0x538   :  { %5116 = vmatprep.subr.bf16.mxu1 %v9570_v57  ;;  %v9638_v57 = vld [vmem:[#allocation4 + $0x470] ss:$8 sps:$4 sm:$0xff]  }
 0x53b   :  { %5117 = vmatpush1.bf16.msra.mxu1 %v9568_v58  ;;  %v9644_v58 = vld [vmem:[#allocation2 + $0x1104] ss:$16 sps:$4 sm:$0xff]  }
 0x53c   :  { %5118 = vmatprep.subr.bf16.mxu1 %v9573_v38  ;;  %v9641_v38 = vld [vmem:[%s10347_s2] sm:$0xff]  }
 0x53f   :  { %5119 = vmatpush1.bf16.msra.mxu1 %v9571_v42  ;;  %v9642_v42 = vld [vmem:[#allocation2 + $0x1100] ss:$16 sps:$4 sm:$0xff]  }
 0x540   :  { %5120 = vmatprep.subr.bf16.mxu1 %v9576_v59  ;;  %v9647_v59 = vld [vmem:[#allocation2 + $0x1124] ss:$16 sps:$4 sm:$0xff]  }
 0x543   :  { %5121 = vmatpush1.bf16.msra.mxu1 %v9574_v60  ;;  %v9645_v60 = vld [vmem:[#allocation2 + $0x1120] ss:$16 sps:$4 sm:$0xff]  }
 0x544   :  { %5122 = vmatprep.subr.bf16.mxu1 %v9579_v61  ;;  %v9650_v61 = vld [vmem:[#allocation2 + $0x1144] ss:$16 sps:$4 sm:$0xff]  }
 0x547   :  { %5123 = vmatpush1.bf16.msra.mxu1 %v9577_v11  ;;  %v9648_v11 = vld [vmem:[#allocation2 + $0x1140] ss:$16 sps:$4 sm:$0xff]  }
 0x548   :  { %5124 = vmatprep.subr.bf16.mxu1 %v9582_v62  ;;  %v9653_v62 = vld [vmem:[#allocation2 + $0x1164] ss:$16 sps:$4 sm:$0xff]  }
 0x54b   :  { %5125 = vmatpush1.bf16.msra.mxu1 %v9580_v63  ;;  %v9651_v63 = vld [vmem:[#allocation2 + $0x1160] ss:$16 sps:$4 sm:$0xff]  }
 0x54c   :  { %5126 = vmatprep.subr.bf16.mxu1 %v9585_v0  ;;  %v9656_v0 = vld [vmem:[#allocation2 + $0x1184] ss:$16 sps:$4 sm:$0xff]  }
 0x54f   :  { %5127 = vmatpush1.bf16.msra.mxu1 %v9583_v1  ;;  %v9654_v1 = vld [vmem:[#allocation2 + $0x1180] ss:$16 sps:$4 sm:$0xff]  }
 0x550   :  { %5128 = vmatprep.subr.bf16.mxu1 %v9588_v3  ;;  %v9659_v3 = vld [vmem:[#allocation2 + $0x11a4] ss:$16 sps:$4 sm:$0xff]  }
 0x553   :  { %5129 = vmatpush1.bf16.msra.mxu1 %v9586_v5  ;;  %v9657_v5 = vld [vmem:[#allocation2 + $0x11a0] ss:$16 sps:$4 sm:$0xff]  }
 0x554   :  { %5130 = vmatprep.subr.bf16.mxu1 %v9591_v6  ;;  %v9662_v6 = vld [vmem:[#allocation2 + $0x11c4] ss:$16 sps:$4 sm:$0xff]  }
 0x557   :  { %5131 = vmatpush1.bf16.msra.mxu1 %v9589_v8  ;;  %v9660_v8 = vld [vmem:[#allocation2 + $0x11c0] ss:$16 sps:$4 sm:$0xff]  }
 0x558   :  { %5132 = vmatprep.subr.bf16.mxu1 %v9594_v9  ;;  %v9665_v9 = vld [vmem:[#allocation2 + $0x11e4] ss:$16 sps:$4 sm:$0xff]  }
 0x55b   :  { %5133 = vmatpush1.bf16.msra.mxu1 %v9592_v10  ;;  %v9663_v10 = vld [vmem:[#allocation2 + $0x11e0] ss:$16 sps:$4 sm:$0xff]  }
 0x55c   :  { %5134 = vmatprep.subr.bf16.mxu1 %v9597_v12  ;;  %v9666_v12 = vld [vmem:[#allocation6 + $0x140] sm:$0xff]  }
 0x55f   :  { %5135 = vmatpush1.bf16.msra.mxu1 %v9595_v13  ;;  %v9669_v13 = vld [vmem:[#allocation2 + $0x1004] ss:$16 sps:$4 sm:$0xff]  }
 0x560   :  { %5136 = vmatprep.subr.bf16.mxu1 %v9600_v16  ;;  %v9670_v16 = vld [vmem:[#allocation6 + $0x100] sm:$0xff]  }
 0x563   :  { %5137 = vmatpush1.bf16.msra.mxu1 %v9598_v17  ;;  %v9671_v17 = vld [vmem:[#allocation6 + $0x148] sm:$0xff]  }
 0x564   :  { %8404 = vmatprep.subr.bf16.mxu1 %v9666_v12 }
 0x566   :  { %5139 = vmatmul.mubr.bf16.vlgmr.msra.gmra.mrb[12].mxu1 %v10279_v41 }
 0x567   :  { %8405 = vmatpush3.bf16.msra.mxu1 %v9670_v16  ;;  %v9754_v16 = vld [vmem:[#allocation2 + $0x1200] ss:$16 sps:$4 sm:$0xff]  }
 0x568   :  { %8406 = vmatprep.subr.bf16.mxu1 %v9671_v17 }
 0x56b   :  { %8407 = vmatpush3.bf16.msra.mxu1 %v9675_v18  ;;  %v9706_v18 = vld [vmem:[#allocation2 + $0x1108] ss:$16 sps:$4 sm:$0xff]  }
 0x56c   :  { %8408 = vmatprep.subr.bf16.mxu1 %v9676_v21  ;;  %v9711_v21 = vld [vmem:[#allocation2 + $0x112c] ss:$16 sps:$4 sm:$0xff]  }
 0x56f   :  { %8409 = vmatpush3.bf16.msra.mxu1 %v9680_v22  ;;  %v9762_v22 = vld [vmem:[#allocation2 + $0x1224] ss:$16 sps:$4 sm:$0xff]  }
 0x570   :  { %8410 = vmatprep.subr.bf16.mxu1 %v9681_v27  ;;  %v9760_v27 = vld [vmem:[#allocation2 + $0x1220] ss:$16 sps:$4 sm:$0xff]  }
 0x573   :  { %8411 = vmatpush3.bf16.msra.mxu1 %v9685_v15  ;;  %v9709_v15 = vld [vmem:[#allocation2 + $0x1128] ss:$16 sps:$4 sm:$0xff]  }
 0x574   :  { %8412 = vmatprep.subr.bf16.mxu1 %v9686_v44  ;;  %v9768_v44 = vld [vmem:[#allocation2 + $0x1244] ss:$16 sps:$4 sm:$0xff]  }
 0x639   :  { %v5140_v26 = vpop.f32.mrb[12].mxu1 }
 0x63a   :  { %v8526_v19 = vadd.f32 %v5140_v26, %v4736_v24  ;;  %v5142_v20 = vpop.f32.mrb[13].mxu1  ;;  %v9695_v26 = vld [vmem:[#allocation6 + $0x128] sm:$0xff]  }
 0x63b   :  { %v8527_v28 = vadd.f32 %v5142_v20, %v4740_v25  ;;  %v5144_v41 = vpop.f32.mrb[14].mxu1  ;;  %v9700_v20 = vld [vmem:[#allocation6 + $0x130] sm:$0xff]  }
 0x63c   :  { %v8528_v29 = vadd.f32 %v5144_v41, %v4736_v24  ;;  %v5146_v30 = vpop.f32.mrb[15].mxu1  ;;  %v5149_v32 = vmax.f32 %v8526_v19, 0.0  ;;  %v9690_v24 = vld [vmem:[#allocation6 + $0x120] sm:$0xff]   ;;  %v9696_v19 = vld [vmem:[#allocation6 + $0x170] sm:$0xff]   ;;  %v9705_v41 = vld [vmem:[#allocation6 + $0x138] sm:$0xff]  }
 0x63d   :  { %v8529_v31 = vadd.f32 %v5146_v30, %v4740_v25  ;;  %v5150_v34 = vmax.f32 %v8527_v28, 0.0  ;;  %8413 = vmatpush3.bf16.msra.mxu1 %v9690_v24  ;;  %v9691_v25 = vld [vmem:[#allocation6 + $0x168] sm:$0xff]   ;;  %v9701_v28 = vld [vmem:[#allocation6 + $0x178] sm:$0xff]  }
 0x63e   :  { %v5151_v33 = vmax.f32 %v8528_v29, 0.0  ;;  %8414 = vmatprep.subr.bf16.mxu1 %v9691_v25  ;;  %v9708_v29 = vld [vmem:[#allocation2 + $0x110c] ss:$16 sps:$4 sm:$0xff]   ;;  %v9766_v25 = vld [vmem:[#allocation2 + $0x1240] ss:$16 sps:$4 sm:$0xff]  }
 0x63f   :  { %v5152_v35 = vmax.f32 %v8529_v31, 0.0  ;;  %v9714_v24 = vld [vmem:[#allocation2 + $0x114c] ss:$16 sps:$4 sm:$0xff]  }
 0x640   :  { %v5153_v36 = vpack.c.bf16 %v5151_v33, %v5149_v32 }
 0x641   :  { %v5154_v37 = vpack.c.bf16 %v5152_v35, %v5150_v34  ;;  %8415 = vmatpush3.bf16.msra.mxu1 %v9695_v26  ;;  %v5187_v34 = vld [vmem:[#allocation7 + $0x5] ss:$0 sm:$0xff]  ;;  %v9712_v26 = vld [vmem:[#allocation2 + $0x1148] ss:$16 sps:$4 sm:$0xff]  }
 0x642   :  { %8416 = vmatprep.subr.bf16.mxu1 %v9696_v19  ;;  %v9774_v19 = vld [vmem:[#allocation2 + $0x1264] ss:$16 sps:$4 sm:$0xff]  }
 0x643   :  { %5316 = vmatprep.mubr.bf16.mxu0 %v5154_v37 }
 0x644   :  { %5317 = vmatmul.mubr.bf16.vlgmr.msra.gmra.mrb[12].mxu0 %v5153_v36 }
 0x645   :  { %5443 = vmatpush1.bf16.msra.mxu0 %v9617_v39  ;;  %5474 = vmatprep.mubr.bf16.mxu0 %v10044_v46 }
 0x646   :  { %5444 = vmatprep.subr.bf16.mxu0 %v9622_v40  ;;  %8417 = vmatpush3.bf16.msra.mxu1 %v9700_v20  ;;  %v9667_v40 = vld [vmem:[#allocation2 + $0x1000] ss:$16 sps:$4 sm:$0xff]   ;;  %v9717_v20 = vld [vmem:[#allocation2 + $0x116c] ss:$16 sps:$4 sm:$0xff]  }
 0x647   :  { %8418 = vmatprep.subr.bf16.mxu1 %v9701_v28  ;;  %v9772_v28 = vld [vmem:[#allocation2 + $0x1260] ss:$16 sps:$4 sm:$0xff]  }
 0x649   :  { %5445 = vmatpush1.bf16.msra.mxu0 %v9620_v45 }
 0x64a   :  { %5446 = vmatprep.subr.bf16.mxu0 %v9625_v47  ;;  %8419 = vmatpush3.bf16.msra.mxu1 %v9705_v41  ;;  %v9674_v47 = vld [vmem:[#allocation2 + $0x1024] ss:$16 sps:$4 sm:$0xff]   ;;  %v9715_v41 = vld [vmem:[#allocation2 + $0x1168] ss:$16 sps:$4 sm:$0xff]  }
 0x64b   :  { %5930 = vmatprep.subr.bf16.mxu1 %v9708_v29  ;;  %v9780_v29 = vld [vmem:[#allocation2 + $0x1284] ss:$16 sps:$4 sm:$0xff]  }
 0x64d   :  { %5447 = vmatpush1.bf16.msra.mxu0 %v9623_v43  ;;  %v9672_v43 = vld [vmem:[#allocation2 + $0x1020] ss:$16 sps:$4 sm:$0xff]  }
 0x64e   :  { %5448 = vmatprep.subr.bf16.mxu0 %v9628_v48  ;;  %v9679_v48 = vld [vmem:[#allocation2 + $0x1044] ss:$16 sps:$4 sm:$0xff]  }
 0x651   :  { %5449 = vmatpush1.bf16.msra.mxu0 %v9626_v4  ;;  %v9677_v4 = vld [vmem:[#allocation2 + $0x1040] ss:$16 sps:$4 sm:$0xff]  }
 0x652   :  { %5450 = vmatprep.subr.bf16.mxu0 %v9631_v14  ;;  %v9684_v14 = vld [vmem:[#allocation2 + $0x1064] ss:$16 sps:$4 sm:$0xff]  }
 0x655   :  { %5451 = vmatpush1.bf16.msra.mxu0 %v9629_v49  ;;  %v9682_v49 = vld [vmem:[#allocation2 + $0x1060] ss:$16 sps:$4 sm:$0xff]  }
 0x656   :  { %5452 = vmatprep.subr.bf16.mxu0 %v9634_v50  ;;  %v9689_v50 = vld [vmem:[#allocation2 + $0x1084] ss:$16 sps:$4 sm:$0xff]  }
 0x659   :  { %5453 = vmatpush1.bf16.msra.mxu0 %v9632_v53  ;;  %v9687_v53 = vld [vmem:[#allocation2 + $0x1080] ss:$16 sps:$4 sm:$0xff]  }
 0x65a   :  { %5454 = vmatprep.subr.bf16.mxu0 %v9637_v56  ;;  %v9694_v56 = vld [vmem:[#allocation2 + $0x10a4] ss:$16 sps:$4 sm:$0xff]  }
 0x65d   :  { %5455 = vmatpush1.bf16.msra.mxu0 %v9635_v2  ;;  %v5344_v2 = vld [vmem:[#allocation7 + $0x6] ss:$8 sm:$0x3] }
 0x65e   :  { %5456 = vmatprep.subr.bf16.mxu0 %v9640_v23  ;;  %v9692_v23 = vld [vmem:[#allocation2 + $0x10a0] ss:$16 sps:$4 sm:$0xff]  }
 0x661   :  { %5457 = vmatpush1.bf16.msra.mxu0 %v9638_v57  ;;  %v9699_v57 = vld [vmem:[#allocation2 + $0x10c4] ss:$16 sps:$4 sm:$0xff]  }
 0x662   :  { %5887 = vmatprep.subr.bf16.mxu0 %v9644_v58  ;;  %v5349_v58 = vrot.slane %v5344_v2, %v10183_v51 }
 0x664   :  { %5475 = vmatmul.mubr.bf16.vlgmr.msra.gmra.mrb[16].mxu0 %v9641_v38  ;;  %v5353_v38 = vrot.slane %v5344_v2, %v10187_v54  ;;  %v9744_v2 = vld [vmem:[#allocation2 + $0x108c] ss:$16 sps:$4 sm:$0xff]  }
 0x665   :  { %5888 = vmatpush1.bf16.msra.mxu0 %v9642_v42  ;;  %5919 = vmatprep.mubr.bf16.mxu0 %v10044_v46  ;;  %v9697_v42 = vld [vmem:[#allocation2 + $0x10c0] ss:$16 sps:$4 sm:$0xff]  }
 0x666   :  { %5889 = vmatprep.subr.bf16.mxu0 %v9647_v59 }
 0x669   :  { %5890 = vmatpush1.bf16.msra.mxu0 %v9645_v60  ;;  %v9704_v60 = vld [vmem:[#allocation2 + $0x10e4] ss:$16 sps:$4 sm:$0xff]  }
 0x66a   :  { %5891 = vmatprep.subr.bf16.mxu0 %v9650_v61 }
 0x66d   :  { %5892 = vmatpush1.bf16.msra.mxu0 %v9648_v11 }
 0x66e   :  { %5893 = vmatprep.subr.bf16.mxu0 %v9653_v62 }
 0x671   :  { %5894 = vmatpush1.bf16.msra.mxu0 %v9651_v63 }
 0x672   :  { %5895 = vmatprep.subr.bf16.mxu0 %v9656_v0 }
 0x675   :  { %5896 = vmatpush1.bf16.msra.mxu0 %v9654_v1 }
 0x676   :  { %5897 = vmatprep.subr.bf16.mxu0 %v9659_v3  ;;  %v9702_v3 = vld [vmem:[#allocation2 + $0x10e0] ss:$16 sps:$4 sm:$0xff]  }
 0x679   :  { %5898 = vmatpush1.bf16.msra.mxu0 %v9657_v5 }
 0x67a   :  { %5899 = vmatprep.subr.bf16.mxu0 %v9662_v6  ;;  %v9756_v6 = vld [vmem:[#allocation2 + $0x1204] ss:$16 sps:$4 sm:$0xff]  }
 0x67d   :  { %5900 = vmatpush1.bf16.msra.mxu0 %v9660_v8 }
 0x67e   :  { %5901 = vmatprep.subr.bf16.mxu0 %v9665_v9 }
 0x681   :  { %5902 = vmatpush1.bf16.msra.mxu0 %v9663_v10 }
 0x682   :  { %6133 = vmatprep.subr.bf16.mxu0 %v9669_v13 }
 0x717   :  { %v8398_v30 = vpop.f32.mrb[12].mxu0 }
 0x718   :  { %v8399_v31 = vpop.f32.mrb[13].mxu0 }
 0x719   :  { %v8400_v32 = vadd.f32 %v8399_v31, %v8398_v30  ;;  %v8401_v33 = vpop.f32.mrb[14].mxu0  ;;  %v9720_v30 = vld [vmem:[#allocation2 + $0x118c] ss:$16 sps:$4 sm:$0xff]   ;;  %v9778_v31 = vld [vmem:[#allocation2 + $0x1280] ss:$16 sps:$4 sm:$0xff]  }
 0x71a   :  { %v8402_v35 = vpop.f32.mrb[15].mxu0 }
 0x71b   :  { %v8403_v36 = vadd.f32 %v8402_v35, %v8401_v33  ;;  %v5319_v37 = vadd.f32 %v8400_v32, %v5187_v34  ;;  %v9718_v32 = vld [vmem:[#allocation2 + $0x1188] ss:$16 sps:$4 sm:$0xff]   ;;  %v9786_v33 = vld [vmem:[#allocation2 + $0x12a4] ss:$16 sps:$4 sm:$0xff]   ;;  %v9784_v35 = vld [vmem:[#allocation2 + $0x12a0] ss:$16 sps:$4 sm:$0xff]  }
 0x71d   :  { %v5322_v39 = vadd.f32 %v8403_v36, %v5187_v34  ;;  %v9723_v34 = vld [vmem:[#allocation2 + $0x11ac] ss:$16 sps:$4 sm:$0xff]   ;;  %v9721_v36 = vld [vmem:[#allocation2 + $0x11a8] ss:$16 sps:$4 sm:$0xff]  }
 0x71f   :  { %v10297_v45 = vpack.c.bf16 %v5322_v39, %v5319_v37  ;;  %v9726_v37 = vld [vmem:[#allocation2 + $0x11cc] ss:$16 sps:$4 sm:$0xff]   ;;  %v9724_v39 = vld [vmem:[#allocation2 + $0x11c8] ss:$16 sps:$4 sm:$0xff]  }
 0x721   :  { %5920 = vmatmul.mubr.bf16.vlgmr.msra.gmra.mrb[20].mxu0 %v10297_v45 }
 0x722   :  { %6134 = vmatpush1.bf16.msra.mxu0 %v9667_v40  ;;  %6165 = vmatprep.mubr.bf16.mxu0 %v10044_v46  ;;  %v9729_v40 = vld [vmem:[#allocation2 + $0x11ec] ss:$16 sps:$4 sm:$0xff]  }
 0x723   :  { %6135 = vmatprep.subr.bf16.mxu0 %v9674_v47  ;;  %v9727_v47 = vld [vmem:[#allocation2 + $0x11e8] ss:$16 sps:$4 sm:$0xff]  }
 0x726   :  { %6136 = vmatpush1.bf16.msra.mxu0 %v9672_v43  ;;  %v9732_v43 = vld [vmem:[#allocation2 + $0x100c] ss:$16 sps:$4 sm:$0xff]  }
 0x727   :  { %6137 = vmatprep.subr.bf16.mxu0 %v9679_v48  ;;  %v9730_v48 = vld [vmem:[#allocation2 + $0x1008] ss:$16 sps:$4 sm:$0xff]  }
 0x72a   :  { %6138 = vmatpush1.bf16.msra.mxu0 %v9677_v4  ;;  %v9735_v4 = vld [vmem:[#allocation2 + $0x102c] ss:$16 sps:$4 sm:$0xff]  }
 0x72b   :  { %6139 = vmatprep.subr.bf16.mxu0 %v9684_v14  ;;  %v9733_v14 = vld [vmem:[#allocation2 + $0x1028] ss:$16 sps:$4 sm:$0xff]  }
 0x72e   :  { %6140 = vmatpush1.bf16.msra.mxu0 %v9682_v49  ;;  %v9738_v49 = vld [vmem:[#allocation2 + $0x104c] ss:$16 sps:$4 sm:$0xff]  }
 0x72f   :  { %6141 = vmatprep.subr.bf16.mxu0 %v9689_v50  ;;  %v9736_v50 = vld [vmem:[#allocation2 + $0x1048] ss:$16 sps:$4 sm:$0xff]  }
 0x732   :  { %6142 = vmatpush1.bf16.msra.mxu0 %v9687_v53  ;;  %v9741_v53 = vld [vmem:[#allocation2 + $0x106c] ss:$16 sps:$4 sm:$0xff]  }
 0x733   :  { %6143 = vmatprep.subr.bf16.mxu0 %v9694_v56  ;;  %v9739_v56 = vld [vmem:[#allocation2 + $0x1068] ss:$16 sps:$4 sm:$0xff]  }
 0x736   :  { %6144 = vmatpush1.bf16.msra.mxu0 %v9692_v23  ;;  %v9742_v23 = vld [vmem:[#allocation2 + $0x1088] ss:$16 sps:$4 sm:$0xff]  }
 0x737   :  { %v5476_v59 = vpop.f32.mrb[16].mxu0  ;;  %6145 = vmatprep.subr.bf16.mxu0 %v9699_v57  ;;  %v9747_v57 = vld [vmem:[#allocation2 + $0x10ac] ss:$16 sps:$4 sm:$0xff]  }
 0x738   :  { %v5477_v61 = vadd.f32 %v5476_v59, %v5349_v58  ;;  %v5478_v11 = vpop.f32.mrb[17].mxu0  ;;  %v9751_v59 = vld [vmem:[#allocation2 + $0x10e8] ss:$16 sps:$4 sm:$0xff]  }
 0x739   :  { %v5479_v62 = vadd.f32 %v5478_v11, %v5353_v38  ;;  %v5480_v63 = vpop.f32.mrb[18].mxu0  ;;  %v9765_v11 = vld [vmem:[#allocation2 + $0x122c] ss:$16 sps:$4 sm:$0xff]  }
 0x73a   :  { %v5481_v0 = vadd.f32 %v5480_v63, %v5349_v58  ;;  %v5482_v1 = vpop.f32.mrb[19].mxu0  ;;  %6146 = vmatpush1.bf16.msra.mxu0 %v9697_v42  ;;  %v5485_v8 = vmax.f32 %v5477_v61, 0.0  ;;  %v9750_v58 = vld [vmem:[#allocation2 + $0x10cc] ss:$16 sps:$4 sm:$0xff]   ;;  %v9757_v61 = vld [vmem:[#allocation2 + $0x1208] ss:$16 sps:$4 sm:$0xff]  }
 0x73b   :  { %v5483_v5 = vadd.f32 %v5482_v1, %v5353_v38  ;;  %6147 = vmatprep.subr.bf16.mxu0 %v9704_v60  ;;  %v5486_v10 = vmax.f32 %v5479_v62, 0.0  ;;  %v9748_v38 = vld [vmem:[#allocation2 + $0x10c8] ss:$16 sps:$4 sm:$0xff]   ;;  %v9753_v42 = vld [vmem:[#allocation2 + $0x10ec] ss:$16 sps:$4 sm:$0xff]  }
 0x73c   :  { %v5487_v9 = vmax.f32 %v5481_v0, 0.0  ;;  %v9759_v60 = vld [vmem:[#allocation2 + $0x120c] ss:$16 sps:$4 sm:$0xff]   ;;  %v9763_v62 = vld [vmem:[#allocation2 + $0x1228] ss:$16 sps:$4 sm:$0xff]  }
 0x73d   :  { %v5488_v12 = vmax.f32 %v5483_v5, 0.0  ;;  %v9771_v63 = vld [vmem:[#allocation2 + $0x124c] ss:$16 sps:$4 sm:$0xff]   ;;  %v9769_v0 = vld [vmem:[#allocation2 + $0x1248] ss:$16 sps:$4 sm:$0xff]  }
 0x73e   :  { %v5489_v13 = vpack.c.bf16 %v5487_v9, %v5485_v8  ;;  %6148 = vmatpush1.bf16.msra.mxu0 %v9702_v3  ;;  %v9777_v1 = vld [vmem:[#allocation2 + $0x126c] ss:$16 sps:$4 sm:$0xff]   ;;  %v9775_v3 = vld [vmem:[#allocation2 + $0x1268] ss:$16 sps:$4 sm:$0xff]   ;;  %v9792_v9 = vld [vmem:[#allocation2 + $0x12c4] ss:$16 sps:$4 sm:$0xff]  }
 0x73f   :  { %v5490_v17 = vpack.c.bf16 %v5488_v12, %v5486_v10  ;;  %6412 = vmatprep.subr.bf16.mxu0 %v9756_v6  ;;  %v9783_v5 = vld [vmem:[#allocation2 + $0x128c] ss:$16 sps:$4 sm:$0xff]   ;;  %v9781_v6 = vld [vmem:[#allocation2 + $0x1288] ss:$16 sps:$4 sm:$0xff]  }
 0x740   :  { %v9789_v8 = vld [vmem:[#allocation2 + $0x12ac] ss:$16 sps:$4 sm:$0xff]   ;;  %v9793_v12 = vld [vmem:[#allocation2 + $0x12c8] ss:$16 sps:$4 sm:$0xff]  }
 0x741   :  { %5652 = vmatprep.mubr.bf16.mxu1 %v5490_v17  ;;  %6166 = vmatmul.mubr.bf16.vlgmr.msra.gmra.mrb[20].mxu0 %v10271_v7  ;;  %v9795_v10 = vld [vmem:[#allocation2 + $0x12cc] ss:$16 sps:$4 sm:$0xff]   ;;  %v9796_v17 = vld [vmem:[#allocation2 + $0x12e0] ss:$16 sps:$4 sm:$0xff]  }
 0x742   :  { %5653 = vmatmul.mubr.bf16.vlgmr.msra.gmra.mrb[16].mxu1 %v5489_v13  ;;  %6413 = vmatpush1.bf16.msra.mxu0 %v9754_v16  ;;  %v9798_v13 = vld [vmem:[#allocation2 + $0x12e4] ss:$16 sps:$4 sm:$0xff]   ;;  %v9801_v16 = vld [vmem:[#allocation2 + $0x12ec] ss:$16 sps:$4 sm:$0xff]  }
 0x743   :  { %5931 = vmatpush1.bf16.msra.mxu1 %v9706_v18  ;;  %5962 = vmatprep.mubr.bf16.mxu1 %v10044_v46  ;;  %v9799_v18 = vld [vmem:[#allocation2 + $0x12e8] ss:$16 sps:$4 sm:$0xff]  }
 0x744   :  { %5932 = vmatprep.subr.bf16.mxu1 %v9711_v21  ;;  %6414 = vmatprep.subr.bf16.mxu0 %v9762_v22  ;;  %v9804_v21 = vld [vmem:[#allocation4 + $0x484] ss:$8 sps:$4 sm:$0xff]  }
 0x745   :  { %6444 = vmatprep.mubr.bf16.mxu0 %v10044_v46 }
 0x746   :  { %6415 = vmatpush1.bf16.msra.mxu0 %v9760_v27 }
 0x747   :  { %5933 = vmatpush1.bf16.msra.mxu1 %v9709_v15  ;;  %6416 = vmatprep.subr.bf16.mxu0 %v9768_v44 }
 0x748   :  { %5934 = vmatprep.subr.bf16.mxu1 %v9714_v24  ;;  %v5523_v24 = vld [vmem:[#allocation7 + $0x7] ss:$0 sm:$0xff] }
 0x74a   :  { %6417 = vmatpush1.bf16.msra.mxu0 %v9766_v25 }
 0x74b   :  { %5935 = vmatpush1.bf16.msra.mxu1 %v9712_v26  ;;  %6418 = vmatprep.subr.bf16.mxu0 %v9774_v19 }
 0x74c   :  { %5936 = vmatprep.subr.bf16.mxu1 %v9717_v20 }
 0x74e   :  { %6419 = vmatpush1.bf16.msra.mxu0 %v9772_v28  ;;  %v9802_v28 = vld [vmem:[#allocation4 + $0x480] ss:$8 sps:$4 sm:$0xff]  }
 0x74f   :  { %5937 = vmatpush1.bf16.msra.mxu1 %v9715_v41  ;;  %6420 = vmatprep.subr.bf16.mxu0 %v9780_v29  ;;  %v9807_v29 = vld [vmem:[#allocation4 + $0x494] ss:$8 sps:$4 sm:$0xff]  }
 0x750   :  { %5938 = vmatprep.subr.bf16.mxu1 %v9720_v30  ;;  %v9805_v30 = vld [vmem:[#allocation4 + $0x490] ss:$8 sps:$4 sm:$0xff]  }
 0x752   :  { %6421 = vmatpush1.bf16.msra.mxu0 %v9778_v31  ;;  %v9810_v31 = vld [vmem:[#allocation4 + $0x4a4] ss:$8 sps:$4 sm:$0xff]  }
 0x753   :  { %5939 = vmatpush1.bf16.msra.mxu1 %v9718_v32  ;;  %6422 = vmatprep.subr.bf16.mxu0 %v9786_v33  ;;  %v9808_v32 = vld [vmem:[#allocation4 + $0x4a0] ss:$8 sps:$4 sm:$0xff]   ;;  %v9813_v33 = vld [vmem:[#allocation4 + $0x4b4] ss:$8 sps:$4 sm:$0xff]  }
 0x754   :  { %5940 = vmatprep.subr.bf16.mxu1 %v9723_v34  ;;  %v9811_v34 = vld [vmem:[#allocation4 + $0x4b0] ss:$8 sps:$4 sm:$0xff]  }
 0x756   :  { %6423 = vmatpush1.bf16.msra.mxu0 %v9784_v35  ;;  %v9816_v35 = vld [vmem:[#allocation4 + $0x4c4] ss:$8 sps:$4 sm:$0xff]  }
 0x757   :  { %5941 = vmatpush1.bf16.msra.mxu1 %v9721_v36  ;;  %6424 = vmatprep.subr.bf16.mxu0 %v9792_v9  ;;  %v9814_v36 = vld [vmem:[#allocation4 + $0x4c0] ss:$8 sps:$4 sm:$0xff]  }
 0x758   :  { %5942 = vmatprep.subr.bf16.mxu1 %v9726_v37  ;;  %v9819_v37 = vld [vmem:[#allocation4 + $0x4d4] ss:$8 sps:$4 sm:$0xff]   ;;  %v9907_v9 = vld [vmem:[#allocation6 + $0x1a0] sm:$0xff]  }
 0x75b   :  { %5943 = vmatpush1.bf16.msra.mxu1 %v9724_v39  ;;  %v9817_v39 = vld [vmem:[#allocation4 + $0x4d0] ss:$8 sps:$4 sm:$0xff]  }
 0x75c   :  { %5944 = vmatprep.subr.bf16.mxu1 %v9729_v40  ;;  %v9822_v40 = vld [vmem:[#allocation4 + $0x4e4] ss:$8 sps:$4 sm:$0xff]  }
 0x75f   :  { %5945 = vmatpush1.bf16.msra.mxu1 %v9727_v47  ;;  %v9820_v47 = vld [vmem:[#allocation4 + $0x4e0] ss:$8 sps:$4 sm:$0xff]  }
 0x760   :  { %6176 = vmatprep.subr.bf16.mxu1 %v9732_v43  ;;  %v9825_v43 = vld [vmem:[#allocation4 + $0x4f4] ss:$8 sps:$4 sm:$0xff]  }
 0x762   :  { %5963 = vmatmul.mubr.bf16.vlgmr.msra.gmra.mrb[20].mxu1 %v10297_v45  ;;  %v9745_v45 = vld [vmem:[#allocation2 + $0x10a8] ss:$16 sps:$4 sm:$0xff]  }
 0x763   :  { %6177 = vmatpush1.bf16.msra.mxu1 %v9730_v48  ;;  %6208 = vmatprep.mubr.bf16.mxu1 %v10044_v46  ;;  %v9823_v48 = vld [vmem:[#allocation4 + $0x4f0] ss:$8 sps:$4 sm:$0xff]  }
 0x764   :  { %6178 = vmatprep.subr.bf16.mxu1 %v9735_v4  ;;  %v9828_v4 = vld [vmem:[#allocation4 + $0x504] ss:$8 sps:$4 sm:$0xff]  }
 0x767   :  { %6179 = vmatpush1.bf16.msra.mxu1 %v9733_v14  ;;  %v9826_v14 = vld [vmem:[#allocation4 + $0x500] ss:$8 sps:$4 sm:$0xff]  }
 0x768   :  { %6180 = vmatprep.subr.bf16.mxu1 %v9738_v49  ;;  %v9831_v49 = vld [vmem:[#allocation4 + $0x514] ss:$8 sps:$4 sm:$0xff]  }
 0x76b   :  { %6181 = vmatpush1.bf16.msra.mxu1 %v9736_v50  ;;  %v9829_v50 = vld [vmem:[#allocation4 + $0x510] ss:$8 sps:$4 sm:$0xff]  }
 0x76c   :  { %6182 = vmatprep.subr.bf16.mxu1 %v9741_v53  ;;  %v9834_v53 = vld [vmem:[#allocation4 + $0x524] ss:$8 sps:$4 sm:$0xff]  }
 0x76f   :  { %6183 = vmatpush1.bf16.msra.mxu1 %v9739_v56  ;;  %v9832_v56 = vld [vmem:[#allocation4 + $0x520] ss:$8 sps:$4 sm:$0xff]  }
 0x770   :  { %6184 = vmatprep.subr.bf16.mxu1 %v9744_v2  ;;  %v9837_v2 = vld [vmem:[#allocation4 + $0x534] ss:$8 sps:$4 sm:$0xff]  }
 0x773   :  { %6185 = vmatpush1.bf16.msra.mxu1 %v9742_v23  ;;  %v9835_v23 = vld [vmem:[#allocation4 + $0x530] ss:$8 sps:$4 sm:$0xff]  }
 0x774   :  { %6186 = vmatprep.subr.bf16.mxu1 %v9747_v57  ;;  %v9840_v57 = vld [vmem:[#allocation4 + $0x544] ss:$8 sps:$4 sm:$0xff]  }
 0x777   :  { %6187 = vmatpush1.bf16.msra.mxu1 %v9745_v45  ;;  %v9838_v45 = vld [vmem:[#allocation4 + $0x540] ss:$8 sps:$4 sm:$0xff]  }
 0x778   :  { %6188 = vmatprep.subr.bf16.mxu1 %v9750_v58  ;;  %v9843_v58 = vld [vmem:[#allocation4 + $0x554] ss:$8 sps:$4 sm:$0xff]  }
 0x77b   :  { %6189 = vmatpush1.bf16.msra.mxu1 %v9748_v38  ;;  %v9841_v38 = vld [vmem:[#allocation4 + $0x550] ss:$8 sps:$4 sm:$0xff]  }
 0x77c   :  { %6190 = vmatprep.subr.bf16.mxu1 %v9753_v42  ;;  %v9846_v42 = vld [vmem:[#allocation4 + $0x564] ss:$8 sps:$4 sm:$0xff]  }
 0x77f   :  { %6191 = vmatpush1.bf16.msra.mxu1 %v9751_v59  ;;  %v9844_v59 = vld [vmem:[#allocation4 + $0x560] ss:$8 sps:$4 sm:$0xff]  }
 0x780   :  { %6455 = vmatprep.subr.bf16.mxu1 %v9759_v60  ;;  %v9849_v60 = vld [vmem:[#allocation4 + $0x574] ss:$8 sps:$4 sm:$0xff]  }
 0x782   :  { %6209 = vmatmul.mubr.bf16.vlgmr.msra.gmra.mrb[20].mxu1 %v10271_v7  ;;  %v9787_v7 = vld [vmem:[#allocation2 + $0x12a8] ss:$16 sps:$4 sm:$0xff]  }
 0x783   :  { %6456 = vmatpush1.bf16.msra.mxu1 %v9757_v61  ;;  %6487 = vmatprep.mubr.bf16.mxu1 %v10044_v46  ;;  %v9790_v46 = vld [vmem:[#allocation2 + $0x12c0] ss:$16 sps:$4 sm:$0xff]  }
 0x784   :  { %6457 = vmatprep.subr.bf16.mxu1 %v9765_v11  ;;  %6425 = vmatpush1.bf16.msra.mxu0 %v9790_v46  ;;  %v9847_v61 = vld [vmem:[#allocation4 + $0x570] ss:$8 sps:$4 sm:$0xff]   ;;  %v9852_v11 = vld [vmem:[#allocation4 + $0x584] ss:$8 sps:$4 sm:$0xff]  }
 0x785   :  { %6426 = vmatprep.subr.bf16.mxu0 %v9798_v13  ;;  %v6507_v46 = vld [vmem:[#allocation7 + $0x20] ss:$8 sm:$0xf] }
 0x786   :  { %v6520_v13 = vrot.slane %v6507_v46, %v10185_v52 }
 0x787   :  { %6458 = vmatpush1.bf16.msra.mxu1 %v9763_v62  ;;  %v9898_v62 = vld [vmem:[#allocation6 + $0x1c0] sm:$0xff]  }
 0x788   :  { %6459 = vmatprep.subr.bf16.mxu1 %v9771_v63  ;;  %6427 = vmatpush1.bf16.msra.mxu0 %v9796_v17  ;;  %v9899_v63 = vld [vmem:[#allocation6 + $0x180] sm:$0xff]   ;;  %v6524_v17 = vrot.slane %v6507_v46, %v10189_v55 }
 0x789   :  { %6946 = vmatprep.subr.bf16.mxu0 %v9804_v21 }
 0x78b   :  { %6460 = vmatpush1.bf16.msra.mxu1 %v9769_v0  ;;  %v9900_v0 = vld [vmem:[#allocation6 + $0x1c8] sm:$0xff]  }
 0x78c   :  { %6461 = vmatprep.subr.bf16.mxu1 %v9777_v1  ;;  %v9901_v1 = vld [vmem:[#allocation6 + $0x188] sm:$0xff]  }
 0x78f   :  { %6462 = vmatpush1.bf16.msra.mxu1 %v9775_v3  ;;  %v9902_v3 = vld [vmem:[#allocation6 + $0x1d0] sm:$0xff]  }
 0x790   :  { %6463 = vmatprep.subr.bf16.mxu1 %v9783_v5  ;;  %v9903_v5 = vld [vmem:[#allocation6 + $0x190] sm:$0xff]  }
 0x793   :  { %6464 = vmatpush1.bf16.msra.mxu1 %v9781_v6  ;;  %v9904_v6 = vld [vmem:[#allocation6 + $0x1d8] sm:$0xff]  }
 0x794   :  { %6465 = vmatprep.subr.bf16.mxu1 %v9789_v8  ;;  %v9905_v8 = vld [vmem:[#allocation6 + $0x198] sm:$0xff]  }
 0x797   :  { %6466 = vmatpush1.bf16.msra.mxu1 %v9787_v7  ;;  %v9906_v7 = vld [vmem:[#allocation6 + $0x1e0] sm:$0xff]  }
 0x798   :  { %6467 = vmatprep.subr.bf16.mxu1 %v9795_v10  ;;  %v9908_v10 = vld [vmem:[#allocation6 + $0x1e8] sm:$0xff]  }
 0x79b   :  { %6468 = vmatpush1.bf16.msra.mxu1 %v9793_v12  ;;  %v6512_v12 = vrot.slane %v6507_v46, %v10183_v51 }
 0x79c   :  { %6469 = vmatprep.subr.bf16.mxu1 %v9801_v16  ;;  %v6516_v16 = vrot.slane %v6507_v46, %v10187_v54  ;;  %v9897_v46 = vld [vmem:[#allocation4 + $0x674] ss:$8 sps:$4 sm:$0xff]  }
 0x79f   :  { %6470 = vmatpush1.bf16.msra.mxu1 %v9799_v18 }
 0x7a0   :  { %8426 = vmatprep.subr.bf16.mxu1 %v9898_v62  ;;  %v9877_v62 = vld [vmem:[#allocation4 + $0x610] ss:$8 sps:$4 sm:$0xff]  }
 0x815   :  { %v8420_v22 = vpop.f32.mrb[16].mxu1 }
 0x816   :  { %v8421_v27 = vpop.f32.mrb[17].mxu1 }
 0x817   :  { %v8422_v15 = vadd.f32 %v8421_v27, %v8420_v22  ;;  %v8423_v44 = vpop.f32.mrb[18].mxu1 }
 0x818   :  { %v8424_v25 = vpop.f32.mrb[19].mxu1 }
 0x819   :  { %v8425_v26 = vadd.f32 %v8424_v25, %v8423_v44  ;;  %v5655_v19 = vadd.f32 %v8422_v15, %v5523_v24 }
 0x81b   :  { %v5658_v20 = vadd.f32 %v8425_v26, %v5523_v24 }
 0x81d   :  { %v6219_v41 = vpack.c.bf16 %v5658_v20, %v5655_v19 }
 0x81f   :  { %6445 = vmatmul.mubr.bf16.vlgmr.msra.gmra.mrb[20].mxu0 %v6219_v41  ;;  %6488 = vmatmul.mubr.bf16.vlgmr.msra.gmra.mrb[20].mxu1 %v6219_v41 }
 0x820   :  { %6947 = vmatpush1.bf16.msra.mxu0 %v9802_v28  ;;  %8427 = vmatpush3.bf16.msra.mxu1 %v9899_v63  ;;  %v9882_v63 = vld [vmem:[#allocation4 + $0x624] ss:$8 sps:$4 sm:$0xff]  }
 0x821   :  { %6948 = vmatprep.subr.bf16.mxu0 %v9807_v29  ;;  %8428 = vmatprep.subr.bf16.mxu1 %v9900_v0  ;;  %v9880_v0 = vld [vmem:[#allocation4 + $0x620] ss:$8 sps:$4 sm:$0xff]  }
 0x824   :  { %6949 = vmatpush1.bf16.msra.mxu0 %v9805_v30  ;;  %8429 = vmatpush3.bf16.msra.mxu1 %v9901_v1  ;;  %v9885_v1 = vld [vmem:[#allocation4 + $0x634] ss:$8 sps:$4 sm:$0xff]  }
 0x825   :  { %6950 = vmatprep.subr.bf16.mxu0 %v9810_v31  ;;  %8430 = vmatprep.subr.bf16.mxu1 %v9902_v3  ;;  %v9883_v3 = vld [vmem:[#allocation4 + $0x630] ss:$8 sps:$4 sm:$0xff]  }
 0x828   :  { %6951 = vmatpush1.bf16.msra.mxu0 %v9808_v32  ;;  %8431 = vmatpush3.bf16.msra.mxu1 %v9903_v5  ;;  %v9888_v5 = vld [vmem:[#allocation4 + $0x644] ss:$8 sps:$4 sm:$0xff]  }
 0x829   :  { %6952 = vmatprep.subr.bf16.mxu0 %v9813_v33  ;;  %8432 = vmatprep.subr.bf16.mxu1 %v9904_v6  ;;  %v9886_v6 = vld [vmem:[#allocation4 + $0x640] ss:$8 sps:$4 sm:$0xff]  }
 0x82c   :  { %6953 = vmatpush1.bf16.msra.mxu0 %v9811_v34  ;;  %8433 = vmatpush3.bf16.msra.mxu1 %v9905_v8  ;;  %v9891_v8 = vld [vmem:[#allocation4 + $0x654] ss:$8 sps:$4 sm:$0xff]  }
 0x82d   :  { %6954 = vmatprep.subr.bf16.mxu0 %v9816_v35  ;;  %8434 = vmatprep.subr.bf16.mxu1 %v9906_v7  ;;  %v9889_v7 = vld [vmem:[#allocation4 + $0x650] ss:$8 sps:$4 sm:$0xff]  }
 0x830   :  { %6955 = vmatpush1.bf16.msra.mxu0 %v9814_v36  ;;  %8435 = vmatpush3.bf16.msra.mxu1 %v9907_v9  ;;  %v9894_v9 = vld [vmem:[#allocation4 + $0x664] ss:$8 sps:$4 sm:$0xff]  }
 0x831   :  { %6956 = vmatprep.subr.bf16.mxu0 %v9819_v37  ;;  %8436 = vmatprep.subr.bf16.mxu1 %v9908_v10  ;;  %v9892_v10 = vld [vmem:[#allocation4 + $0x660] ss:$8 sps:$4 sm:$0xff]  }
 0x834   :  { %6957 = vmatpush1.bf16.msra.mxu0 %v9817_v39 }
 0x835   :  { %6958 = vmatprep.subr.bf16.mxu0 %v9822_v40 }
 0x838   :  { %6959 = vmatpush1.bf16.msra.mxu0 %v9820_v47 }
 0x839   :  { %6960 = vmatprep.subr.bf16.mxu0 %v9825_v43 }
 0x83c   :  { %6961 = vmatpush1.bf16.msra.mxu0 %v9823_v48  ;;  %v9850_v48 = vld [vmem:[#allocation4 + $0x580] ss:$8 sps:$4 sm:$0xff]  }
 0x83d   :  { %6962 = vmatprep.subr.bf16.mxu0 %v9828_v4  ;;  %v9855_v4 = vld [vmem:[#allocation4 + $0x594] ss:$8 sps:$4 sm:$0xff]  }
 0x840   :  { %6963 = vmatpush1.bf16.msra.mxu0 %v9826_v14  ;;  %v9853_v14 = vld [vmem:[#allocation4 + $0x590] ss:$8 sps:$4 sm:$0xff]  }
 0x841   :  { %6964 = vmatprep.subr.bf16.mxu0 %v9831_v49  ;;  %v9858_v49 = vld [vmem:[#allocation4 + $0x5a4] ss:$8 sps:$4 sm:$0xff]  }
 0x844   :  { %6965 = vmatpush1.bf16.msra.mxu0 %v9829_v50  ;;  %v9856_v50 = vld [vmem:[#allocation4 + $0x5a0] ss:$8 sps:$4 sm:$0xff]  }
 0x845   :  { %6966 = vmatprep.subr.bf16.mxu0 %v9834_v53  ;;  %v9861_v53 = vld [vmem:[#allocation4 + $0x5b4] ss:$8 sps:$4 sm:$0xff]  }
 0x848   :  { %6967 = vmatpush1.bf16.msra.mxu0 %v9832_v56  ;;  %v9859_v56 = vld [vmem:[#allocation4 + $0x5b0] ss:$8 sps:$4 sm:$0xff]  }
 0x849   :  { %6968 = vmatprep.subr.bf16.mxu0 %v9837_v2  ;;  %v9864_v2 = vld [vmem:[#allocation4 + $0x5c4] ss:$8 sps:$4 sm:$0xff]  }
 0x84c   :  { %6969 = vmatpush1.bf16.msra.mxu0 %v9835_v23  ;;  %v9862_v23 = vld [vmem:[#allocation4 + $0x5c0] ss:$8 sps:$4 sm:$0xff]  }
 0x84d   :  { %6970 = vmatprep.subr.bf16.mxu0 %v9840_v57  ;;  %v9867_v57 = vld [vmem:[#allocation4 + $0x5d4] ss:$8 sps:$4 sm:$0xff]  }
 0x850   :  { %6971 = vmatpush1.bf16.msra.mxu0 %v9838_v45  ;;  %v9865_v45 = vld [vmem:[#allocation4 + $0x5d0] ss:$8 sps:$4 sm:$0xff]  }
 0x851   :  { %6972 = vmatprep.subr.bf16.mxu0 %v9843_v58  ;;  %v9870_v58 = vld [vmem:[#allocation4 + $0x5e4] ss:$8 sps:$4 sm:$0xff]  }
 0x854   :  { %6973 = vmatpush1.bf16.msra.mxu0 %v9841_v38  ;;  %v9868_v38 = vld [vmem:[#allocation4 + $0x5e0] ss:$8 sps:$4 sm:$0xff]  }
 0x855   :  { %6974 = vmatprep.subr.bf16.mxu0 %v9846_v42  ;;  %v9873_v42 = vld [vmem:[#allocation4 + $0x5f4] ss:$8 sps:$4 sm:$0xff]  }
 0x858   :  { %6975 = vmatpush1.bf16.msra.mxu0 %v9844_v59  ;;  %v9871_v59 = vld [vmem:[#allocation4 + $0x5f0] ss:$8 sps:$4 sm:$0xff]  }
 0x859   :  { %6976 = vmatprep.subr.bf16.mxu0 %v9849_v60  ;;  %v9876_v60 = vld [vmem:[#allocation4 + $0x604] ss:$8 sps:$4 sm:$0xff]  }
 0x85c   :  { %6977 = vmatpush1.bf16.msra.mxu0 %v9847_v61  ;;  %v9874_v61 = vld [vmem:[#allocation4 + $0x600] ss:$8 sps:$4 sm:$0xff]  }
 0x85d   :  { %6989 = vmatprep.subr.bf16.mxu0 %v9852_v11  ;;  %v9879_v11 = vld [vmem:[#allocation4 + $0x614] ss:$8 sps:$4 sm:$0xff]  }
 0x8f2   :  { %v6446_v18 = vpop.f32.mrb[20].mxu0  ;;  %v6489_v21 = vpop.f32.mrb[20].mxu1 }
 0x8f3   :  { %v6529_v22 = vadd.f32 %v6512_v12, %v6446_v18  ;;  %v6531_v27 = vadd.f32 %v6520_v13, %v6489_v21  ;;  %v6448_v15 = vpop.f32.mrb[21].mxu0  ;;  %v6491_v44 = vpop.f32.mrb[21].mxu1  ;;  %v9912_v18 = vld [vmem:[#allocation6 + $0x1f8] sm:$0xff]  }
 0x8f4   :  { %v6530_v24 = vadd.f32 %v6516_v16, %v6448_v15  ;;  %v6532_v25 = vadd.f32 %v6524_v17, %v6491_v44  ;;  %v6450_v26 = vpop.f32.mrb[22].mxu0  ;;  %v6493_v19 = vpop.f32.mrb[22].mxu1  ;;  %v9913_v21 = vld [vmem:[#allocation6 + $0x1b8] sm:$0xff]  }
 0x8f5   :  { %v6533_v20 = vadd.f32 %v6512_v12, %v6450_v26  ;;  %v6535_v28 = vadd.f32 %v6520_v13, %v6493_v19  ;;  %v6452_v41 = vpop.f32.mrb[23].mxu0  ;;  %v6495_v29 = vpop.f32.mrb[23].mxu1  ;;  %v6537_v31 = vmax.f32 %v6529_v22, 0.0  ;;  %v6539_v32 = vmax.f32 %v6531_v27, 0.0  ;;  %v9895_v12 = vld [vmem:[#allocation4 + $0x670] ss:$8 sps:$4 sm:$0xff]  }
 0x8f6   :  { %v6534_v30 = vadd.f32 %v6516_v16, %v6452_v41  ;;  %v6536_v52 = vadd.f32 %v6524_v17, %v6495_v29  ;;  %v6538_v34 = vmax.f32 %v6530_v24, 0.0  ;;  %v6540_v35 = vmax.f32 %v6532_v25, 0.0  ;;  %v9909_v13 = vld [vmem:[#allocation6 + $0x1a8] sm:$0xff]   ;;  %v9910_v16 = vld [vmem:[#allocation6 + $0x1f0] sm:$0xff]  }
 0x8f7   :  { %v6541_v33 = vmax.f32 %v6533_v20, 0.0  ;;  %v6543_v55 = vmax.f32 %v6535_v28, 0.0  ;;  %8437 = vmatpush3.bf16.msra.mxu1 %v9909_v13  ;;  %v9911_v17 = vld [vmem:[#allocation6 + $0x1b0] sm:$0xff]   ;;  %v10045_v22 = vmov 0.0  }
 0x8f8   :  { %v6542_v36 = vmax.f32 %v6534_v30, 0.0  ;;  %v6544_v37 = vmax.f32 %v6536_v52, 0.0  ;;  %8438 = vmatprep.subr.bf16.mxu1 %v9910_v16  ;;  %v6614_v27 = vld [vmem:[#allocation7 + $0x21] ss:$8 sm:$0x3] }
 0x8f9   :  { %v6545_v39 = vpack.c.bf16 %v6541_v33, %v6537_v31  ;;  %v10314_v40 = vpack.c.bf16 %v6543_v55, %v6539_v32  ;;  %v6619_v15 = vrot.slane %v6614_v27, %v10183_v51  ;;  %v6623_v44 = vrot.slane %v6614_v27, %v10187_v54  ;;  %v9915_v51 = vld [vmem:[#allocation6 + $0x208] sm:$0xff]   ;;  %v9916_v54 = vld [vmem:[#allocation6 + $0x210] sm:$0xff]  }
 0x8fa   :  { %v6546_v47 = vpack.c.bf16 %v6542_v36, %v6538_v34  ;;  %v6548_v43 = vpack.c.bf16 %v6544_v37, %v6540_v35  ;;  %v9914_v34 = vld [vmem:[#allocation6 + $0x200] sm:$0xff]   ;;  %v9917_v35 = vld [vmem:[#allocation6 + $0x218] sm:$0xff]   ;;  %v9919_v37 = vld [vmem:[#allocation6 + $0x228] sm:$0xff]  }
 0x8fb   :  { %8439 = vmatpush3.bf16.msra.mxu1 %v9911_v17  ;;  %v9918_v36 = vld [vmem:[#allocation6 + $0x220] sm:$0xff]  }
 0x8fc   :  { %6978 = vmatprep.mubr.bf16.mxu0 %v6546_v47  ;;  %8440 = vmatprep.subr.bf16.mxu1 %v9912_v18 }
 0x8fd   :  { %6979 = vmatmul.mubr.bf16.vlgmr.msra.gmra.mrb[24].mxu0 %v6545_v39  ;;  %v9920_v39 = vld [vmem:[#allocation6 + $0x230] sm:$0xff]  }
 0x8fe   :  { %6990 = vmatpush1.bf16.msra.mxu0 %v9850_v48  ;;  %7021 = vmatprep.mubr.bf16.mxu0 %v6548_v43  ;;  %v7070_v43 = vld [vmem:[#allocation7 + $0x22] ss:$0 sm:$0xff] }
 0x8ff   :  { %6991 = vmatprep.subr.bf16.mxu0 %v9855_v4  ;;  %8441 = vmatpush3.bf16.msra.mxu1 %v9913_v21 }
 0x900   :  { %8466 = vmatprep.subr.bf16.mxu1 %v10045_v22 }
 0x902   :  { %6992 = vmatpush1.bf16.msra.mxu0 %v9853_v14 }
 0x903   :  { %6993 = vmatprep.subr.bf16.mxu0 %v9858_v49 }
 0x906   :  { %6994 = vmatpush1.bf16.msra.mxu0 %v9856_v50 }
 0x907   :  { %6995 = vmatprep.subr.bf16.mxu0 %v9861_v53 }
 0x90a   :  { %6996 = vmatpush1.bf16.msra.mxu0 %v9859_v56 }
 0x90b   :  { %6997 = vmatprep.subr.bf16.mxu0 %v9864_v2 }
 0x90e   :  { %6998 = vmatpush1.bf16.msra.mxu0 %v9862_v23 }
 0x90f   :  { %6999 = vmatprep.subr.bf16.mxu0 %v9867_v57  ;;  %v9922_v57 = vld [vmem:[#allocation6 + $0x240] sm:$0xff]  }
 0x912   :  { %7000 = vmatpush1.bf16.msra.mxu0 %v9865_v45 }
 0x913   :  { %7001 = vmatprep.subr.bf16.mxu0 %v9870_v58  ;;  %v9923_v58 = vld [vmem:[#allocation6 + $0x248] sm:$0xff]  }
 0x916   :  { %7002 = vmatpush1.bf16.msra.mxu0 %v9868_v38  ;;  %v9924_v38 = vld [vmem:[#allocation6 + $0x250] sm:$0xff]  }
 0x917   :  { %7003 = vmatprep.subr.bf16.mxu0 %v9873_v42  ;;  %v9925_v42 = vld [vmem:[#allocation6 + $0x258] sm:$0xff]  }
 0x91a   :  { %7004 = vmatpush1.bf16.msra.mxu0 %v9871_v59  ;;  %v9926_v59 = vld [vmem:[#allocation6 + $0x260] sm:$0xff]  }
 0x91b   :  { %7005 = vmatprep.subr.bf16.mxu0 %v9876_v60  ;;  %v9927_v60 = vld [vmem:[#allocation6 + $0x268] sm:$0xff]  }
 0x91e   :  { %7006 = vmatpush1.bf16.msra.mxu0 %v9874_v61  ;;  %v9928_v61 = vld [vmem:[#allocation6 + $0x270] sm:$0xff]  }
 0x91f   :  { %7007 = vmatprep.subr.bf16.mxu0 %v9879_v11  ;;  %v9929_v11 = vld [vmem:[#allocation6 + $0x278] sm:$0xff]  }
 0x922   :  { %7008 = vmatpush1.bf16.msra.mxu0 %v9877_v62  ;;  %v7227_v62 = vld [vmem:[#allocation7 + $0x23] ss:$0 sm:$0xff] }
 0x923   :  { %7009 = vmatprep.subr.bf16.mxu0 %v9882_v63 }
 0x926   :  { %7010 = vmatpush1.bf16.msra.mxu0 %v9880_v0 }
 0x927   :  { %7011 = vmatprep.subr.bf16.mxu0 %v9885_v1 }
 0x92a   :  { %7012 = vmatpush1.bf16.msra.mxu0 %v9883_v3 }
 0x92b   :  { %7013 = vmatprep.subr.bf16.mxu0 %v9888_v5 }
 0x92e   :  { %7014 = vmatpush1.bf16.msra.mxu0 %v9886_v6 }
 0x92f   :  { %7015 = vmatprep.subr.bf16.mxu0 %v9891_v8 }
 0x932   :  { %7016 = vmatpush1.bf16.msra.mxu0 %v9889_v7 }
 0x933   :  { %7017 = vmatprep.subr.bf16.mxu0 %v9894_v9 }
 0x936   :  { %7018 = vmatpush1.bf16.msra.mxu0 %v9892_v10  ;;  %v7336_v10 = vld [vmem:[#allocation7 + $0x24] ss:$0 sm:$0xff] }
 0x937   :  { %7019 = vmatprep.subr.bf16.mxu0 %v9897_v46 }
 0x93a   :  { %7020 = vmatpush1.bf16.msra.mxu0 %v9895_v12 }
 0x93d   :  { %7022 = vmatmul.mubr.bf16.vlgmr.msra.gmra.mrb[24].mxu0 %v10314_v40  ;;  %v9921_v40 = vld [vmem:[#allocation6 + $0x238] sm:$0xff]  }
 0xa10   :  { %v7023_v24 = vpop.f32.mrb[24].mxu0 }
 0xa11   :  { %v8530_v25 = vadd.f32 %v7023_v24, %v6619_v15  ;;  %v7025_v26 = vpop.f32.mrb[25].mxu0 }
 0xa12   :  { %v8531_v19 = vadd.f32 %v7025_v26, %v6623_v44  ;;  %v7027_v20 = vpop.f32.mrb[26].mxu0 }
 0xa13   :  { %v8532_v28 = vadd.f32 %v7027_v20, %v6619_v15  ;;  %v7029_v41 = vpop.f32.mrb[27].mxu0  ;;  %v7032_v30 = vmax.f32 %v8530_v25, 0.0 }
 0xa14   :  { %v8533_v29 = vadd.f32 %v7029_v41, %v6623_v44  ;;  %v7033_v31 = vmax.f32 %v8531_v19, 0.0 }
 0xa15   :  { %v7034_v52 = vmax.f32 %v8532_v28, 0.0 }
 0xa16   :  { %v7035_v32 = vmax.f32 %v8533_v29, 0.0 }
 0xa17   :  { %v7036_v33 = vpack.c.bf16 %v7034_v52, %v7032_v30 }
 0xa18   :  { %v7037_v55 = vpack.c.bf16 %v7035_v32, %v7033_v31 }
 0xa1a   :  { %7199 = vmatprep.mubr.bf16.mxu1 %v7037_v55 }
 0xa1b   :  { %7200 = vmatmul.mubr.bf16.vlgmr.msra.gmra.mrb[24].mxu1 %v7036_v33 }
 0xa1c   :  { %8467 = vmatpush3.bf16.msra.mxu1 %v9914_v34  ;;  %8482 = vmatprep.mubr.msk.bf16.mxu1 %vm10046_vm0, %v10045_v22 }
 0xa1d   :  { %8468 = vmatprep.subr.bf16.mxu1 %v10045_v22 }
 0xa20   :  { %8469 = vmatpush3.bf16.msra.mxu1 %v9915_v51 }
 0xa21   :  { %8470 = vmatprep.subr.bf16.mxu1 %v10045_v22 }
 0xa24   :  { %8471 = vmatpush3.bf16.msra.mxu1 %v9916_v54 }
 0xa25   :  { %8472 = vmatprep.subr.bf16.mxu1 %v10045_v22 }
 0xa28   :  { %8473 = vmatpush3.bf16.msra.mxu1 %v9917_v35 }
 0xa29   :  { %8474 = vmatprep.subr.bf16.mxu1 %v10045_v22 }
 0xa2c   :  { %8475 = vmatpush3.bf16.msra.mxu1 %v9918_v36 }
 0xa2d   :  { %8476 = vmatprep.subr.bf16.mxu1 %v10045_v22 }
 0xa30   :  { %8477 = vmatpush3.bf16.msra.mxu1 %v9919_v37 }
 0xa31   :  { %8478 = vmatprep.subr.bf16.mxu1 %v10045_v22 }
 0xa34   :  { %8479 = vmatpush3.bf16.msra.mxu1 %v9920_v39 }
 0xa35   :  { %8480 = vmatprep.subr.bf16.mxu1 %v10045_v22 }
 0xa38   :  { %8481 = vmatpush3.bf16.msra.mxu1 %v9921_v40 }
 0xa39   :  { %8486 = vmatprep.subr.bf16.mxu1 %v10045_v22 }
 0xaee   :  { %v8442_v47 = vpop.f32.mrb[24].mxu1 }
 0xaef   :  { %v8443_v48 = vpop.f32.mrb[25].mxu1 }
 0xaf0   :  { %v8444_v4 = vadd.f32 %v8443_v48, %v8442_v47  ;;  %v8445_v14 = vpop.f32.mrb[26].mxu1 }
 0xaf1   :  { %v8446_v49 = vpop.f32.mrb[27].mxu1 }
 0xaf2   :  { %v7202_v50 = vadd.f32 %v8444_v4, %v7070_v43  ;;  %v8447_v53 = vadd.f32 %v8446_v49, %v8445_v14 }
 0xaf4   :  { %v7205_v56 = vadd.f32 %v8447_v53, %v7070_v43  ;;  %v7208_v2 = vmax.f32 %v7202_v50, 0.0 }
 0xaf6   :  { %v7209_v23 = vmax.f32 %v7205_v56, 0.0 }
 0xaf8   :  { %v7210_v45 = vpack.c.bf16 %v7209_v23, %v7208_v2 }
 0xafa   :  { %8483 = vmatmul.mubr.bf16.vlgmr.msra.gmra.mrb[28].mxu1 %v7210_v45 }
 0xafb   :  { %8487 = vmatpush3.bf16.msra.mxu1 %v9922_v57  ;;  %8502 = vmatprep.mubr.msk.bf16.mxu1 %vm10046_vm0, %v10045_v22 }
 0xafc   :  { %8488 = vmatprep.subr.bf16.mxu1 %v10045_v22 }
 0xaff   :  { %8489 = vmatpush3.bf16.msra.mxu1 %v9923_v58 }
 0xb00   :  { %8490 = vmatprep.subr.bf16.mxu1 %v10045_v22 }
 0xb03   :  { %8491 = vmatpush3.bf16.msra.mxu1 %v9924_v38 }
 0xb04   :  { %8492 = vmatprep.subr.bf16.mxu1 %v10045_v22 }
 0xb07   :  { %8493 = vmatpush3.bf16.msra.mxu1 %v9925_v42 }
 0xb08   :  { %8494 = vmatprep.subr.bf16.mxu1 %v10045_v22 }
 0xb0b   :  { %8495 = vmatpush3.bf16.msra.mxu1 %v9926_v59 }
 0xb0c   :  { %8496 = vmatprep.subr.bf16.mxu1 %v10045_v22 }
 0xb0f   :  { %8497 = vmatpush3.bf16.msra.mxu1 %v9927_v60 }
 0xb10   :  { %8498 = vmatprep.subr.bf16.mxu1 %v10045_v22 }
 0xb13   :  { %8499 = vmatpush3.bf16.msra.mxu1 %v9928_v61 }
 0xb14   :  { %8500 = vmatprep.subr.bf16.mxu1 %v10045_v22 }
 0xb17   :  { %8501 = vmatpush3.bf16.msra.mxu1 %v9929_v11 }
 0xbcd   :  { %v7310_v63 = vpop.f32.mrb[28].mxu1 }
 0xbce   :  { %v7311_v0 = vadd.f32 %v7310_v63, %v7227_v62  ;;  %v8484_v1 = vpop.f32.mrb[29].mxu1 }
 0xbcf   :  { %v7313_v3 = vpop.f32.mrb[30].mxu1 }
 0xbd0   :  { %v7314_v5 = vadd.f32 %v7313_v3, %v7227_v62  ;;  %v8485_v6 = vpop.f32.mrb[31].mxu1  ;;  %v7317_v8 = vmax.f32 %v7311_v0, 0.0 }
 0xbd2   :  { %v7318_v7 = vmax.f32 %v7314_v5, 0.0 }
 0xbd4   :  { %v7319_v9 = vpack.c.bf16 %v7318_v7, %v7317_v8 }
 0xbd6   :  { %8503 = vmatmul.mubr.bf16.vlgmr.msra.gmra.mrb[32].mxu1 %v7319_v9 }
 0xca9   :  { %v7419_v46 = vpop.f32.mrb[32].mxu1 }
 0xcaa   :  { %v7420_v12 = vadd.f32 %v7419_v46, %v7336_v10  ;;  %v8504_v13 = vpop.f32.mrb[33].mxu1 }
 0xcab   :  { %v7422_v16 = vpop.f32.mrb[34].mxu1 }
 0xcac   :  { %v7426_v17 = vsub.f32 0.0, %v7420_v12  ;;  %v7423_v18 = vadd.f32 %v7422_v16, %v7336_v10  ;;  %v8505_v21 = vpop.f32.mrb[35].mxu1 }
 0xcae   :  { %v7428_v22 = vmul.f32 1.442695, %v7426_v17  ;;  %v7427_v27 = vsub.f32 0.0, %v7423_v18 }
 0xcb0   :  { %9930 = vpow2.f32 %v7428_v22  ;;  %v7430_v15 = vmul.f32 1.442695, %v7427_v27 }
 0xcb2   :  { %9932 = vpow2.f32 %v7430_v15 }
 0xcba   :  { %v9931_v44 = vpop.eup %9930 }
 0xcbb   :  { %v7432_v24 = vadd.f32 1.0, %v9931_v44 }
 0xcbc   :  { %v9933_v25 = vpop.eup %9932 }
 0xcbd   :  { %9934 = vrcp.f32 %v7432_v24  ;;  %v7433_v26 = vadd.f32 1.0, %v9933_v25 }
 0xcbf   :  { %9936 = vrcp.f32 %v7433_v26 }
 0xcc7   :  { %v9935_v19 = vpop.eup %9934 }
 0xcc8   :  { %7438 = vst [vmem:[%s10352_s7] sm:$0xff] %v9935_v19 }
 0xcc9   :  { %v9937_v20 = vpop.eup %9936 }
 0xcca   :  { %7439 = vst [vmem:[%s10352_s7 + $0x8] sm:$0xff] %v9937_v20 }
 0xccb   :  { %7444 = vsyncpa [#allocation3], 1 }
 0xccc   :  { %7445 = vsyncpa [#allocation5], 1 }
 0xccd   :  { %7446 = vsyncpa [#allocation8], 1 }

</bundles_post_ra>
